<compile_context>
chip_gen: v5e
topology: v5e:2x2
jax: 0.10.0
libtpu: 0.0.40
codegen_flags: <defaults>
</compile_context>

<pallas_src>
import functools

import jax
import jax.numpy as jnp
from jax.experimental import pallas as pl
from jax.experimental.pallas import tpu as pltpu


def _round_up(x, m):
    return (x + m - 1) // m * m


# ---------------------------------------------------------------------------
# Propogator Pallas kernel
# ---------------------------------------------------------------------------
def _propogator_kernel(x_ref, w1_ref, b1_ref, w2_ref, out_ref, *, d_out):
    # x: (tile, Dp_in) packed [sc | a_in | a_out | 0-pad], bf16 or f32.
    x = x_ref[...]

    # One wide matmul produces [r_pre | z_pre | h_io_pre] (f32 accumulation).
    y = jnp.dot(x, w1_ref[...], preferred_element_type=jnp.float32) + b1_ref[...]

    r = jax.nn.sigmoid(y[:, :d_out])              # (tile, Dp_out)
    z = jax.nn.sigmoid(y[:, d_out:2 * d_out])     # (tile, Dp_out)
    h_io = y[:, 2 * d_out:]                       # (tile, Dp_out), includes b_t

    sc = x[:, :d_out].astype(jnp.float32)         # sc lives in the leading lanes
    rx = (r * sc).astype(w2_ref.dtype)            # garbage lanes killed by zero
                                                  # rows of w2
    h_hat = jnp.tanh(
        h_io + jnp.dot(rx, w2_ref[...], preferred_element_type=jnp.float32))

    # Padded lanes of the output are garbage (finite) and sliced off outside.
    out_ref[...] = ((1.0 - z) * sc + z * h_hat).astype(out_ref.dtype)


# ---------------------------------------------------------------------------
# Weight fusion (hoisted: call ONCE, reuse across every propagator call)
# ---------------------------------------------------------------------------
def fuse_propogator_params(params, state_dim, use_bf16_matmul=True):
    """Fuse the three (3D, D) weights of the Propogator into
         w1 : (Dp_in, 3*Dp_out)   -> [r | z | h_io] pre-activations
         b1 : (1, 3*Dp_out)
         w2 : (Dp_out, Dp_out)    -> (r*sc) contribution to h_hat
    matching the packed activation layout x = [sc | a_in | a_out | 0]."""
    d = state_dim
    dp_in = _round_up(max(3 * d, 128), 128)
    dp_out = _round_up(max(d, 128), 128)

    def split(w):                              # rows ordered [a_in; a_out; sc]
        return w[0:d], w[d:2 * d], w[2 * d:3 * d]

    def block(w_sc, w_in, w_out):              # -> (Dp_in, Dp_out)
        top = jnp.concatenate([w_sc, w_in, w_out], axis=0)          # (3d, d)
        return jnp.pad(top, ((0, dp_in - 3 * d), (0, dp_out - d)))

    r_in, r_out, r_sc = split(params["w_r"])
    z_in, z_out, z_sc = split(params["w_z"])
    t_in, t_out, t_sc = split(params["w_t"])

    w1 = jnp.concatenate(
        [block(r_sc, r_in, r_out),
         block(z_sc, z_in, z_out),
         block(jnp.zeros_like(t_sc), t_in, t_out)],   # sc part goes via r*sc
        axis=1)                                        # (Dp_in, 3*Dp_out)

    pad_b = lambda b: jnp.pad(b, ((0, 0), (0, dp_out - d)))
    b1 = jnp.concatenate([pad_b(params["b_r"]), pad_b(params["b_z"]),
                          pad_b(params["b_t"])], axis=1)   # (1, 3*Dp_out)

    w2 = jnp.pad(t_sc, ((0, dp_out - d), (0, dp_out - d)))  # (Dp_out, Dp_out)

    mm_dtype = jnp.bfloat16 if use_bf16_matmul else jnp.float32
    return dict(w1=w1.astype(mm_dtype), b1=b1, w2=w2.astype(mm_dtype))


@functools.partial(jax.jit, static_argnames=("tile_n",))
def propogator_pallas(a_in, a_out, state_cur, fused, tile_n=1024):
    """Propogator forward using pre-fused weights from fuse_propogator_params."""
    N, D = a_in.shape
    w1, b1, w2 = fused["w1"], fused["b1"], fused["w2"]
    dp_in = w1.shape[0]
    dp_out = w2.shape[0]
    act_dtype = w1.dtype

    # Big row tile, but capped at ~N/2 so the grid has >=2 steps (v7x megacore).
    half = _round_up(pl.cdiv(N, 2), 8)
    tile = max(8, min(tile_n, half))
    n_pad = _round_up(N, tile)

    # Single packed activation slab: [sc | a_in | a_out], padded to Dp_in lanes.
    x = jnp.concatenate([state_cur, a_in, a_out], axis=1).astype(act_dtype)
    x = jnp.pad(x, ((0, n_pad - N), (0, dp_in - 3 * D)))       # (n_pad, Dp_in)

    x_spec = pl.BlockSpec((tile, dp_in), lambda i: (i, 0))
    out_spec = pl.BlockSpec((tile, dp_out), lambda i: (i, 0))
    const = lambda shape: pl.BlockSpec(shape, lambda i: (0, 0))

    kernel = functools.partial(_propogator_kernel, d_out=dp_out)

    # Weights are tiny ((128,384)+(128,128) bf16 ~ 128 KiB); constant-index
    # blocks are not re-DMA'd across grid steps, so no special buffering needed.
    out = pl.pallas_call(
        kernel,
        out_shape=jax.ShapeDtypeStruct((n_pad, dp_out), state_cur.dtype),
        grid_spec=pltpu.PrefetchScalarGridSpec(
            num_scalar_prefetch=0,
            grid=(n_pad // tile,),
            in_specs=[x_spec,
                      const((dp_in, 3 * dp_out)),
                      const((1, 3 * dp_out)),
                      const((dp_out, dp_out))],
            out_specs=out_spec,
        ),
        compiler_params=pltpu.CompilerParams(
            dimension_semantics=("parallel",)),
    )(x, w1, b1, w2)

    return out[:N, :D]


# ---------------------------------------------------------------------------
# Pure-JAX reference for the Propogator (mirrors the PyTorch forward)
# ---------------------------------------------------------------------------
def propogator_ref(a_in, a_out, sc, p):
    a = jnp.concatenate([a_in, a_out, sc], axis=1)
    r = jax.nn.sigmoid(a @ p["w_r"] + p["b_r"])
    z = jax.nn.sigmoid(a @ p["w_z"] + p["b_z"])
    joined = jnp.concatenate([a_in, a_out, r * sc], axis=1)
    h_hat = jnp.tanh(joined @ p["w_t"] + p["b_t"])
    return (1.0 - z) * sc + z * h_hat


def init_propogator_params(key, state_dim, scale=0.02):
    """GGNN-style init: N(0, 0.02) weights (stored transposed), zero bias."""
    keys = jax.random.split(key, 3)
    def lin(k):
        w = scale * jax.random.normal(k, (3 * state_dim, state_dim), jnp.float32)
        b = jnp.zeros((1, state_dim), jnp.float32)
        return w, b
    w_r, b_r = lin(keys[0])
    w_z, b_z = lin(keys[1])
    w_t, b_t = lin(keys[2])
    return dict(w_r=w_r, b_r=b_r, w_z=w_z, b_z=b_z, w_t=w_t, b_t=b_t)


# ---------------------------------------------------------------------------
# Full GGNN forward (message passing + readout) using the Pallas propagator
# ---------------------------------------------------------------------------
def init_ggnn_params(key, state_dim, annotation_dim, n_edge_types, n_node, n_steps):
    keys = jax.random.split(key, 2 * n_edge_types + 3)
    scale = 0.02
    in_w = [scale * jax.random.normal(keys[i], (state_dim, state_dim), jnp.float32)
            for i in range(n_edge_types)]
    out_w = [scale * jax.random.normal(keys[n_edge_types + i],
                                       (state_dim, state_dim), jnp.float32)
             for i in range(n_edge_types)]
    in_b = [jnp.zeros((state_dim,), jnp.float32) for _ in range(n_edge_types)]
    out_b = [jnp.zeros((state_dim,), jnp.float32) for _ in range(n_edge_types)]
    prop = init_propogator_params(keys[-3], state_dim)
    out1_w = scale * jax.random.normal(keys[-2], (state_dim + annotation_dim,
                                                  state_dim), jnp.float32)
    out2_w = scale * jax.random.normal(keys[-1], (state_dim, 1), jnp.float32)
    return dict(in_w=in_w, in_b=in_b, out_w=out_w, out_b=out_b, prop=prop,
                out1_w=out1_w, out1_b=jnp.zeros((state_dim,), jnp.float32),
                out2_w=out2_w, out2_b=jnp.zeros((1,), jnp.float32),
                n_node=n_node, n_steps=n_steps)


def ggnn_forward(prop_state, annotation, A, params, prop_apply):
    """Mirrors GGNN.forward exactly (propagator called inside the per-edge-type
    loop, index-assignment scatter with last-write-wins on duplicate indices —
    same as the PyTorch reference).  prop_state: (T, D); A: list of (n_edges, 2)
    int32 [src, dest] edge lists, one per edge type."""
    n_steps = params["n_steps"]
    n_edge_types = len(A)
    # TODO(synk): dynamic index_select / scatter-assign message passing and the
    # small readout MLP stay in plain JAX (XLA) — no clean static BlockSpec.
    for _ in range(n_steps):
        in_states = jnp.zeros_like(prop_state)
        out_states = jnp.zeros_like(prop_state)
        for i in range(n_edge_types):
            src = A[i][:, 0]
            dest = A[i][:, 1]
            incoming = prop_state[src] @ params["in_w"][i] + params["in_b"][i]
            outgoing = prop_state[dest] @ params["out_w"][i] + params["out_b"][i]
            in_states = in_states.at[dest].set(prop_state[dest] + incoming)
            out_states = out_states.at[src].set(prop_state[src] + outgoing)
            prop_state = prop_apply(in_states, out_states, prop_state)
    join_state = jnp.concatenate([prop_state, annotation], axis=1)
    h = jnp.tanh(join_state @ params["out1_w"] + params["out1_b"])
    output = h @ params["out2_w"] + params["out2_b"]          # (T, 1)
    output = output[1:].reshape(-1, params["n_node"], 1)
    return output.sum(axis=2)


# ---------------------------------------------------------------------------
if __name__ == "__main__":
    key = jax.random.PRNGKey(0)

    # ---- 1) Standalone Propogator check (exercises packing + tiling) -------
    state_dim = 32
    N = 1000                                    # not a multiple of the tile
    k_in, k_out, k_sc, k_p, k_g = jax.random.split(key, 5)
    a_in = jax.random.normal(k_in, (N, state_dim), jnp.float32)
    a_out = jax.random.normal(k_out, (N, state_dim), jnp.float32)
    state_cur = jax.random.normal(k_sc, (N, state_dim), jnp.float32)
    prop_params = init_propogator_params(k_p, state_dim)
    ref = propogator_ref(a_in, a_out, state_cur, prop_params)

    # f32-matmul path: exact check.
    fused_f32 = fuse_propogator_params(prop_params, state_dim,
                                       use_bf16_matmul=False)
    out_f32 = propogator_pallas(a_in, a_out, state_cur, fused_f32)
    jax.block_until_ready(out_f32)
    assert bool(jnp.allclose(out_f32, ref, atol=1e-5, rtol=1e-5)), \
        "propagator (f32) mismatch"

    # bf16-matmul path (default recommendation on v5e/v6e/v7x).
    fused_bf16 = fuse_propogator_params(prop_params, state_dim,
                                        use_bf16_matmul=True)
    out_bf16 = propogator_pallas(a_in, a_out, state_cur, fused_bf16)
    jax.block_until_ready(out_bf16)
    assert bool(jnp.allclose(out_bf16, ref, atol=5e-2, rtol=5e-2)), \
        "propagator (bf16) mismatch"

    # ---- 2) Full GGNN forward (small shapes) --------------------------------
    annotation_dim = 8
    n_node = 4
    batch = 2
    n_edge_types = 2
    n_steps = 2
    T = batch * n_node + 1                      # so output[1:] reshapes cleanly

    gk1, gk2 = jax.random.split(k_g)
    annotation = jax.random.normal(gk1, (T, annotation_dim), jnp.float32)
    prop_state0 = jnp.pad(annotation, ((0, 0), (0, state_dim - annotation_dim)))
    # Edge lists (src, dest); unique src / dest per edge type.
    A = [jnp.array([[0, 1], [2, 3], [4, 5], [6, 7]], jnp.int32),
         jnp.array([[1, 0], [3, 2], [5, 6], [8, 7]], jnp.int32)]
    ggnn_params = init_ggnn_params(gk2, state_dim, annotation_dim,
                                   n_edge_types, n_node, n_steps)

    # Fuse the propagator weights ONCE (hoisted out of the step loop).
    ggnn_fused_f32 = fuse_propogator_params(ggnn_params["prop"], state_dim,
                                            use_bf16_matmul=False)
    ggnn_fused_bf16 = fuse_propogator_params(ggnn_params["prop"], state_dim,
                                             use_bf16_matmul=True)

    prop_apply_ref = lambda ai, ao, sc: propogator_ref(ai, ao, sc,
                                                       ggnn_params["prop"])
    prop_apply_f32 = lambda ai, ao, sc: propogator_pallas(ai, ao, sc,
                                                          ggnn_fused_f32)
    prop_apply_bf16 = lambda ai, ao, sc: propogator_pallas(ai, ao, sc,
                                                           ggnn_fused_bf16)

    ggnn_ref_out = ggnn_forward(prop_state0, annotation, A, ggnn_params,
                                prop_apply_ref)

    ggnn_out_f32 = ggnn_forward(prop_state0, annotation, A, ggnn_params,
                                prop_apply_f32)
    jax.block_until_ready(ggnn_out_f32)
    assert ggnn_out_f32.shape == (batch, n_node)
    assert bool(jnp.allclose(ggnn_out_f32, ggnn_ref_out, atol=1e-4, rtol=1e-4)), \
        "GGNN forward (f32) mismatch"

    ggnn_out_bf16 = ggnn_forward(prop_state0, annotation, A, ggnn_params,
                                 prop_apply_bf16)
    jax.block_until_ready(ggnn_out_bf16)
    assert bool(jnp.allclose(ggnn_out_bf16, ggnn_ref_out, atol=2e-2, rtol=2e-2)), \
        "GGNN forward (bf16) mismatch"

    print("KERNEL_OK")
</pallas_src>

<mosaic_0001>
module attributes {stable_mosaic.version = 11 : i64} {
  func.func @_propogator_kernel(%arg0: i32, %arg1: memref<504x128xf32, #tpu.memory_space<vmem>>, %arg2: memref<128x384xf32, #tpu.memory_space<vmem>>, %arg3: memref<1x384xf32, #tpu.memory_space<vmem>>, %arg4: memref<128x128xf32, #tpu.memory_space<vmem>>, %arg5: memref<504x128xf32, #tpu.memory_space<vmem>>) attributes {dimension_semantics = [#tpu.dimension_semantics<parallel>], iteration_bounds = array<i64: 2>, scalar_prefetch = 0 : i64, scratch_operands = 0 : i64, tpu.core_type = #tpu.core_type<tc>, window_params = [{transform_indices = @transform_0, window_bounds = array<i64: 504, 128>}, {pipeline_mode = #tpu.pipeline_mode<synchronous>, transform_indices = @transform_1, window_bounds = array<i64: 128, 384>}, {pipeline_mode = #tpu.pipeline_mode<synchronous>, transform_indices = @transform_2, window_bounds = array<i64: 1, 384>}, {pipeline_mode = #tpu.pipeline_mode<synchronous>, transform_indices = @transform_3, window_bounds = array<i64: 128, 128>}, {transform_indices = @transform_4, window_bounds = array<i64: 504, 128>}]} {
    %c0 = arith.constant 0 : index
    %c0_0 = arith.constant 0 : index
    %0 = vector.load %arg1[%c0, %c0_0] : memref<504x128xf32, #tpu.memory_space<vmem>>, vector<504x128xf32>
    %c0_1 = arith.constant 0 : index
    %c0_2 = arith.constant 0 : index
    %1 = vector.load %arg2[%c0_1, %c0_2] : memref<128x384xf32, #tpu.memory_space<vmem>>, vector<128x384xf32>
    %cst = arith.constant dense<0.000000e+00> : vector<504x384xf32>
    %2 = tpu.matmul %0, %1, %cst {dimension_numbers = #tpu.dot_dimension_numbers<[1], [0], [0], [1], [0, 0, 1, 1], [], []>} : vector<504x128xf32>, vector<128x384xf32>, vector<504x384xf32> -> vector<504x384xf32>
    %c0_3 = arith.constant 0 : index
    %c0_4 = arith.constant 0 : index
    %3 = vector.load %arg3[%c0_3, %c0_4] : memref<1x384xf32, #tpu.memory_space<vmem>>, vector<1x384xf32>
    %4 = vector.broadcast %3 : vector<1x384xf32> to vector<504x384xf32>
    %5 = arith.addf %2, %4 : vector<504x384xf32>
    %6 = vector.extract_strided_slice %5 {offsets = [0, 0], sizes = [504, 128], strides = [1, 1]} : vector<504x384xf32> to vector<504x128xf32>
    %7 = arith.negf %6 : vector<504x128xf32>
    %8 = math.exp %7 : vector<504x128xf32>
    %cst_5 = arith.constant 1.000000e+00 : f32
    %9 = vector.broadcast %cst_5 : f32 to vector<504x128xf32>
    %10 = arith.addf %9, %8 : vector<504x128xf32>
    %11 = arith.divf %9, %10 : vector<504x128xf32>
    %12 = vector.extract_strided_slice %5 {offsets = [0, 128], sizes = [504, 128], strides = [1, 1]} : vector<504x384xf32> to vector<504x128xf32>
    %13 = arith.negf %12 : vector<504x128xf32>
    %14 = math.exp %13 : vector<504x128xf32>
    %cst_6 = arith.constant 1.000000e+00 : f32
    %15 = vector.broadcast %cst_6 : f32 to vector<504x128xf32>
    %16 = arith.addf %15, %14 : vector<504x128xf32>
    %17 = arith.divf %15, %16 : vector<504x128xf32>
    %18 = vector.extract_strided_slice %5 {offsets = [0, 256], sizes = [504, 128], strides = [1, 1]} : vector<504x384xf32> to vector<504x128xf32>
    %19 = arith.mulf %11, %0 : vector<504x128xf32>
    %c0_7 = arith.constant 0 : index
    %c0_8 = arith.constant 0 : index
    %20 = vector.load %arg4[%c0_7, %c0_8] : memref<128x128xf32, #tpu.memory_space<vmem>>, vector<128x128xf32>
    %cst_9 = arith.constant dense<0.000000e+00> : vector<504x128xf32>
    %21 = tpu.matmul %19, %20, %cst_9 {dimension_numbers = #tpu.dot_dimension_numbers<[1], [0], [0], [1], [0, 0, 1, 1], [], []>} : vector<504x128xf32>, vector<128x128xf32>, vector<504x128xf32> -> vector<504x128xf32>
    %22 = arith.addf %18, %21 : vector<504x128xf32>
    %23 = math.tanh %22 : vector<504x128xf32>
    %cst_10 = arith.constant 1.000000e+00 : f32
    %24 = vector.broadcast %cst_10 : f32 to vector<504x128xf32>
    %25 = arith.subf %24, %17 : vector<504x128xf32>
    %26 = arith.mulf %25, %0 : vector<504x128xf32>
    %27 = arith.mulf %17, %23 : vector<504x128xf32>
    %28 = arith.addf %26, %27 : vector<504x128xf32>
    %c0_11 = arith.constant 0 : index
    %c0_12 = arith.constant 0 : index
    %29 = vector.load %arg5[%c0_11, %c0_12] : memref<504x128xf32, #tpu.memory_space<vmem>>, vector<504x128xf32>
    tpu.vector_store %arg5[%c0_11, %c0_12], %28 {strides = array<i32>} : memref<504x128xf32, #tpu.memory_space<vmem>>, vector<504x128xf32>,
    return
  }
  func.func @transform_0(%arg0: i32) -> (i32, i32) {
    %c0_i32 = arith.constant 0 : i32
    %c0_i32_0 = arith.constant 0 : i32
    return %arg0, %c0_i32 : i32, i32
  }
  func.func @transform_1(%arg0: i32) -> (i32, i32) {
    %c0_i32 = arith.constant 0 : i32
    %c0_i32_0 = arith.constant 0 : i32
    %c0_i32_1 = arith.constant 0 : i32
    return %c0_i32, %c0_i32_0 : i32, i32
  }
  func.func @transform_2(%arg0: i32) -> (i32, i32) {
    %c0_i32 = arith.constant 0 : i32
    %c0_i32_0 = arith.constant 0 : i32
    %c0_i32_1 = arith.constant 0 : i32
    return %c0_i32, %c0_i32_0 : i32, i32
  }
  func.func @transform_3(%arg0: i32) -> (i32, i32) {
    %c0_i32 = arith.constant 0 : i32
    %c0_i32_0 = arith.constant 0 : i32
    %c0_i32_1 = arith.constant 0 : i32
    return %c0_i32, %c0_i32_0 : i32, i32
  }
  func.func @transform_4(%arg0: i32) -> (i32, i32) {
    %c0_i32 = arith.constant 0 : i32
    %c0_i32_0 = arith.constant 0 : i32
    return %arg0, %c0_i32 : i32, i32
  }
}

</mosaic_0001>

<bundles_post_ra>
// kernel: propogator_pallas.1
= control target key start
LH: loop header
LB: loop body
LE: loop exit
PB: predicated region body
PF: predicated region fallthrough
CT: control target
= control target key end

     0   :  { %s5062_s15 = smov 0   ;;  %s9184_s0 = inlined_call_operand.vmem [shape: f32[1008,128], index: 0, kind: input, shape index: {}]   ;;  %s9185_s1 = inlined_call_operand.vmem [shape: f32[128,384], index: 1, kind: input, shape index: {}]   ;;  %s9186_s2 = inlined_call_operand.vmem [shape: f32[1,384], index: 2, kind: input, shape index: {}]   ;;  %s9187_s3 = inlined_call_operand.vmem [shape: f32[128,128], index: 3, kind: input, shape index: {}]   ;;  %s9188_s4 = inlined_call_operand.vmem [shape: f32[1008,128], index: 4, kind: output, shape index: {}]  }
   0x1 LB: > { %s4114_s16 = sadd.s32 4294967295, %s5035_s15   ;;  %p4118_p0 = scmp.ge.s32.totalorder %s5035_s15, 1  ;;  %s5035_s15 = sphi %s5062_s15, %s14_s15  }
   0x2   : > { %p163_p1 = scmp.lt.s32.totalorder %s5035_s15, 3 }
   0x4   : > { %p164_p2 = pnand %p4118_p0, %p163_p1 }
   0x5   : > { %s189_s5 = smul.u32 (!%p164_p2), 63, %s4114_s16 }
   0x6   : > { %167 = sbr.rel (%p164_p2) target bundleno = 944 (0x3b0), region = 36 }
   0x7   : > { %p190_p3 = scmp.lt.s32.totalorder (!%p164_p2), %s189_s5, 125 }
   0xb   : > { %v309_v0 = vld [vmem:[%s9185_s1 + $0x168] sm:$0xff]  ;;  %v306_v1 = vld [vmem:[%s9185_s1 + $0x150] sm:$0xff]  ;;  %v303_v2 = vld [vmem:[%s9185_s1 + $0x138] sm:$0xff]  ;;  %s9452_s5 = smov (!%p190_p3, %s189_s5), 125 }
   0xc   : > { %320 = vmatpush.msra.mxu0 %v309_v0  ;;  %v300_v3 = vld [vmem:[%s9185_s1 + $0x120] sm:$0xff]  ;;  %v297_v4 = vld [vmem:[%s9185_s1 + $0x108] sm:$0xff]  ;;  %v294_v5 = vld [vmem:[%s9185_s1 + $0xf0] sm:$0xff]  ;;  %s4119_s19 = sshll.u32 %s9452_s5, 3 }
   0xd   : > { %v291_v6 = vld [vmem:[%s9185_s1 + $0xd8] sm:$0xff]  ;;  %v288_v7 = vld [vmem:[%s9185_s1 + $0xc0] sm:$0xff]  ;;  %v285_v8 = vld [vmem:[%s9185_s1 + $0xa8] sm:$0xff]  ;;  %s5123_s26 = scalar_lea.vmem %s9184_s0, %s4119_s19  ;;  %s5881_s17 = scalar_lea.vmem %s9188_s4, %s4119_s19 }
   0xe   : > { %321 = vmatpush.msra.mxu0 %v306_v1  ;;  %v282_v9 = vld [vmem:[%s9185_s1 + $0x90] sm:$0xff]  ;;  %v279_v10 = vld [vmem:[%s9185_s1 + $0x78] sm:$0xff]  ;;  %v276_v11 = vld [vmem:[%s9185_s1 + $0x60] sm:$0xff] }
   0xf   : > { %v273_v12 = vld [vmem:[%s9185_s1 + $0x48] sm:$0xff]  ;;  %v270_v13 = vld [vmem:[%s9185_s1 + $0x30] sm:$0xff]  ;;  %v267_v14 = vld [vmem:[%s9185_s1 + $0x18] sm:$0xff] }
  0x10   : > { %322 = vmatpush.msra.mxu0 %v303_v2  ;;  %v264_v15 = vld [vmem:[%s9185_s1] sm:$0xff]  ;;  %v5133_v17 = vld [vmem:[%s5123_s26 + $0x8] sm:$0xff]  ;;  %v5137_v18 = vld [vmem:[%s5123_s26 + $0x10] sm:$0xff] }
  0x11   : > { %v5129_v16 = vld [vmem:[%s5123_s26] sm:$0xff]  ;;  %v5141_v19 = vld [vmem:[%s5123_s26 + $0x18] sm:$0xff]  ;;  %v5149_v21 = vld [vmem:[%s5123_s26 + $0x28] sm:$0xff] }
  0x12   : > { %323 = vmatpush.msra.mxu0 %v300_v3  ;;  %v5145_v20 = vld [vmem:[%s5123_s26 + $0x20] sm:$0xff]  ;;  %v5153_v22 = vld [vmem:[%s5123_s26 + $0x30] sm:$0xff]  ;;  %v5157_v23 = vld [vmem:[%s5123_s26 + $0x38] sm:$0xff] }
  0x13   : > { %v5161_v24 = vld [vmem:[%s5123_s26 + $0x40] sm:$0xff]  ;;  %v310_v25 = vld [vmem:[%s9185_s1 + $0x170] sm:$0xff]  ;;  %v307_v26 = vld [vmem:[%s9185_s1 + $0x158] sm:$0xff] }
  0x14   : > { %324 = vmatpush.msra.mxu0 %v297_v4  ;;  %526 = vmatpush.msra.mxu1 %v310_v25  ;;  %v304_v27 = vld [vmem:[%s9185_s1 + $0x140] sm:$0xff]  ;;  %v301_v28 = vld [vmem:[%s9185_s1 + $0x128] sm:$0xff]  ;;  %v298_v30 = vld [vmem:[%s9185_s1 + $0x110] sm:$0xff] }
  0x15   : > { %v5177_v29 = vld [vmem:[%s5123_s26 + $0x48] sm:$0xff]  ;;  %v295_v31 = vld [vmem:[%s9185_s1 + $0xf8] sm:$0xff]  ;;  %v292_v32 = vld [vmem:[%s9185_s1 + $0xe0] sm:$0xff] }
  0x16   : > { %325 = vmatpush.msra.mxu0 %v294_v5  ;;  %527 = vmatpush.msra.mxu1 %v307_v26  ;;  %v289_v33 = vld [vmem:[%s9185_s1 + $0xc8] sm:$0xff]  ;;  %v5193_v34 = vld [vmem:[%s5123_s26 + $0x50] sm:$0xff]  ;;  %v283_v36 = vld [vmem:[%s9185_s1 + $0x98] sm:$0xff] }
  0x17   : > { %v286_v35 = vld [vmem:[%s9185_s1 + $0xb0] sm:$0xff]  ;;  %v280_v37 = vld [vmem:[%s9185_s1 + $0x80] sm:$0xff]  ;;  %v277_v38 = vld [vmem:[%s9185_s1 + $0x68] sm:$0xff] }
  0x18   : > { %326 = vmatpush.msra.mxu0 %v291_v6  ;;  %528 = vmatpush.msra.mxu1 %v304_v27  ;;  %v5209_v39 = vld [vmem:[%s5123_s26 + $0x58] sm:$0xff]  ;;  %v274_v40 = vld [vmem:[%s9185_s1 + $0x50] sm:$0xff]  ;;  %v268_v42 = vld [vmem:[%s9185_s1 + $0x20] sm:$0xff] }
  0x19   : > { %v271_v41 = vld [vmem:[%s9185_s1 + $0x38] sm:$0xff]  ;;  %v5225_v44 = vld [vmem:[%s5123_s26 + $0x60] sm:$0xff]  ;;  %v265_v45 = vld [vmem:[%s9185_s1 + $0x8] sm:$0xff] }
  0x1a   : > { %327 = vmatpush.msra.mxu0 %v288_v7  ;;  %529 = vmatpush.msra.mxu1 %v301_v28  ;;  %v311_v43 = vld [vmem:[%s9185_s1 + $0x178] sm:$0xff]  ;;  %v308_v46 = vld [vmem:[%s9185_s1 + $0x160] sm:$0xff]  ;;  %v305_v48 = vld [vmem:[%s9185_s1 + $0x148] sm:$0xff] }
  0x1b   : > { %732 = vmatpush.msra.mxu2 %v311_v43  ;;  %v3410_v47 = vld [vmem:[%s9187_s3 + $0x78] sm:$0xff]  ;;  %v3409_v49 = vld [vmem:[%s9187_s3 + $0x70] sm:$0xff]  ;;  %v3408_v51 = vld [vmem:[%s9187_s3 + $0x68] sm:$0xff] }
  0x1c   : > { %328 = vmatpush.msra.mxu0 %v285_v8  ;;  %530 = vmatpush.msra.mxu1 %v298_v30  ;;  %v302_v50 = vld [vmem:[%s9185_s1 + $0x130] sm:$0xff]  ;;  %v299_v52 = vld [vmem:[%s9185_s1 + $0x118] sm:$0xff]  ;;  %v3407_v53 = vld [vmem:[%s9187_s3 + $0x60] sm:$0xff] }
  0x1d   : > { %733 = vmatpush.msra.mxu2 %v308_v46  ;;  %3411 = vmatpush.msra.mxu3 %v3410_v47  ;;  %v5257_v54 = vld [vmem:[%s5123_s26 + $0x68] sm:$0xff]  ;;  %v296_v55 = vld [vmem:[%s9185_s1 + $0x100] sm:$0xff]  ;;  %v3406_v56 = vld [vmem:[%s9187_s3 + $0x58] sm:$0xff] }
  0x1e   : > { %329 = vmatpush.msra.mxu0 %v282_v9  ;;  %531 = vmatpush.msra.mxu1 %v295_v31  ;;  %v293_v57 = vld [vmem:[%s9185_s1 + $0xe8] sm:$0xff]  ;;  %v3405_v58 = vld [vmem:[%s9187_s3 + $0x50] sm:$0xff]  ;;  %v287_v61 = vld [vmem:[%s9185_s1 + $0xb8] sm:$0xff] }
  0x1f   : > { %734 = vmatpush.msra.mxu2 %v305_v48  ;;  %3412 = vmatpush.msra.mxu3 %v3409_v49  ;;  %v290_v59 = vld [vmem:[%s9185_s1 + $0xd0] sm:$0xff]  ;;  %v3404_v60 = vld [vmem:[%s9187_s3 + $0x48] sm:$0xff]  ;;  %v3403_v62 = vld [vmem:[%s9187_s3 + $0x40] sm:$0xff] }
  0x20   : > { %330 = vmatpush.msra.mxu0 %v279_v10  ;;  %532 = vmatpush.msra.mxu1 %v292_v32  ;;  %v5286_v63 = vld [vmem:[%s5123_s26 + $0x70] sm:$0xff]  ;;  %v284_v0 = vld [vmem:[%s9185_s1 + $0xa0] sm:$0xff]  ;;  %v3402_v1 = vld [vmem:[%s9187_s3 + $0x38] sm:$0xff] }
  0x21   : > { %735 = vmatpush.msra.mxu2 %v302_v50  ;;  %3413 = vmatpush.msra.mxu3 %v3408_v51  ;;  %v281_v2 = vld [vmem:[%s9185_s1 + $0x88] sm:$0xff]  ;;  %v3401_v3 = vld [vmem:[%s9187_s3 + $0x30] sm:$0xff]  ;;  %v275_v6 = vld [vmem:[%s9185_s1 + $0x58] sm:$0xff] }
  0x22   : > { %331 = vmatpush.msra.mxu0 %v276_v11  ;;  %533 = vmatpush.msra.mxu1 %v289_v33  ;;  %v278_v4 = vld [vmem:[%s9185_s1 + $0x70] sm:$0xff]  ;;  %v3400_v5 = vld [vmem:[%s9187_s3 + $0x28] sm:$0xff]  ;;  %v3399_v7 = vld [vmem:[%s9187_s3 + $0x20] sm:$0xff] }
  0x23   : > { %736 = vmatpush.msra.mxu2 %v299_v52  ;;  %3414 = vmatpush.msra.mxu3 %v3407_v53  ;;  %v5315_v8 = vld [vmem:[%s5123_s26 + $0x78] sm:$0xff]  ;;  %v272_v9 = vld [vmem:[%s9185_s1 + $0x40] sm:$0xff]  ;;  %v3396_v25 = vld [vmem:[%s9187_s3 + $0x8] sm:$0xff] }
  0x24   : > { %332 = vmatpush.msra.mxu0 %v273_v12  ;;  %534 = vmatpush.msra.mxu1 %v286_v35  ;;  %v3398_v10 = vld [vmem:[%s9187_s3 + $0x18] sm:$0xff]  ;;  %v5326_v11 = vld [vmem:[%s9186_s2] sm:$0x7]  ;;  %v269_v12 = vld [vmem:[%s9185_s1 + $0x28] sm:$0xff] }
  0x25   : > { %737 = vmatpush.msra.mxu2 %v296_v55  ;;  %3415 = vmatpush.msra.mxu3 %v3406_v56  ;;  %v3395_v26 = vld [vmem:[%s9187_s3] sm:$0xff]  ;;  %v5357_v33 = vld [vmem:[%s5123_s26 + $0x88] sm:$0xff]  ;;  %v5371_v51 = vld [vmem:[%s5123_s26 + $0x98] sm:$0xff] }
  0x26   : > { %333 = vmatpush.msra.mxu0 %v270_v13  ;;  %535 = vmatpush.msra.mxu1 %v283_v36  ;;  %v3397_v13 = vld [vmem:[%s9187_s3 + $0x10] sm:$0xff]  ;;  %v5350_v28 = vld [vmem:[%s5123_s26 + $0x80] sm:$0xff] }
  0x27   : > { %738 = vmatpush.msra.mxu2 %v293_v57  ;;  %3416 = vmatpush.msra.mxu3 %v3405_v58 }
  0x28   : > { %334 = vmatpush.msra.mxu0 %v267_v14  ;;  %536 = vmatpush.msra.mxu1 %v280_v37  ;;  %v5337_v14 = vperm.slane %v5326_v11, 0 }
  0x29   : > { %739 = vmatpush.msra.mxu2 %v290_v59  ;;  %3417 = vmatpush.msra.mxu3 %v3404_v60 }
  0x2a   : > { %335 = vmatpush.msra.mxu0 %v264_v15  ;;  %537 = vmatpush.msra.mxu1 %v277_v38  ;;  %v266_v15 = vld [vmem:[%s9185_s1 + $0x10] sm:$0xff] }
  0x2b   : > { %336 = vmatmul.f32.vlgmr.msra.gmra.mxu0 %v5129_v16  ;;  %740 = vmatpush.msra.mxu2 %v287_v61 }
  0x2c   : > { %538 = vmatpush.msra.mxu1 %v274_v40  ;;  %3418 = vmatpush.msra.mxu3 %v3403_v62 }
  0x2d   : > { %741 = vmatpush.msra.mxu2 %v284_v0 }
  0x2e   : > { %539 = vmatpush.msra.mxu1 %v271_v41  ;;  %3419 = vmatpush.msra.mxu3 %v3402_v1  ;;  %v5364_v41 = vld [vmem:[%s5123_s26 + $0x90] sm:$0xff] }
  0x2f   : > { %742 = vmatpush.msra.mxu2 %v281_v2 }
  0x30   : > { %540 = vmatpush.msra.mxu1 %v268_v42  ;;  %3420 = vmatpush.msra.mxu3 %v3401_v3 }
  0x31   : > { %743 = vmatpush.msra.mxu2 %v278_v4 }
  0x32   : > { %541 = vmatpush.msra.mxu1 %v265_v45  ;;  %3421 = vmatpush.msra.mxu3 %v3400_v5 }
  0x33   : > { %339 = vmatmul.f32.gmra.mxu0 %v5133_v17  ;;  %542 = vmatmul.f32.vlgmr.msra.gmra.mxu1 %v5129_v16 }
  0x34   : > { %744 = vmatpush.msra.mxu2 %v275_v6  ;;  %3422 = vmatpush.msra.mxu3 %v3399_v7  ;;  %v5379_v6 = vld [vmem:[%s5123_s26 + $0xa0] sm:$0xff] }
  0x36   : > { %745 = vmatpush.msra.mxu2 %v272_v9  ;;  %3423 = vmatpush.msra.mxu3 %v3398_v10 }
  0x38   : > { %746 = vmatpush.msra.mxu2 %v269_v12  ;;  %3424 = vmatpush.msra.mxu3 %v3397_v13 }
  0x3a   : > { %747 = vmatpush.msra.mxu2 %v266_v15  ;;  %3425 = vmatpush.msra.mxu3 %v3396_v25 }
  0x3b   : > { %342 = vmatmul.f32.gmra.mxu0 %v5137_v18  ;;  %545 = vmatmul.f32.gmra.mxu1 %v5133_v17 }
  0x3c   : > { %748 = vmatmul.f32.vlgmr.msra.gmra.mxu2 %v5129_v16  ;;  %3426 = vmatpush.msra.mxu3 %v3395_v26 }
  0x43   : > { %345 = vmatmul.f32.gmra.mxu0 %v5141_v19  ;;  %548 = vmatmul.f32.gmra.mxu1 %v5137_v18 }
  0x44   : > { %751 = vmatmul.f32.gmra.mxu2 %v5133_v17 }
  0x4b   : > { %348 = vmatmul.f32.gmra.mxu0 %v5145_v20  ;;  %551 = vmatmul.f32.gmra.mxu1 %v5141_v19 }
  0x4c   : > { %754 = vmatmul.f32.gmra.mxu2 %v5137_v18 }
  0x53   : > { %351 = vmatmul.f32.gmra.mxu0 %v5149_v21  ;;  %554 = vmatmul.f32.gmra.mxu1 %v5145_v20 }
  0x54   : > { %757 = vmatmul.f32.gmra.mxu2 %v5141_v19 }
  0x5b   : > { %354 = vmatmul.f32.gmra.mxu0 %v5153_v22  ;;  %557 = vmatmul.f32.gmra.mxu1 %v5149_v21 }
  0x5c   : > { %760 = vmatmul.f32.gmra.mxu2 %v5145_v20 }
  0x63   : > { %357 = vmatmul.f32.gmra.mxu0 %v5157_v23  ;;  %560 = vmatmul.f32.gmra.mxu1 %v5153_v22 }
  0x64   : > { %763 = vmatmul.f32.gmra.mxu2 %v5149_v21 }
  0x6b   : > { %360 = vmatmul.f32.gmra.mxu0 %v5161_v24  ;;  %563 = vmatmul.f32.gmra.mxu1 %v5157_v23 }
  0x6c   : > { %766 = vmatmul.f32.gmra.mxu2 %v5153_v22 }
  0x73   : > { %363 = vmatmul.f32.gmra.mxu0 %v5177_v29  ;;  %566 = vmatmul.f32.gmra.mxu1 %v5161_v24 }
  0x74   : > { %769 = vmatmul.f32.gmra.mxu2 %v5157_v23 }
  0x7b   : > { %366 = vmatmul.f32.gmra.mxu0 %v5193_v34  ;;  %569 = vmatmul.f32.gmra.mxu1 %v5177_v29 }
  0x7c   : > { %772 = vmatmul.f32.gmra.mxu2 %v5161_v24 }
  0x83   : > { %369 = vmatmul.f32.gmra.mxu0 %v5209_v39  ;;  %572 = vmatmul.f32.gmra.mxu1 %v5193_v34 }
  0x84   : > { %775 = vmatmul.f32.gmra.mxu2 %v5177_v29 }
  0x8b   : > { %372 = vmatmul.f32.gmra.mxu0 %v5225_v44  ;;  %575 = vmatmul.f32.gmra.mxu1 %v5209_v39 }
  0x8c   : > { %778 = vmatmul.f32.gmra.mxu2 %v5193_v34 }
  0x93   : > { %375 = vmatmul.f32.gmra.mxu0 %v5257_v54  ;;  %578 = vmatmul.f32.gmra.mxu1 %v5225_v44 }
  0x94   : > { %781 = vmatmul.f32.gmra.mxu2 %v5209_v39 }
  0x9b   : > { %378 = vmatmul.f32.gmra.mxu0 %v5286_v63  ;;  %581 = vmatmul.f32.gmra.mxu1 %v5257_v54 }
  0x9c   : > { %784 = vmatmul.f32.gmra.mxu2 %v5225_v44 }
  0xa3   : > { %381 = vmatmul.f32.gmra.mxu0 %v5315_v8  ;;  %584 = vmatmul.f32.gmra.mxu1 %v5286_v63 }
  0xa4   : > { %787 = vmatmul.f32.gmra.mxu2 %v5257_v54 }
  0xa8   : > { %v337_v27 = vpop.f32.mrf.mxu0 }
  0xa9   : > { %v338_v30 = vadd.f32 %v337_v27, %v5337_v14 }
  0xab   : > { %v4121_v31 = vmul.f32 -1.442695, %v338_v30  ;;  %384 = vmatmul.f32.gmra.mxu0 %v5350_v28  ;;  %587 = vmatmul.f32.gmra.mxu1 %v5315_v8 }
  0xac   : > { %790 = vmatmul.f32.gmra.mxu2 %v5286_v63 }
  0xad   : > { %4257 = vpow2.f32 %v4121_v31 }
  0xb0   : > { %v340_v32 = vpop.f32.mrf.mxu0 }
  0xb1   : > { %v341_v35 = vadd.f32 %v340_v32, %v5337_v14 }
  0xb3   : > { %v4258_v36 = vpop.eup %4257  ;;  %v4122_v37 = vmul.f32 -1.442695, %v341_v35  ;;  %387 = vmatmul.f32.gmra.mxu0 %v5357_v33  ;;  %590 = vmatmul.f32.gmra.mxu1 %v5350_v28 }
  0xb4   : > { %v1127_v38 = vadd.f32 1.0, %v4258_v36  ;;  %793 = vmatmul.f32.gmra.mxu2 %v5315_v8 }
  0xb5   : > { %4259 = vpow2.f32 %v4122_v37 }
  0xb6   : > { %4261 = vrcp.f32 %v1127_v38  ;;  %v1201_v52 = vand.u32 2147483648, %v1127_v38  ;;  %v1199_v56 = vand.u32 2147483647, %v1127_v38  ;;  %vm1195_vm1 = vweird.f32 %v1127_v38 }
  0xb8   : > { %v343_v40 = vpop.f32.mrf.mxu0  ;;  %v1202_v62 = vor.u32 1.1754944e-38, %v1201_v52  ;;  %vm1200_vm3 = vcmp.eq.f32.partialorder %v1199_v56, 8.507059e+37 }
  0xb9   : > { %v344_v42 = vadd.f32 %v343_v40, %v5337_v14 }
  0xbb   : > { %v4260_v43 = vpop.eup %4259  ;;  %v4123_v45 = vmul.f32 -1.442695, %v344_v42  ;;  %390 = vmatmul.f32.gmra.mxu0 %v5364_v41  ;;  %593 = vmatmul.f32.gmra.mxu1 %v5357_v33 }
  0xbc   : > { %v4262_v46 = vpop.eup %4261  ;;  %v1128_v47 = vadd.f32 1.0, %v4260_v43  ;;  %796 = vmatmul.f32.gmra.mxu2 %v5350_v28 }
  0xbd   : > { %4263 = vpow2.f32 %v4123_v45  ;;  %v1191_v48 = vmul.f32 %v4262_v46, %v1127_v38  ;;  %vm1196_vm0 = vweird.f32 %v4262_v46  ;;  %v5387_v38 = vld [vmem:[%s5123_s26 + $0xa8] sm:$0xff] }
  0xbe   : > { %4265 = vrcp.f32 %v1128_v47  ;;  %vm1197_vm2 = vmor %vm1195_vm1, %vm1196_vm0  ;;  %v1216_v7 = vand.u32 2147483648, %v1128_v47  ;;  %v1214_v12 = vand.u32 2147483647, %v1128_v47  ;;  %vm1210_vm5 = vweird.f32 %v1128_v47 }
  0xbf   : > { %v1192_v49 = vsub.f32 1.0, %v1191_v48 }
  0xc0   : > { %v346_v50 = vpop.f32.mrf.mxu0  ;;  %v1217_v27 = vor.u32 1.1754944e-38, %v1216_v7  ;;  %vm1215_vm7 = vcmp.eq.f32.partialorder %v1214_v12, 8.507059e+37 }
  0xc1   : > { %v347_v53 = vadd.f32 %v346_v50, %v5337_v14  ;;  %v1193_v55 = vmul.f32 %v4262_v46, %v1192_v49 }
  0xc3   : > { %v4264_v57 = vpop.eup %4263  ;;  %v4124_v58 = vmul.f32 -1.442695, %v347_v53  ;;  %393 = vmatmul.f32.gmra.mxu0 %v5371_v51  ;;  %v1194_v59 = vadd.f32 %v4262_v46, %v1193_v55  ;;  %596 = vmatmul.f32.gmra.mxu1 %v5364_v41 }
  0xc4   : > { %v4266_v60 = vpop.eup %4265  ;;  %v1129_v61 = vadd.f32 1.0, %v4264_v57  ;;  %799 = vmatmul.f32.gmra.mxu2 %v5357_v33 }
  0xc5   : > { %4267 = vpow2.f32 %v4124_v58  ;;  %v1198_v0 = vsel %vm1197_vm2, %v4262_v46, %v1194_v59  ;;  %v1206_v1 = vmul.f32 %v4266_v60, %v1128_v47  ;;  %vm1211_vm4 = vweird.f32 %v4266_v60  ;;  %v5395_v59 = vld [vmem:[%s5123_s26 + $0xb0] sm:$0xff] }
  0xc6   : > { %4269 = vrcp.f32 %v1129_v61  ;;  %v1203_v2 = vsel %vm1200_vm3, %v1202_v62, %v1198_v0  ;;  %vm1212_vm6 = vmor %vm1210_vm5, %vm1211_vm4  ;;  %v1231_v40 = vand.u32 2147483648, %v1129_v61  ;;  %v1229_v45 = vand.u32 2147483647, %v1129_v61 }
  0xc7   : > { %v3332_v3 = vmul.f32 %v1203_v2, %v5129_v16  ;;  %v1207_v4 = vsub.f32 1.0, %v1206_v1  ;;  %vm1225_vm9 = vweird.f32 %v1129_v61 }
  0xc8   : > { %v349_v5 = vpop.f32.mrf.mxu0  ;;  %v1232_v50 = vor.u32 1.1754944e-38, %v1231_v40  ;;  %vm1230_vm11 = vcmp.eq.f32.partialorder %v1229_v45, 8.507059e+37 }
  0xc9   : > { %v350_v9 = vadd.f32 %v349_v5, %v5337_v14  ;;  %3427 = vmatmul.f32.vlgmr.msra.gmra.mxu3 %v3332_v3  ;;  %v1208_v10 = vmul.f32 %v4266_v60, %v1207_v4 }
  0xcb   : > { %v4268_v13 = vpop.eup %4267  ;;  %v4125_v15 = vmul.f32 -1.442695, %v350_v9  ;;  %396 = vmatmul.f32.gmra.mxu0 %v5379_v6  ;;  %v1209_v25 = vadd.f32 %v4266_v60, %v1208_v10  ;;  %599 = vmatmul.f32.gmra.mxu1 %v5371_v51 }
  0xcc   : > { %v4270_v16 = vpop.eup %4269  ;;  %v1130_v26 = vadd.f32 1.0, %v4268_v13  ;;  %802 = vmatmul.f32.gmra.mxu2 %v5364_v41 }
  0xcd   : > { %4271 = vpow2.f32 %v4125_v15  ;;  %v1213_v30 = vsel %vm1212_vm6, %v4266_v60, %v1209_v25  ;;  %v1221_v31 = vmul.f32 %v4270_v16, %v1129_v61  ;;  %vm1226_vm8 = vweird.f32 %v4270_v16  ;;  %v5403_v25 = vld [vmem:[%s5123_s26 + $0xb8] sm:$0xff] }
  0xce   : > { %4273 = vrcp.f32 %v1130_v26  ;;  %v1218_v32 = vsel %vm1215_vm7, %v1217_v27, %v1213_v30  ;;  %vm1227_vm10 = vmor %vm1225_vm9, %vm1226_vm8  ;;  %v1246_v60 = vand.u32 2147483648, %v1130_v26  ;;  %v1244_v0 = vand.u32 2147483647, %v1130_v26 }
  0xcf   : > { %v3333_v35 = vmul.f32 %v1218_v32, %v5133_v17  ;;  %v1222_v36 = vsub.f32 1.0, %v1221_v31  ;;  %vm1240_vm13 = vweird.f32 %v1130_v26 }
  0xd0   : > { %v352_v37 = vpop.f32.mrf.mxu0  ;;  %v1247_v5 = vor.u32 1.1754944e-38, %v1246_v60  ;;  %vm1245_vm15 = vcmp.eq.f32.partialorder %v1244_v0, 8.507059e+37 }
  0xd1   : > { %v353_v42 = vadd.f32 %v352_v37, %v5337_v14  ;;  %3430 = vmatmul.f32.gmra.mxu3 %v3333_v35  ;;  %v1223_v43 = vmul.f32 %v4270_v16, %v1222_v36 }
  0xd3   : > { %v4272_v46 = vpop.eup %4271  ;;  %v4126_v47 = vmul.f32 -1.442695, %v353_v42  ;;  %399 = vmatmul.f32.gmra.mxu0 %v5387_v38  ;;  %v1224_v48 = vadd.f32 %v4270_v16, %v1223_v43  ;;  %602 = vmatmul.f32.gmra.mxu1 %v5379_v6  ;;  %v749_v6 = vpop.f32.mrf.mxu2 }
  0xd4   : > { %v4274_v17 = vpop.eup %4273  ;;  %v1131_v49 = vadd.f32 1.0, %v4272_v46 }
  0xd5   : > { %4275 = vpow2.f32 %v4126_v47  ;;  %v1228_v52 = vsel %vm1227_vm10, %v4270_v16, %v1224_v48  ;;  %v1236_v53 = vmul.f32 %v4274_v17, %v1130_v26  ;;  %vm1241_vm12 = vweird.f32 %v4274_v17  ;;  %v5411_v48 = vld [vmem:[%s5123_s26 + $0xc0] sm:$0xff] }
  0xd6   : > { %4277 = vrcp.f32 %v1131_v49  ;;  %v1233_v55 = vsel %vm1230_vm11, %v1232_v50, %v1228_v52  ;;  %vm1242_vm14 = vmor %vm1240_vm13, %vm1241_vm12  ;;  %v1261_v16 = vand.u32 2147483648, %v1131_v49  ;;  %v1259_v30 = vand.u32 2147483647, %v1131_v49 }
  0xd7   : > { %v3334_v56 = vmul.f32 %v1233_v55, %v5137_v18  ;;  %v1237_v57 = vsub.f32 1.0, %v1236_v53  ;;  %vm1255_vm1 = vweird.f32 %v1131_v49 }
  0xd8   : > { %v355_v58 = vpop.f32.mrf.mxu0  ;;  %v1262_v37 = vor.u32 1.1754944e-38, %v1261_v16  ;;  %vm1260_vm3 = vcmp.eq.f32.partialorder %v1259_v30, 8.507059e+37 }
  0xd9   : > { %v356_v61 = vadd.f32 %v355_v58, %v5337_v14  ;;  %3433 = vmatmul.f32.gmra.mxu3 %v3334_v56  ;;  %v1238_v62 = vmul.f32 %v4274_v17, %v1237_v57 }
  0xdb   : > { %v4276_v1 = vpop.eup %4275  ;;  %v4127_v2 = vmul.f32 -1.442695, %v356_v61  ;;  %402 = vmatmul.f32.gmra.mxu0 %v5395_v59  ;;  %v1239_v3 = vadd.f32 %v4274_v17, %v1238_v62  ;;  %605 = vmatmul.f32.gmra.mxu1 %v5387_v38 }
  0xdc   : > { %v4278_v18 = vpop.eup %4277  ;;  %v1132_v4 = vadd.f32 1.0, %v4276_v1 }
  0xdd   : > { %4279 = vpow2.f32 %v4127_v2  ;;  %v1243_v7 = vsel %vm1242_vm14, %v4274_v17, %v1239_v3  ;;  %v1251_v9 = vmul.f32 %v4278_v18, %v1131_v49  ;;  %vm1256_vm0 = vweird.f32 %v4278_v18  ;;  %v5419_v3 = vld [vmem:[%s5123_s26 + $0xc8] sm:$0xff] }
  0xde   : > { %4281 = vrcp.f32 %v1132_v4  ;;  %v1248_v10 = vsel %vm1245_vm15, %v1247_v5, %v1243_v7  ;;  %vm1257_vm2 = vmor %vm1255_vm1, %vm1256_vm0  ;;  %v1276_v17 = vand.u32 2147483648, %v1132_v4  ;;  %v1274_v52 = vand.u32 2147483647, %v1132_v4 }
  0xdf   : > { %v3335_v12 = vmul.f32 %v1248_v10, %v5141_v19  ;;  %v1252_v13 = vsub.f32 1.0, %v1251_v9  ;;  %vm1270_vm5 = vweird.f32 %v1132_v4 }
  0xe0   : > { %v358_v15 = vpop.f32.mrf.mxu0  ;;  %v1277_v58 = vor.u32 1.1754944e-38, %v1276_v17  ;;  %vm1275_vm7 = vcmp.eq.f32.partialorder %v1274_v52, 8.507059e+37 }
  0xe1   : > { %v359_v26 = vadd.f32 %v358_v15, %v5337_v14  ;;  %3436 = vmatmul.f32.gmra.mxu3 %v3335_v12  ;;  %v1253_v27 = vmul.f32 %v4278_v18, %v1252_v13 }
  0xe3   : > { %v4280_v31 = vpop.eup %4279  ;;  %v4128_v32 = vmul.f32 -1.442695, %v359_v26  ;;  %405 = vmatmul.f32.gmra.mxu0 %v5403_v25  ;;  %v1254_v35 = vadd.f32 %v4278_v18, %v1253_v27  ;;  %608 = vmatmul.f32.gmra.mxu1 %v5395_v59 }
  0xe4   : > { %v4282_v19 = vpop.eup %4281  ;;  %v1133_v36 = vadd.f32 1.0, %v4280_v31 }
  0xe5   : > { %4283 = vpow2.f32 %v4128_v32  ;;  %v1258_v40 = vsel %vm1257_vm2, %v4278_v18, %v1254_v35  ;;  %v1266_v42 = vmul.f32 %v4282_v19, %v1132_v4  ;;  %vm1271_vm4 = vweird.f32 %v4282_v19  ;;  %v5427_v35 = vld [vmem:[%s5123_s26 + $0xd0] sm:$0xff] }
  0xe6   : > { %4285 = vrcp.f32 %v1133_v36  ;;  %v1263_v43 = vsel %vm1260_vm3, %v1262_v37, %v1258_v40  ;;  %vm1272_vm6 = vmor %vm1270_vm5, %vm1271_vm4  ;;  %v1291_v18 = vand.u32 2147483648, %v1133_v36  ;;  %v1289_v7 = vand.u32 2147483647, %v1133_v36 }
  0xe7   : > { %v3336_v45 = vmul.f32 %v1263_v43, %v5145_v20  ;;  %v1267_v46 = vsub.f32 1.0, %v1266_v42  ;;  %vm1285_vm9 = vweird.f32 %v1133_v36 }
  0xe8   : > { %v361_v47 = vpop.f32.mrf.mxu0  ;;  %v1292_v15 = vor.u32 1.1754944e-38, %v1291_v18  ;;  %vm1290_vm11 = vcmp.eq.f32.partialorder %v1289_v7, 8.507059e+37 }
  0xe9   : > { %v362_v49 = vadd.f32 %v361_v47, %v5337_v14  ;;  %3439 = vmatmul.f32.gmra.mxu3 %v3336_v45  ;;  %v1268_v50 = vmul.f32 %v4282_v19, %v1267_v46 }
  0xeb   : > { %v4284_v53 = vpop.eup %4283  ;;  %v4129_v55 = vmul.f32 -1.442695, %v362_v49  ;;  %408 = vmatmul.f32.gmra.mxu0 %v5411_v48  ;;  %v1269_v56 = vadd.f32 %v4282_v19, %v1268_v50  ;;  %611 = vmatmul.f32.gmra.mxu1 %v5403_v25 }
  0xec   : > { %v4286_v20 = vpop.eup %4285  ;;  %v1134_v57 = vadd.f32 1.0, %v4284_v53 }
  0xed   : > { %4287 = vpow2.f32 %v4129_v55  ;;  %v1273_v60 = vsel %vm1272_vm6, %v4282_v19, %v1269_v56  ;;  %v1281_v61 = vmul.f32 %v4286_v20, %v1133_v36  ;;  %vm1286_vm8 = vweird.f32 %v4286_v20  ;;  %v228_v56 = vld [vmem:[%s5123_s26 + $0xd8] sm:$0xff] }
  0xee   : > { %4289 = vrcp.f32 %v1134_v57  ;;  %v1278_v62 = vsel %vm1275_vm7, %v1277_v58, %v1273_v60  ;;  %vm1287_vm10 = vmor %vm1285_vm9, %vm1286_vm8  ;;  %v1306_v19 = vand.u32 2147483648, %v1134_v57  ;;  %v1304_v40 = vand.u32 2147483647, %v1134_v57 }
  0xef   : > { %v3337_v0 = vmul.f32 %v1278_v62, %v5149_v21  ;;  %v1282_v1 = vsub.f32 1.0, %v1281_v61  ;;  %vm1300_vm13 = vweird.f32 %v1134_v57 }
  0xf0   : > { %v364_v2 = vpop.f32.mrf.mxu0  ;;  %v1307_v47 = vor.u32 1.1754944e-38, %v1306_v19  ;;  %vm1305_vm15 = vcmp.eq.f32.partialorder %v1304_v40, 8.507059e+37 }
  0xf1   : > { %v365_v4 = vadd.f32 %v364_v2, %v5337_v14  ;;  %3442 = vmatmul.f32.gmra.mxu3 %v3337_v0  ;;  %v1283_v5 = vmul.f32 %v4286_v20, %v1282_v1 }
  0xf3   : > { %v4288_v9 = vpop.eup %4287  ;;  %v4130_v10 = vmul.f32 -1.442695, %v365_v4  ;;  %411 = vmatmul.f32.gmra.mxu0 %v5419_v3  ;;  %v1284_v12 = vadd.f32 %v4286_v20, %v1283_v5 }
  0xf4   : > { %v4290_v21 = vpop.eup %4289  ;;  %v1135_v13 = vadd.f32 1.0, %v4288_v9 }
  0xf5   : > { %4291 = vpow2.f32 %v4130_v10  ;;  %v1288_v16 = vsel %vm1287_vm10, %v4286_v20, %v1284_v12  ;;  %v1296_v26 = vmul.f32 %v4290_v21, %v1134_v57  ;;  %vm1301_vm12 = vweird.f32 %v4290_v21  ;;  %v229_v12 = vld [vmem:[%s5123_s26 + $0xe0] sm:$0xff] }
  0xf6   : > { %4293 = vrcp.f32 %v1135_v13  ;;  %v1293_v27 = vsel %vm1290_vm11, %v1292_v15, %v1288_v16  ;;  %vm1302_vm14 = vmor %vm1300_vm13, %vm1301_vm12  ;;  %v1321_v20 = vand.u32 2147483648, %v1135_v13  ;;  %v1319_v60 = vand.u32 2147483647, %v1135_v13 }
  0xf7   : > { %v3338_v30 = vmul.f32 %v1293_v27, %v5153_v22  ;;  %v1297_v31 = vsub.f32 1.0, %v1296_v26  ;;  %vm1315_vm1 = vweird.f32 %v1135_v13  ;;  %v543_v27 = vpop.f32.mrf.mxu1  ;;  %614 = vmatmul.f32.gmra.mxu1 %v5411_v48 }
  0xf8   : > { %v367_v32 = vpop.f32.mrf.mxu0  ;;  %v1322_v2 = vor.u32 1.1754944e-38, %v1321_v20  ;;  %vm1320_vm3 = vcmp.eq.f32.partialorder %v1319_v60, 8.507059e+37 }
  0xf9   : > { %v368_v36 = vadd.f32 %v367_v32, %v5337_v14  ;;  %3445 = vmatmul.f32.gmra.mxu3 %v3338_v30  ;;  %v1298_v37 = vmul.f32 %v4290_v21, %v1297_v31 }
  0xfb   : > { %v4292_v42 = vpop.eup %4291  ;;  %v4131_v43 = vmul.f32 -1.442695, %v368_v36  ;;  %414 = vmatmul.f32.gmra.mxu0 %v5427_v35  ;;  %v1299_v45 = vadd.f32 %v4290_v21, %v1298_v37 }
  0xfc   : > { %v4294_v22 = vpop.eup %4293  ;;  %v5431_v46 = vadd.f32 1.0, %v4292_v42 }
  0xfd   : > { %4295 = vpow2.f32 %v4131_v43  ;;  %v1303_v17 = vsel %vm1302_vm14, %v4290_v21, %v1299_v45  ;;  %v1311_v49 = vmul.f32 %v4294_v22, %v1135_v13  ;;  %vm1316_vm0 = vweird.f32 %v4294_v22 }
  0xfe   : > { %4297 = vrcp.f32 %v5431_v46  ;;  %v1308_v50 = vsel %vm1305_vm15, %v1307_v47, %v1303_v17  ;;  %vm1317_vm2 = vmor %vm1315_vm1, %vm1316_vm0  ;;  %v1336_v21 = vand.u32 2147483648, %v5431_v46  ;;  %v5449_v13 = vperm.slane %v5326_v11, 1  ;;  %v230_v17 = vld [vmem:[%s5123_s26 + $0xe8] sm:$0xff] }
  0xff   : > { %v3339_v52 = vmul.f32 %v1308_v50, %v5157_v23  ;;  %v1312_v53 = vsub.f32 1.0, %v1311_v49  ;;  %v1334_v26 = vand.u32 2147483647, %v5431_v46  ;;  %vm1330_vm5 = vweird.f32 %v5431_v46 }
 0x100   : > { %v370_v55 = vpop.f32.mrf.mxu0  ;;  %v1337_v37 = vor.u32 1.1754944e-38, %v1336_v21 }
 0x101   : > { %v371_v57 = vadd.f32 %v370_v55, %v5337_v14  ;;  %3448 = vmatmul.f32.gmra.mxu3 %v3339_v52  ;;  %v1313_v58 = vmul.f32 %v4294_v22, %v1312_v53  ;;  %vm1335_vm7 = vcmp.eq.f32.partialorder %v1334_v26, 8.507059e+37  ;;  %v546_v55 = vpop.f32.mrf.mxu1  ;;  %617 = vmatmul.f32.gmra.mxu1 %v5419_v3 }
 0x103   : > { %v4296_v61 = vpop.eup %4295  ;;  %v4132_v62 = vmul.f32 -1.442695, %v371_v57  ;;  %417 = vmatmul.f32.gmra.mxu0 %v228_v56  ;;  %v1314_v0 = vadd.f32 %v4294_v22, %v1313_v58  ;;  %v547_v56 = vadd.f32 %v546_v55, %v5449_v13 }
 0x104   : > { %v4298_v1 = vpop.eup %4297  ;;  %v5439_v23 = vadd.f32 1.0, %v4296_v61 }
 0x105   : > { %4299 = vpow2.f32 %v4132_v62  ;;  %v1318_v18 = vsel %vm1317_vm2, %v4294_v22, %v1314_v0  ;;  %v1326_v4 = vmul.f32 %v4298_v1, %v5431_v46  ;;  %vm1331_vm4 = vweird.f32 %v4298_v1 }
 0x106   : > { %4301 = vrcp.f32 %v5439_v23  ;;  %v1323_v5 = vsel %vm1320_vm3, %v1322_v2, %v1318_v18  ;;  %vm1332_vm6 = vmor %vm1330_vm5, %vm1331_vm4  ;;  %v1351_v49 = vand.u32 2147483648, %v5439_v23  ;;  %v1349_v53 = vand.u32 2147483647, %v5439_v23 }
 0x107   : > { %v3340_v7 = vmul.f32 %v1323_v5, %v5161_v24  ;;  %v1327_v9 = vsub.f32 1.0, %v1326_v4  ;;  %v544_v24 = vadd.f32 %v543_v27, %v5449_v13  ;;  %vm1345_vm9 = vweird.f32 %v5439_v23 }
 0x108   : > { %v373_v10 = vpop.f32.mrf.mxu0  ;;  %v1352_v61 = vor.u32 1.1754944e-38, %v1351_v49  ;;  %vm1350_vm11 = vcmp.eq.f32.partialorder %v1349_v53, 8.507059e+37 }
 0x109   : > { %v374_v15 = vadd.f32 %v373_v10, %v5337_v14  ;;  %3451 = vmatmul.f32.gmra.mxu3 %v3340_v7  ;;  %v1328_v16 = vmul.f32 %v4298_v1, %v1327_v9  ;;  %v4184_v40 = vmul.f32 -1.442695, %v544_v24  ;;  %v231_v9 = vld [vmem:[%s5123_s26 + $0xf0] sm:$0xff] }
 0x10b   : > { %v4300_v30 = vpop.eup %4299  ;;  %v4133_v31 = vmul.f32 -1.442695, %v374_v15  ;;  %420 = vmatmul.f32.gmra.mxu0 %v229_v12  ;;  %v1329_v32 = vadd.f32 %v4298_v1, %v1328_v16  ;;  %v549_v16 = vpop.f32.mrf.mxu1  ;;  %620 = vmatmul.f32.gmra.mxu1 %v5427_v35 }
 0x10c   : > { %v4302_v19 = vpop.eup %4301  ;;  %v5455_v36 = vadd.f32 1.0, %v4300_v30 }
 0x10d   : > { %4303 = vpow2.f32 %v4133_v31  ;;  %v1333_v42 = vsel %vm1332_vm6, %v4298_v1, %v1329_v32  ;;  %v1341_v43 = vmul.f32 %v4302_v19, %v5439_v23  ;;  %vm1346_vm8 = vweird.f32 %v4302_v19 }
 0x10e   : > { %4305 = vrcp.f32 %v5455_v36  ;;  %v1338_v45 = vsel %vm1335_vm7, %v1337_v37, %v1333_v42  ;;  %vm1347_vm10 = vmor %vm1345_vm9, %vm1346_vm8  ;;  %v4185_v23 = vmul.f32 -1.442695, %v547_v56  ;;  %v1366_v10 = vand.u32 2147483648, %v5455_v36 }
 0x10f   : > { %v3341_v22 = vmul.f32 %v1338_v45, %v5177_v29  ;;  %v1342_v46 = vsub.f32 1.0, %v1341_v43  ;;  %4307 = vpow2.f32 %v4184_v40  ;;  %v1364_v15 = vand.u32 2147483647, %v5455_v36 }
 0x110   : > { %v376_v47 = vpop.f32.mrf.mxu0  ;;  %vm1360_vm13 = vweird.f32 %v5455_v36  ;;  %v1367_v30 = vor.u32 1.1754944e-38, %v1366_v10  ;;  %v550_v31 = vadd.f32 %v549_v16, %v5449_v13  ;;  %v233_v10 = vld [vmem:[%s5123_s26 + $0x100] sm:$0xff] }
 0x111   : > { %v377_v50 = vadd.f32 %v376_v47, %v5337_v14  ;;  %3454 = vmatmul.f32.gmra.mxu3 %v3341_v22  ;;  %v1343_v52 = vmul.f32 %v4302_v19, %v1342_v46  ;;  %vm1365_vm15 = vcmp.eq.f32.partialorder %v1364_v15, 8.507059e+37  ;;  %v232_v46 = vld [vmem:[%s5123_s26 + $0xf8] sm:$0xff] }
 0x112   : > { %v4186_v49 = vmul.f32 -1.442695, %v550_v31  ;;  %v752_v31 = vpop.f32.mrf.mxu2 }
 0x113   : > { %v4304_v20 = vpop.eup %4303  ;;  %v4134_v29 = vmul.f32 -1.442695, %v377_v50  ;;  %423 = vmatmul.f32.gmra.mxu0 %v230_v17  ;;  %v1344_v57 = vadd.f32 %v4302_v19, %v1343_v52  ;;  %v552_v53 = vpop.f32.mrf.mxu1 }
 0x114   : > { %v4306_v58 = vpop.eup %4305  ;;  %v5468_v60 = vadd.f32 1.0, %v4304_v20 }
 0x115   : > { %v4308_v62 = vpop.eup %4307  ;;  %4309 = vpow2.f32 %v4134_v29  ;;  %v1348_v0 = vsel %vm1347_vm10, %v4302_v19, %v1344_v57  ;;  %v1356_v1 = vmul.f32 %v4306_v58, %v5455_v36  ;;  %vm1361_vm12 = vweird.f32 %v4306_v58 }
 0x116   : > { %4311 = vrcp.f32 %v5468_v60  ;;  %v1353_v2 = vsel %vm1350_vm11, %v1352_v61, %v1348_v0  ;;  %v5473_v18 = vadd.f32 1.0, %v4308_v62  ;;  %vm1362_vm14 = vmor %vm1360_vm13, %vm1361_vm12  ;;  %v1379_v47 = vand.u32 2147483647, %v5468_v60 }
 0x117   : > { %v3342_v4 = vmul.f32 %v1353_v2, %v5193_v34  ;;  %v1357_v5 = vsub.f32 1.0, %v1356_v1  ;;  %v1381_v17 = vand.u32 2147483648, %v5468_v60  ;;  %vm1375_vm1 = vweird.f32 %v5468_v60 }
 0x118   : > { %v379_v7 = vpop.f32.mrf.mxu0  ;;  %4313 = vrcp.f32 %v5473_v18  ;;  %v553_v29 = vadd.f32 %v552_v53, %v5449_v13  ;;  %vm1380_vm3 = vcmp.eq.f32.partialorder %v1379_v47, 8.507059e+37  ;;  %vm2392_vm6 = vweird.f32 %v5473_v18 }
 0x119   : > { %v380_v12 = vadd.f32 %v379_v7, %v5337_v14  ;;  %3457 = vmatmul.f32.gmra.mxu3 %v3342_v4  ;;  %v1358_v21 = vmul.f32 %v4306_v58, %v1357_v5  ;;  %4315 = vpow2.f32 %v4185_v23  ;;  %v1382_v61 = vor.u32 1.1754944e-38, %v1381_v17 }
 0x11a   : > { %v4187_v5 = vmul.f32 -1.442695, %v553_v29 }
 0x11b   : > { %v4310_v26 = vpop.eup %4309  ;;  %v4135_v34 = vmul.f32 -1.442695, %v380_v12  ;;  %426 = vmatmul.f32.gmra.mxu0 %v231_v9  ;;  %v1359_v27 = vadd.f32 %v4306_v58, %v1358_v21 }
 0x11c   : > { %v4312_v63 = vpop.eup %4311  ;;  %v5483_v24 = vadd.f32 1.0, %v4310_v26  ;;  %v555_v26 = vpop.f32.mrf.mxu1 }
 0x11d   : > { %4317 = vpow2.f32 %v4135_v34  ;;  %v1363_v32 = vsel %vm1362_vm14, %v4306_v58, %v1359_v27  ;;  %v1371_v19 = vmul.f32 %v4312_v63, %v5468_v60  ;;  %vm1376_vm0 = vweird.f32 %v4312_v63 }
 0x11e   : > { %v5488_v37 = vpop.eup %4313  ;;  %4319 = vrcp.f32 %v5483_v24  ;;  %v1368_v36 = vsel %vm1365_vm15, %v1367_v30, %v1363_v32  ;;  %vm1377_vm2 = vmor %vm1375_vm1, %vm1376_vm0  ;;  %v1394_v1 = vand.u32 2147483647, %v5483_v24  ;;  %v1396_v2 = vand.u32 2147483648, %v5483_v24 }
 0x11f   : > { %v3343_v40 = vmul.f32 %v1368_v36, %v5209_v39  ;;  %v2388_v42 = vmul.f32 %v5488_v37, %v5473_v18  ;;  %v1372_v43 = vsub.f32 1.0, %v1371_v19  ;;  %v4316_v45 = vpop.eup %4315  ;;  %4321 = vpow2.f32 %v4186_v49 }
 0x120   : > { %v382_v22 = vpop.f32.mrf.mxu0  ;;  %v5499_v39 = vadd.f32 1.0, %v4316_v45  ;;  %vm1390_vm4 = vweird.f32 %v5483_v24  ;;  %vm2393_vm7 = vweird.f32 %v5488_v37  ;;  %vm5523_vm8 = vcmp.eq.f32.partialorder %v1394_v1, 8.507059e+37 }
 0x121   : > { %v383_v50 = vadd.f32 %v382_v22, %v5337_v14  ;;  %3460 = vmatmul.f32.gmra.mxu3 %v3343_v40  ;;  %v1373_v52 = vmul.f32 %v4312_v63, %v1372_v43  ;;  %v2389_v56 = vsub.f32 1.0, %v2388_v42  ;;  %v1397_v16 = vor.u32 1.1754944e-38, %v1396_v2  ;;  %vm5546_vm11 = vmor %vm2392_vm6, %vm2393_vm7 }
 0x122   : > { %4323 = vrcp.f32 %v5499_v39  ;;  %v2398_v34 = vand.u32 2147483648, %v5473_v18  ;;  %v556_v32 = vadd.f32 %v555_v26, %v5449_v13  ;;  %v2396_v42 = vand.u32 2147483647, %v5473_v18  ;;  %v4887_v26 = vld [vmem:[%s5123_s26 + $0x70] sm:$0xff] }
 0x123   : > { %v4318_v8 = vpop.eup %4317  ;;  %v4136_v55 = vmul.f32 -1.442695, %v383_v50  ;;  %429 = vmatmul.f32.gmra.mxu0 %v232_v46  ;;  %v1374_v20 = vadd.f32 %v4312_v63, %v1373_v52  ;;  %v2390_v51 = vmul.f32 %v5488_v37, %v2389_v56  ;;  %v5568_v56 = vperm.slane %v5326_v11, 2 }
 0x124   : > { %v4320_v57 = vpop.eup %4319  ;;  %v5503_v58 = vadd.f32 1.0, %v4318_v8  ;;  %v4188_v50 = vmul.f32 -1.442695, %v556_v32  ;;  %vm5570_vm13 = vcmp.eq.f32.partialorder %v2396_v42, 8.507059e+37 }
 0x125   : > { %4325 = vpow2.f32 %v4136_v55  ;;  %v1378_v60 = vsel %vm1377_vm2, %v4312_v63, %v1374_v20  ;;  %v1386_v62 = vmul.f32 %v4320_v57, %v5483_v24  ;;  %v4322_v7 = vpop.eup %4321  ;;  %vm1391_vm5 = vweird.f32 %v4320_v57  ;;  %v234_v55 = vld [vmem:[%s5123_s26 + $0x108] sm:$0xff]  ;;  %v4888_v20 = vld [vmem:[%s5123_s26] sm:$0xff] }
 0x126   : > { %4327 = vrcp.f32 %v5503_v58  ;;  %v1383_v0 = vsel %vm1380_vm3, %v1382_v61, %v1378_v60  ;;  %v5518_v15 = vadd.f32 1.0, %v4322_v7  ;;  %vm5531_vm9 = vmor %vm1390_vm4, %vm1391_vm5  ;;  %v2391_v19 = vadd.f32 %v5488_v37, %v2390_v51 }
 0x127   : > { %v3344_v23 = vmul.f32 %v1383_v0, %v5225_v44  ;;  %v1387_v4 = vsub.f32 1.0, %v1386_v62  ;;  %4329 = vpow2.f32 %v4187_v5  ;;  %vm1405_vm10 = vweird.f32 %v5503_v58  ;;  %v558_v0 = vpop.f32.mrf.mxu1  ;;  %v237_v62 = vld [vmem:[%s5123_s26 + $0x120] sm:$0xff] }
 0x128   : > { %v385_v9 = vpop.f32.mrf.mxu0  ;;  %v5521_v44 = vpop.eup %4323  ;;  %4331 = vrcp.f32 %v5518_v15  ;;  %v1409_v22 = vand.u32 2147483647, %v5503_v58  ;;  %v1411_v18 = vand.u32 2147483648, %v5503_v58  ;;  %v2395_v52 = vsel %vm5546_vm11, %v5488_v37, %v2391_v19 }
 0x129   : > { %v386_v12 = vadd.f32 %v385_v9, %v5337_v14  ;;  %3463 = vmatmul.f32.gmra.mxu3 %v3344_v23  ;;  %v1388_v21 = vmul.f32 %v4320_v57, %v1387_v4  ;;  %v2403_v46 = vmul.f32 %v5521_v44, %v5499_v39  ;;  %v559_v9 = vadd.f32 %v558_v0, %v5449_v13 }
 0x12a   : > { %vm5580_vm14 = vcmp.eq.f32.partialorder %v1409_v22, 8.507059e+37  ;;  %v1412_v11 = vor.u32 1.1754944e-38, %v1411_v18  ;;  %vm2407_vm3 = vweird.f32 %v5499_v39  ;;  %vm2408_vm4 = vweird.f32 %v5521_v44 }
 0x12b   : > { %v4326_v27 = vpop.eup %4325  ;;  %v4137_v63 = vmul.f32 -1.442695, %v386_v12  ;;  %432 = vmatmul.f32.gmra.mxu0 %v233_v10  ;;  %v1389_v30 = vadd.f32 %v4320_v57, %v1388_v21  ;;  %v2404_v60 = vsub.f32 1.0, %v2403_v46  ;;  %v4189_v42 = vmul.f32 -1.442695, %v559_v9  ;;  %vm5657_vm7 = vmor %vm2407_vm3, %vm2408_vm4  ;;  %v5688_v9 = vld [vmem:[%s5123_s26 + $0x98] sm:$0xff] }
 0x12c   : > { %v4328_v36 = vpop.eup %4327  ;;  %v5537_v40 = vadd.f32 1.0, %v4326_v27  ;;  %805 = vmatmul.f32.gmra.mxu2 %v5688_v9 }
 0x12d   : > { %4333 = vpow2.f32 %v4137_v63  ;;  %v1393_v43 = vsel %vm5531_vm9, %v4320_v57, %v1389_v30  ;;  %v1401_v45 = vmul.f32 %v4328_v36, %v5503_v58  ;;  %v4330_v53 = vpop.eup %4329  ;;  %vm1406_vm12 = vweird.f32 %v4328_v36 }
 0x12e   : > { %4335 = vrcp.f32 %v5537_v40  ;;  %v1398_v47 = vsel %vm5523_vm8, %v1397_v16, %v1393_v43  ;;  %v5575_v61 = vadd.f32 1.0, %v4330_v53  ;;  %v1424_v33 = vand.u32 2147483647, %v5537_v40  ;;  %v5578_v37 = vpop.eup %4331  ;;  %vm1407_vm0 = vmor %vm1405_vm10, %vm1406_vm12 }
 0x12f   : > { %v3345_v17 = vmul.f32 %v1398_v47, %v5257_v54  ;;  %v1402_v49 = vsub.f32 1.0, %v1401_v45  ;;  %v2399_v54 = vor.u32 1.1754944e-38, %v2398_v34  ;;  %4337 = vpow2.f32 %v4188_v50  ;;  %v561_v18 = vpop.f32.mrf.mxu1 }
 0x130   : > { %v388_v8 = vpop.f32.mrf.mxu0  ;;  %vm1420_vm15 = vweird.f32 %v5537_v40  ;;  %v1426_v4 = vand.u32 2147483648, %v5537_v40  ;;  %4339 = vrcp.f32 %v5575_v61  ;;  %vm5602_vm1 = vcmp.eq.f32.partialorder %v1424_v33, 8.507059e+37 }
 0x131   : > { %v389_v29 = vadd.f32 %v388_v8, %v5337_v14  ;;  %3466 = vmatmul.f32.gmra.mxu3 %v3345_v17  ;;  %v1403_v57 = vmul.f32 %v4328_v36, %v1402_v49  ;;  %v5596_v7 = vsel %vm5570_vm13, %v2399_v54, %v2395_v52  ;;  %v5607_v58 = vadd.f32 %v749_v6, %v5568_v56 }
 0x132   : > { %v5612_v28 = vmul.f32 %v5578_v37, %v5518_v15  ;;  %v2405_v16 = vmul.f32 %v5521_v44, %v2404_v60  ;;  %v1427_v63 = vor.u32 1.1754944e-38, %v1426_v4  ;;  %v3743_v30 = vsub.f32 1.0, %v5596_v7 }
 0x133   : > { %v4334_v1 = vpop.eup %4333  ;;  %v4138_v2 = vmul.f32 -1.442695, %v389_v29  ;;  %435 = vmatmul.f32.gmra.mxu0 %v234_v55  ;;  %v1404_v23 = vadd.f32 %v4328_v36, %v1403_v57  ;;  %v2413_v53 = vand.u32 2147483648, %v5499_v39  ;;  %v2411_v29 = vand.u32 2147483647, %v5499_v39 }
 0x134   : > { %v5586_v5 = vpop.eup %4335  ;;  %v5588_v51 = vadd.f32 1.0, %v4334_v1  ;;  %v2419_v6 = vsub.f32 1.0, %v5612_v28  ;;  %v2406_v47 = vadd.f32 %v5521_v44, %v2405_v16  ;;  %v5651_v54 = vmul.f32 %v4888_v20, %v3743_v30  ;;  %v4889_v1 = vld [vmem:[%s5123_s26 + $0x78] sm:$0xff]  ;;  %v4891_v20 = vld [vmem:[%s5123_s26 + $0x80] sm:$0xff] }
 0x135   : > { %4341 = vpow2.f32 %v4138_v2  ;;  %v1408_v10 = vsel %vm1407_vm0, %v4328_v36, %v1404_v23  ;;  %v1416_v12 = vmul.f32 %v5586_v5, %v5537_v40  ;;  %v4338_v32 = vpop.eup %4337  ;;  %v235_v36 = vld [vmem:[%s5123_s26 + $0x110] sm:$0xff]  ;;  %vm1421_vm2 = vweird.f32 %v5586_v5  ;;  %v236_v28 = vld [vmem:[%s5123_s26 + $0x118] sm:$0xff] }
 0x136   : > { %4343 = vrcp.f32 %v5588_v51  ;;  %v1413_v38 = vsel %vm5580_vm14, %v1412_v11, %v1408_v10  ;;  %v1439_v24 = vand.u32 2147483647, %v5588_v51  ;;  %v5626_v22 = vadd.f32 1.0, %v4338_v32  ;;  %v5629_v41 = vpop.eup %4339  ;;  %vm5639_vm5 = vmor %vm1420_vm15, %vm1421_vm2 }
 0x137   : > { %v3346_v34 = vmul.f32 %v4887_v26, %v1413_v38  ;;  %v1417_v27 = vsub.f32 1.0, %v1416_v12  ;;  %v1441_v46 = vand.u32 2147483648, %v5588_v51  ;;  %4345 = vpow2.f32 %v4189_v42 }
 0x138   : > { %v391_v19 = vpop.f32.mrf.mxu0  ;;  %4347 = vrcp.f32 %v5626_v22  ;;  %vm1435_vm6 = vweird.f32 %v5588_v51  ;;  %v562_v57 = vadd.f32 %v561_v18, %v5449_v13  ;;  %vm5669_vm8 = vcmp.eq.f32.partialorder %v1439_v24, 8.507059e+37 }
 0x139   : > { %v392_v43 = vadd.f32 %v391_v19, %v5337_v14  ;;  %3469 = vmatmul.f32.gmra.mxu3 %v3346_v34  ;;  %v1418_v45 = vmul.f32 %v5586_v5, %v1417_v27  ;;  %v5674_v39 = vadd.f32 %v752_v31, %v5568_v56  ;;  %v5679_v59 = vmul.f32 %v5629_v41, %v5575_v61 }
 0x13a   : > { %v1442_v0 = vor.u32 1.1754944e-38, %v1441_v46  ;;  %v2410_v4 = vsel %vm5657_vm7, %v5521_v44, %v2406_v47  ;;  %vm5694_vm10 = vcmp.eq.f32.partialorder %v2411_v29, 8.507059e+37  ;;  %v4190_v16 = vmul.f32 -1.442695, %v562_v57  ;;  %v5752_v57 = vld [vmem:[%s5123_s26 + $0xa0] sm:$0xff] }
 0x13b   : > { %v4342_v17 = vpop.eup %4341  ;;  %v4139_v49 = vmul.f32 -1.442695, %v392_v43  ;;  %438 = vmatmul.f32.gmra.mxu0 %v235_v36  ;;  %v1419_v50 = vadd.f32 %v5586_v5, %v1418_v45  ;;  %v2420_v30 = vmul.f32 %v5578_v37, %v2419_v6  ;;  %v2434_v31 = vsub.f32 1.0, %v5679_v59  ;;  %808 = vmatmul.f32.gmra.mxu2 %v5752_v57 }
 0x13c   : > { %v5646_v8 = vpop.eup %4343  ;;  %v5648_v55 = vadd.f32 1.0, %v4342_v17  ;;  %vm2422_vm13 = vweird.f32 %v5518_v15  ;;  %vm2423_vm14 = vweird.f32 %v5578_v37  ;;  %vm2437_vm7 = vweird.f32 %v5575_v61 }
 0x13d   : > { %4349 = vpow2.f32 %v4139_v49  ;;  %v1423_v33 = vsel %vm5639_vm5, %v5586_v5, %v1419_v50  ;;  %v1431_v60 = vmul.f32 %v5646_v8, %v5588_v51  ;;  %v2414_v5 = vor.u32 1.1754944e-38, %v2413_v53  ;;  %v4346_v10 = vpop.eup %4345  ;;  %v564_v49 = vpop.f32.mrf.mxu1  ;;  %vm5744_vm0 = vmor %vm2422_vm13, %vm2423_vm14 }
 0x13e   : > { %4351 = vrcp.f32 %v5648_v55  ;;  %v1428_v11 = vsel %vm5602_vm1, %v1427_v63, %v1423_v33  ;;  %vm1436_vm9 = vweird.f32 %v5646_v8  ;;  %v1454_v21 = vand.u32 2147483647, %v5648_v55  ;;  %v5698_v26 = vpop.eup %4347  ;;  %v755_v63 = vpop.f32.mrf.mxu2 }
 0x13f   : > { %v3347_v2 = vmul.f32 %v4889_v1, %v1428_v11  ;;  %v1432_v23 = vsub.f32 1.0, %v1431_v60  ;;  %v5702_v27 = vadd.f32 1.0, %v4346_v10  ;;  %v5708_v32 = vmul.f32 %v5698_v26, %v5626_v22  ;;  %vm1437_vm12 = vmor %vm1435_vm6, %vm1436_vm9 }
 0x140   : > { %v394_v12 = vpop.f32.mrf.mxu0  ;;  %v1456_v19 = vand.u32 2147483648, %v5648_v55  ;;  %4353 = vpow2.f32 %v4190_v16  ;;  %vm1450_vm11 = vweird.f32 %v5648_v55  ;;  %v5716_v43 = vsel %vm5694_vm10, %v2414_v5, %v2410_v4 }
 0x141   : > { %v395_v44 = vadd.f32 %v394_v12, %v5337_v14  ;;  %3472 = vmatmul.f32.gmra.mxu3 %v3347_v2  ;;  %v1433_v34 = vmul.f32 %v5646_v8, %v1432_v23  ;;  %4355 = vrcp.f32 %v5702_v27  ;;  %v5727_v46 = vadd.f32 %v755_v63, %v5568_v56 }
 0x142   : > { %vm5735_vm15 = vcmp.eq.f32.partialorder %v1454_v21, 8.507059e+37  ;;  %v2421_v17 = vadd.f32 %v5578_v37, %v2420_v30  ;;  %v1457_v50 = vor.u32 1.1754944e-38, %v1456_v19  ;;  %v3744_v52 = vsub.f32 1.0, %v5716_v43 }
 0x143   : > { %v4350_v36 = vpop.eup %4349  ;;  %v4140_v24 = vmul.f32 -1.442695, %v395_v44  ;;  %441 = vmatmul.f32.gmra.mxu0 %v236_v28  ;;  %v1434_v42 = vadd.f32 %v5646_v8, %v1433_v34  ;;  %v2428_v1 = vand.u32 2147483648, %v5518_v15  ;;  %v565_v2 = vadd.f32 %v564_v49, %v5449_v13  ;;  %v4893_v28 = vld [vmem:[%s5123_s26 + $0x8] sm:$0xff] }
 0x144   : > { %v5718_v45 = vpop.eup %4351  ;;  %v5720_v6 = vadd.f32 1.0, %v4350_v36  ;;  %v2425_v12 = vsel %vm5744_vm0, %v5578_v37, %v2421_v17  ;;  %v5770_v21 = vmul.f32 %v4893_v28, %v3744_v52 }
 0x145   : > { %4357 = vpow2.f32 %v4140_v24  ;;  %v1438_v47 = vsel %vm1437_vm12, %v5646_v8, %v1434_v42  ;;  %v1446_v18 = vmul.f32 %v5718_v45, %v5648_v55  ;;  %v2449_v8 = vsub.f32 1.0, %v5708_v32 }
 0x146   : > { %4359 = vrcp.f32 %v5720_v6  ;;  %v1443_v25 = vsel %vm5669_vm8, %v1442_v0, %v1438_v47  ;;  %vm1451_vm1 = vweird.f32 %v5718_v45  ;;  %v4354_v33 = vpop.eup %4353  ;;  %v1469_v11 = vand.u32 2147483647, %v5720_v6  ;;  %v758_v17 = vpop.f32.mrf.mxu2 }
 0x147   : > { %v3348_v40 = vmul.f32 %v4891_v20, %v1443_v25  ;;  %v1447_v29 = vsub.f32 1.0, %v1446_v18  ;;  %v2426_v0 = vand.u32 2147483647, %v5518_v15  ;;  %v5760_v23 = vpop.eup %4355  ;;  %v5764_v10 = vadd.f32 1.0, %v4354_v33  ;;  %vm1452_vm3 = vmor %vm1450_vm11, %vm1451_vm1  ;;  %v5806_v20 = vld [vmem:[%s5123_s26 + $0xa8] sm:$0xff] }
 0x148   : > { %v397_v60 = vpop.f32.mrf.mxu0  ;;  %v1471_v15 = vand.u32 2147483648, %v5720_v6  ;;  %v2429_v38 = vor.u32 1.1754944e-38, %v2428_v1  ;;  %v5775_v34 = vmul.f32 %v5760_v23, %v5702_v27  ;;  %vm1465_vm4 = vweird.f32 %v5720_v6  ;;  %811 = vmatmul.f32.gmra.mxu2 %v5806_v20  ;;  %v567_v1 = vpop.f32.mrf.mxu1 }
 0x149   : > { %v398_v4 = vadd.f32 %v397_v60, %v5337_v14  ;;  %3475 = vmatmul.f32.gmra.mxu3 %v3348_v40  ;;  %v1448_v5 = vmul.f32 %v5718_v45, %v1447_v29  ;;  %vm2427_vm2 = vcmp.eq.f32.partialorder %v2426_v0, 8.507059e+37  ;;  %4361 = vrcp.f32 %v5764_v10  ;;  %v238_v29 = vld [vmem:[%s5123_s26 + $0x128] sm:$0xff] }
 0x14a   : > { %v5788_v36 = vsel %vm2427_vm2, %v2429_v38, %v2425_v12  ;;  %v4191_v24 = vmul.f32 -1.442695, %v565_v2  ;;  %vm5795_vm5 = vcmp.eq.f32.partialorder %v1469_v11, 8.507059e+37  ;;  %v1472_v49 = vor.u32 1.1754944e-38, %v1471_v15 }
 0x14b   : > { %v4358_v16 = vpop.eup %4357  ;;  %v4141_v44 = vmul.f32 -1.442695, %v398_v4  ;;  %444 = vmatmul.f32.gmra.mxu0 %v237_v62  ;;  %v1449_v63 = vadd.f32 %v5718_v45, %v1448_v5  ;;  %v3745_v25 = vsub.f32 1.0, %v5788_v36  ;;  %v2435_v0 = vmul.f32 %v5629_v41, %v2434_v31  ;;  %v4896_v4 = vld [vmem:[%s5123_s26 + $0x10] sm:$0xff] }
 0x14c   : > { %v5779_v30 = vpop.eup %4359  ;;  %v5781_v37 = vadd.f32 1.0, %v4358_v16  ;;  %v3428_v19 = vpop.f32.mrf.mxu3  ;;  %vm2438_vm8 = vweird.f32 %v5629_v41 }
 0x14d   : > { %4363 = vpow2.f32 %v4141_v44  ;;  %v3617_v42 = vadd.f32 %v3428_v19, %v5607_v58  ;;  %v1453_v47 = vsel %vm1452_vm3, %v5718_v45, %v1449_v63  ;;  %v1461_v18 = vmul.f32 %v5779_v30, %v5720_v6  ;;  %v4894_v45 = vld [vmem:[%s5123_s26 + $0x88] sm:$0xff]  ;;  %vm5867_vm12 = vmor %vm2437_vm7, %vm2438_vm8 }
 0x14e   : > { %4365 = vrcp.f32 %v5781_v37  ;;  %v1458_v48 = vsel %vm5735_vm15, %v1457_v50, %v1453_v47  ;;  %v2464_v58 = vsub.f32 1.0, %v5775_v34  ;;  %vm1466_vm6 = vweird.f32 %v5779_v30 }
 0x14f   : > { %4367 = vtanh.f32 %v3617_v42  ;;  %v3349_v52 = vmul.f32 %v4894_v45, %v1458_v48  ;;  %v1462_v53 = vsub.f32 1.0, %v1461_v18  ;;  %v1486_v51 = vand.u32 2147483648, %v5781_v37  ;;  %v5815_v33 = vpop.eup %4361  ;;  %vm5845_vm10 = vmor %vm1465_vm4, %vm1466_vm6 }
 0x150   : > { %v400_v40 = vpop.f32.mrf.mxu0  ;;  %4369 = vpow2.f32 %v4191_v24  ;;  %v5813_v50 = vadd.f32 %v758_v17, %v5568_v56  ;;  %v1484_v11 = vand.u32 2147483647, %v5781_v37  ;;  %v5825_v2 = vmul.f32 %v5815_v33, %v5764_v10 }
 0x151   : > { %v401_v60 = vadd.f32 %v400_v40, %v5337_v14  ;;  %3478 = vmatmul.f32.gmra.mxu3 %v3349_v52  ;;  %v1463_v62 = vmul.f32 %v5779_v30, %v1462_v53  ;;  %v5828_v5 = vmul.f32 %v4896_v4, %v3745_v25  ;;  %vm1480_vm9 = vweird.f32 %v5781_v37  ;;  %v5887_v40 = vld [vmem:[%s5123_s26 + $0xb0] sm:$0xff] }
 0x152   : > { %v5834_v59 = vor.u32 1.1754944e-38, %v1486_v51  ;;  %v2436_v31 = vadd.f32 %v5629_v41, %v2435_v0  ;;  %v2441_v19 = vand.u32 2147483647, %v5575_v61  ;;  %v2443_v24 = vand.u32 2147483648, %v5575_v61  ;;  %v4897_v61 = vld [vmem:[%s5123_s26 + $0x90] sm:$0xff]  ;;  %814 = vmatmul.f32.gmra.mxu2 %v5887_v40  ;;  %v761_v0 = vpop.f32.mrf.mxu2 }
 0x153   : > { %v4364_v12 = vpop.eup %4363  ;;  %v4142_v28 = vmul.f32 -1.442695, %v401_v60  ;;  %447 = vmatmul.f32.gmra.mxu0 %v238_v29  ;;  %v1464_v15 = vadd.f32 %v5779_v30, %v1463_v62  ;;  %v568_v42 = vadd.f32 %v567_v1, %v5449_v13  ;;  %vm5859_vm11 = vcmp.eq.f32.partialorder %v1484_v11, 8.507059e+37 }
 0x154   : > { %v5837_v38 = vpop.eup %4365  ;;  %v5839_v16 = vadd.f32 1.0, %v4364_v12  ;;  %v3431_v44 = vpop.f32.mrf.mxu3  ;;  %v2440_v29 = vsel %vm5867_vm12, %v5629_v41, %v2436_v31  ;;  %vm2442_vm14 = vcmp.eq.f32.partialorder %v2441_v19, 8.507059e+37  ;;  %v2444_v51 = vor.u32 1.1754944e-38, %v2443_v24 }
 0x155   : > { %v4368_v47 = vpop.eup %4367  ;;  %4371 = vpow2.f32 %v4142_v28  ;;  %v3618_v18 = vadd.f32 %v3431_v44, %v5674_v39  ;;  %v1468_v6 = vsel %vm5845_vm10, %v5779_v30, %v1464_v15  ;;  %v1476_v17 = vmul.f32 %v5837_v38, %v5781_v37 }
 0x156   : > { %v4370_v39 = vpop.eup %4369  ;;  %4373 = vrcp.f32 %v5839_v16  ;;  %v3869_v30 = vmul.f32 %v4368_v47, %v5596_v7  ;;  %v1473_v25 = vsel %vm5795_vm5, %v1472_v49, %v1468_v6  ;;  %vm1481_vm13 = vweird.f32 %v5837_v38  ;;  %v239_v49 = vld [vmem:[%s5123_s26 + $0x130] sm:$0xff] }
 0x157   : > { %4375 = vtanh.f32 %v3618_v18  ;;  %v3350_v45 = vmul.f32 %v4897_v61, %v1473_v25  ;;  %v5884_v52 = vadd.f32 1.0, %v4370_v39  ;;  %v1477_v53 = vsub.f32 1.0, %v1476_v17  ;;  %vm1482_vm15 = vmor %vm1480_vm9, %vm1481_vm13  ;;  %v4899_v17 = vld [vmem:[%s5123_s26 + $0x18] sm:$0xff] }
 0x158   : > { %v3932_v7 = vadd.f32 %v3869_v30, %v5651_v54  ;;  %v403_v55 = vpop.f32.mrf.mxu0  ;;  %v4192_v11 = vmul.f32 -1.442695, %v568_v42  ;;  %v2479_v54 = vsub.f32 1.0, %v5825_v2  ;;  %v5900_v1 = vsel %vm2442_vm14, %v2444_v51, %v2440_v29  ;;  %v4903_v30 = vld [vmem:[%s5123_s26 + $0x20] sm:$0xff]  ;;  %v243_v2 = vld [vmem:[%s5123_s26 + $0x150] sm:$0xff] }
 0x159   : > { %v404_v60 = vadd.f32 %v403_v55, %v5337_v14  ;;  %3481 = vmatmul.f32.gmra.mxu3 %v3350_v45  ;;  %4377 = vrcp.f32 %v5884_v52  ;;  %v1478_v62 = vmul.f32 %v5837_v38, %v1477_v53  ;;  %v1499_v4 = vand.u32 2147483647, %v5839_v16  ;;  %v240_v45 = vld [vmem:[%s5123_s26 + $0x138] sm:$0xff]  ;;  %v570_v53 = vpop.f32.mrf.mxu1 }
 0x15a   : > { %3995 = vst [vmem:[%s5881_s17] sm:$0xff] %v3932_v7  ;;  %v1501_v41 = vand.u32 2147483648, %v5839_v16  ;;  %v3746_v31 = vsub.f32 1.0, %v5900_v1  ;;  %4379 = vpow2.f32 %v4192_v11  ;;  %vm1495_vm0 = vweird.f32 %v5839_v16 }
 0x15b   : > { %v4372_v12 = vpop.eup %4371  ;;  %v4143_v28 = vmul.f32 -1.442695, %v404_v60  ;;  %450 = vmatmul.f32.gmra.mxu0 %v239_v49  ;;  %v1479_v15 = vadd.f32 %v5837_v38, %v1478_v62  ;;  %v5918_v42 = vadd.f32 %v761_v0, %v5568_v56  ;;  %vm5933_vm1 = vcmp.eq.f32.partialorder %v1499_v4, 8.507059e+37  ;;  %v6050_v4 = vld [vmem:[%s5123_s26 + $0xe0] sm:$0xff] }
 0x15c   : > { %v5906_v44 = vpop.eup %4373  ;;  %v5908_v63 = vadd.f32 1.0, %v4372_v12  ;;  %v3434_v19 = vpop.f32.mrf.mxu3  ;;  %v5915_v24 = vor.u32 1.1754944e-38, %v1501_v41  ;;  %v5924_v3 = vmul.f32 %v4899_v17, %v3746_v31  ;;  %vm2452_vm3 = vweird.f32 %v5626_v22 }
 0x15d   : > { %v4376_v47 = vpop.eup %4375  ;;  %4381 = vpow2.f32 %v4143_v28  ;;  %v3619_v18 = vadd.f32 %v3434_v19, %v5727_v46  ;;  %v1483_v6 = vsel %vm1482_vm15, %v5837_v38, %v1479_v15  ;;  %v1491_v35 = vmul.f32 %v5906_v44, %v5839_v16  ;;  %v5984_v19 = vld [vmem:[%s5123_s26 + $0xd8] sm:$0xff] }
 0x15e   : > { %4383 = vrcp.f32 %v5908_v63  ;;  %v3870_v37 = vmul.f32 %v4376_v47, %v5716_v43  ;;  %v1488_v39 = vsel %vm5859_vm11, %v5834_v59, %v1483_v6  ;;  %vm1496_vm2 = vweird.f32 %v5906_v44  ;;  %v5945_v59 = vld [vmem:[%s5123_s26 + $0xb8] sm:$0xff]  ;;  %623 = vmatmul.f32.gmra.mxu1 %v5984_v19 }
 0x15f   : > { %v5937_v46 = vpop.eup %4377  ;;  %4385 = vtanh.f32 %v3619_v18  ;;  %v3351_v38 = vmul.f32 %v5688_v9, %v1488_v39  ;;  %v2450_v43 = vmul.f32 %v5698_v26, %v2449_v8  ;;  %817 = vmatmul.f32.gmra.mxu2 %v5945_v59  ;;  %v1492_v9 = vsub.f32 1.0, %v1491_v35  ;;  %vm1497_vm7 = vmor %vm1495_vm0, %vm1496_vm2 }
 0x160   : > { %v3933_v48 = vadd.f32 %v3870_v37, %v5770_v21  ;;  %v406_v25 = vpop.f32.mrf.mxu0  ;;  %v5951_v61 = vmul.f32 %v5937_v46, %v5884_v52  ;;  %v4380_v32 = vpop.eup %4379  ;;  %vm2453_vm4 = vweird.f32 %v5698_v26  ;;  %v2456_v21 = vand.u32 2147483647, %v5626_v22 }
 0x161   : > { %v407_v8 = vadd.f32 %v406_v25, %v5337_v14  ;;  %3484 = vmatmul.f32.gmra.mxu3 %v3351_v38  ;;  %v2451_v7 = vadd.f32 %v5698_v26, %v2450_v43  ;;  %v5961_v49 = vadd.f32 1.0, %v4380_v32  ;;  %v1493_v29 = vmul.f32 %v5906_v44, %v1492_v9  ;;  %vm5964_vm5 = vmor %vm2452_vm3, %vm2453_vm4  ;;  %v764_v38 = vpop.f32.mrf.mxu2  ;;  %v6006_v43 = vld [vmem:[%s5123_s26 + $0xc0] sm:$0xff] }
 0x162   : > { %3996 = vst [vmem:[%s5881_s17 + $0x8] sm:$0xff] %v3933_v48  ;;  %v2494_v55 = vsub.f32 1.0, %v5951_v61  ;;  %v2458_v60 = vand.u32 2147483648, %v5626_v22  ;;  %vm5972_vm6 = vcmp.eq.f32.partialorder %v2456_v21, 8.507059e+37  ;;  %v571_v41 = vadd.f32 %v570_v53, %v5449_v13  ;;  %v241_v25 = vld [vmem:[%s5123_s26 + $0x140] sm:$0xff] }
 0x163   : > { %v4382_v62 = vpop.eup %4381  ;;  %v4144_v11 = vmul.f32 -1.442695, %v407_v8  ;;  %453 = vmatmul.f32.gmra.mxu0 %v240_v45  ;;  %v2455_v0 = vsel %vm5964_vm5, %v5698_v26, %v2451_v7  ;;  %4387 = vrcp.f32 %v5961_v49  ;;  %v1494_v22 = vadd.f32 %v5906_v44, %v1493_v29 }
 0x164   : > { %v5977_v12 = vpop.eup %4383  ;;  %v5979_v28 = vadd.f32 1.0, %v4382_v62  ;;  %v3437_v15 = vpop.f32.mrf.mxu3  ;;  %v2459_v31 = vor.u32 1.1754944e-38, %v2458_v60  ;;  %v4193_v18 = vmul.f32 -1.442695, %v571_v41  ;;  %vm1510_vm8 = vweird.f32 %v5908_v63 }
 0x165   : > { %v4386_v26 = vpop.eup %4385  ;;  %4389 = vpow2.f32 %v4144_v11  ;;  %v3620_v47 = vadd.f32 %v3437_v15, %v5813_v50  ;;  %v1506_v6 = vmul.f32 %v5977_v12, %v5908_v63  ;;  %v1498_v37 = vsel %vm1497_vm7, %v5906_v44, %v1494_v22 }
 0x166   : > { %4391 = vrcp.f32 %v5979_v28  ;;  %v3871_v17 = vmul.f32 %v4386_v26, %v5788_v36  ;;  %v5999_v50 = vsel %vm5972_vm6, %v2459_v31, %v2455_v0  ;;  %v1503_v16 = vsel %vm5933_vm1, %v5915_v24, %v1498_v37  ;;  %626 = vmatmul.f32.gmra.mxu1 %v6050_v4  ;;  %v573_v31 = vpop.f32.mrf.mxu1  ;;  %v6072_v37 = vld [vmem:[%s5123_s26 + $0xc8] sm:$0xff] }
 0x167   : > { %4393 = vtanh.f32 %v3620_v47  ;;  %v3747_v39 = vsub.f32 1.0, %v5999_v50  ;;  %v1507_v35 = vsub.f32 1.0, %v1506_v6  ;;  %820 = vmatmul.f32.gmra.mxu2 %v6006_v43  ;;  %v3352_v48 = vmul.f32 %v5752_v57, %v1503_v16 }
 0x168   : > { %v3934_v36 = vadd.f32 %v3871_v17, %v5828_v5  ;;  %v409_v44 = vpop.f32.mrf.mxu0  ;;  %4395 = vpow2.f32 %v4193_v18  ;;  %vm1511_vm9 = vweird.f32 %v5977_v12  ;;  %v1514_v5 = vand.u32 2147483647, %v5908_v63 }
 0x169   : > { %v410_v24 = vadd.f32 %v409_v44, %v5337_v14  ;;  %v6015_v45 = vmul.f32 %v4903_v30, %v3747_v39  ;;  %v1508_v9 = vmul.f32 %v5977_v12, %v1507_v35  ;;  %v6019_v53 = vpop.eup %4387  ;;  %3487 = vmatmul.f32.gmra.mxu3 %v3352_v48  ;;  %v1516_v57 = vand.u32 2147483648, %v5908_v63  ;;  %vm6044_vm11 = vmor %vm1510_vm8, %vm1511_vm9  ;;  %v242_v39 = vld [vmem:[%s5123_s26 + $0x148] sm:$0xff]  ;;  %v767_v48 = vpop.f32.mrf.mxu2 }
 0x16a   : > { %3997 = vst [vmem:[%s5881_s17 + $0x10] sm:$0xff] %v3934_v36  ;;  %v6025_v32 = vadd.f32 %v764_v38, %v5568_v56  ;;  %v2465_v8 = vmul.f32 %v5760_v23, %v2464_v58  ;;  %v6032_v29 = vmul.f32 %v6019_v53, %v5961_v49  ;;  %vm2467_vm10 = vweird.f32 %v5702_v27 }
 0x16b   : > { %v4390_v7 = vpop.eup %4389  ;;  %v4145_v21 = vmul.f32 -1.442695, %v410_v24  ;;  %456 = vmatmul.f32.gmra.mxu0 %v241_v25  ;;  %v1509_v51 = vadd.f32 %v5977_v12, %v1508_v9  ;;  %vm1515_vm12 = vcmp.eq.f32.partialorder %v1514_v5, 8.507059e+37  ;;  %v1517_v58 = vor.u32 1.1754944e-38, %v1516_v57 }
 0x16c   : > { %v6036_v60 = vpop.eup %4391  ;;  %v6038_v62 = vadd.f32 1.0, %v4390_v7  ;;  %v3440_v11 = vpop.f32.mrf.mxu3  ;;  %v2466_v0 = vadd.f32 %v5760_v23, %v2465_v8  ;;  %v2509_v15 = vsub.f32 1.0, %v6032_v29  ;;  %vm2468_vm13 = vweird.f32 %v5760_v23 }
 0x16d   : > { %v4394_v41 = vpop.eup %4393  ;;  %4397 = vpow2.f32 %v4145_v21  ;;  %v3621_v22 = vadd.f32 %v3440_v11, %v5918_v42  ;;  %v1513_v63 = vsel %vm6044_vm11, %v5977_v12, %v1509_v51  ;;  %vm6066_vm14 = vmor %vm2467_vm10, %vm2468_vm13  ;;  %v2471_v12 = vand.u32 2147483647, %v5702_v27  ;;  %v6105_v11 = vld [vmem:[%s5123_s26 + $0xe8] sm:$0xff] }
 0x16e   : > { %v4396_v26 = vpop.eup %4395  ;;  %4399 = vrcp.f32 %v6038_v62  ;;  %v3872_v47 = vmul.f32 %v4394_v41, %v5900_v1  ;;  %v1518_v18 = vsel %vm1515_vm12, %v1517_v58, %v1513_v63  ;;  %v2473_v35 = vand.u32 2147483648, %v5702_v27  ;;  %629 = vmatmul.f32.gmra.mxu1 %v6105_v11  ;;  %v576_v42 = vpop.f32.mrf.mxu1 }
 0x16f   : > { %4401 = vtanh.f32 %v3621_v22  ;;  %v6061_v6 = vadd.f32 1.0, %v4396_v26  ;;  %v3353_v17 = vmul.f32 %v5806_v20, %v1518_v18  ;;  %823 = vmatmul.f32.gmra.mxu2 %v6072_v37  ;;  %v2470_v20 = vsel %vm6066_vm14, %v5760_v23, %v2466_v0 }
 0x170   : > { %v3935_v1 = vadd.f32 %v3872_v47, %v5924_v3  ;;  %v412_v16 = vpop.f32.mrf.mxu0  ;;  %v574_v38 = vadd.f32 %v573_v31, %v5449_v13  ;;  %vm6084_vm15 = vcmp.eq.f32.partialorder %v2471_v12, 8.507059e+37  ;;  %v1521_v3 = vmul.f32 %v6036_v60, %v5979_v28  ;;  %v4907_v47 = vld [vmem:[%s5123_s26 + $0x28] sm:$0xff] }
 0x171   : > { %v413_v36 = vadd.f32 %v412_v16, %v5337_v14  ;;  %4403 = vrcp.f32 %v6061_v6  ;;  %3490 = vmatmul.f32.gmra.mxu3 %v3353_v17  ;;  %v2474_v25 = vor.u32 1.1754944e-38, %v2473_v35  ;;  %vm1525_vm0 = vweird.f32 %v5979_v28 }
 0x172   : > { %3998 = vst [vmem:[%s5881_s17 + $0x18] sm:$0xff] %v3935_v1  ;;  %v4194_v23 = vmul.f32 -1.442695, %v574_v38  ;;  %vm1526_vm1 = vweird.f32 %v6036_v60  ;;  %v1522_v30 = vsub.f32 1.0, %v1521_v3  ;;  %v1529_v9 = vand.u32 2147483647, %v5979_v28 }
 0x173   : > { %v4398_v27 = vpop.eup %4397  ;;  %v4146_v24 = vmul.f32 -1.442695, %v413_v36  ;;  %459 = vmatmul.f32.gmra.mxu0 %v242_v39  ;;  %v1531_v5 = vand.u32 2147483648, %v5979_v28  ;;  %v6101_v7 = vsel %vm6084_vm15, %v2474_v25, %v2470_v20  ;;  %v768_v51 = vadd.f32 %v767_v48, %v5568_v56  ;;  %vm1527_vm3 = vmor %vm1525_vm0, %vm1526_vm1 }
 0x174   : > { %v6095_v57 = vpop.eup %4399  ;;  %v6097_v8 = vadd.f32 1.0, %v4398_v27  ;;  %v3443_v21 = vpop.f32.mrf.mxu3  ;;  %4405 = vpow2.f32 %v4194_v23  ;;  %v3748_v0 = vsub.f32 1.0, %v6101_v7  ;;  %v1523_v41 = vmul.f32 %v6036_v60, %v1522_v30 }
 0x175   : > { %v4402_v34 = vpop.eup %4401  ;;  %4407 = vpow2.f32 %v4146_v24  ;;  %v3622_v58 = vadd.f32 %v3443_v21, %v6025_v32  ;;  %vm6113_vm2 = vcmp.eq.f32.partialorder %v1529_v9, 8.507059e+37  ;;  %v1532_v31 = vor.u32 1.1754944e-38, %v1531_v5  ;;  %v6165_v21 = vld [vmem:[%s5123_s26 + $0xf0] sm:$0xff] }
 0x176   : > { %4409 = vrcp.f32 %v6097_v8  ;;  %v3873_v22 = vmul.f32 %v4402_v34, %v5999_v50  ;;  %v3811_v18 = vmul.f32 %v4907_v47, %v3748_v0  ;;  %v1524_v32 = vadd.f32 %v6036_v60, %v1523_v41  ;;  %v6125_v50 = vld [vmem:[%s5123_s26 + $0xd0] sm:$0xff]  ;;  %632 = vmatmul.f32.gmra.mxu1 %v6165_v21 }
 0x177   : > { %v6117_v26 = vpop.eup %4403  ;;  %4411 = vtanh.f32 %v3622_v58  ;;  %v2480_v17 = vmul.f32 %v5815_v33, %v2479_v54  ;;  %826 = vmatmul.f32.gmra.mxu2 %v6125_v50  ;;  %vm2482_vm4 = vweird.f32 %v5764_v10  ;;  %vm2483_vm5 = vweird.f32 %v5815_v33 }
 0x178   : > { %v3936_v12 = vadd.f32 %v3873_v22, %v6015_v45  ;;  %v6131_v1 = vmul.f32 %v6117_v26, %v6061_v6  ;;  %v415_v16 = vpop.f32.mrf.mxu0  ;;  %v1528_v39 = vsel %vm1527_vm3, %v6036_v60, %v1524_v32  ;;  %vm6143_vm6 = vmor %vm2482_vm4, %vm2483_vm5  ;;  %v2486_v35 = vand.u32 2147483647, %v5764_v10 }
 0x179   : > { %v416_v54 = vadd.f32 %v415_v16, %v5337_v14  ;;  %v2481_v45 = vadd.f32 %v5815_v33, %v2480_v17  ;;  %v1533_v36 = vsel %vm6113_vm2, %v1532_v31, %v1528_v39  ;;  %v2488_v44 = vand.u32 2147483648, %v5764_v10 }
 0x17a   : > { %v4406_v38 = vpop.eup %4405  ;;  %3999 = vst [vmem:[%s5881_s17 + $0x20] sm:$0xff] %v3936_v12  ;;  %v2524_v28 = vsub.f32 1.0, %v6131_v1  ;;  %v577_v60 = vadd.f32 %v576_v42, %v5449_v13  ;;  %v3354_v23 = vmul.f32 %v5887_v40, %v1533_v36  ;;  %vm2487_vm7 = vcmp.eq.f32.partialorder %v2486_v35, 8.507059e+37  ;;  %v4910_v42 = vld [vmem:[%s5123_s26 + $0x30] sm:$0xff] }
 0x17b   : > { %v4408_v3 = vpop.eup %4407  ;;  %v4147_v48 = vmul.f32 -1.442695, %v416_v54  ;;  %v6154_v25 = vadd.f32 1.0, %v4406_v38  ;;  %462 = vmatmul.f32.gmra.mxu0 %v243_v2  ;;  %v2485_v27 = vsel %vm6143_vm6, %v5815_v33, %v2481_v45  ;;  %v2489_v9 = vor.u32 1.1754944e-38, %v2488_v44  ;;  %v770_v33 = vpop.f32.mrf.mxu2 }
 0x17c   : > { %v6160_v24 = vpop.eup %4409  ;;  %v6162_v30 = vadd.f32 1.0, %v4408_v3  ;;  %v3446_v10 = vpop.f32.mrf.mxu3  ;;  %v4195_v5 = vmul.f32 -1.442695, %v577_v60  ;;  %3493 = vmatmul.f32.gmra.mxu3 %v3354_v23  ;;  %v1536_v58 = vmul.f32 %v6095_v57, %v6038_v62  ;;  %vm1540_vm8 = vweird.f32 %v6038_v62 }
 0x17d   : > { %v4412_v34 = vpop.eup %4411  ;;  %4413 = vpow2.f32 %v4147_v48  ;;  %v3623_v40 = vadd.f32 %v3446_v10, %v768_v51  ;;  %v2490_v41 = vsel %vm2487_vm7, %v2489_v9, %v2485_v27  ;;  %vm1541_vm9 = vweird.f32 %v6095_v57  ;;  %v579_v54 = vpop.f32.mrf.mxu1  ;;  %v6215_v27 = vld [vmem:[%s5123_s26 + $0xf8] sm:$0xff] }
 0x17e   : > { %4415 = vrcp.f32 %v6162_v30  ;;  %v3874_v0 = vmul.f32 %v4412_v34, %v6101_v7  ;;  %v3749_v22 = vsub.f32 1.0, %v2490_v41  ;;  %v1537_v51 = vsub.f32 1.0, %v1536_v58  ;;  %v244_v7 = vld [vmem:[%s5123_s26 + $0x158] sm:$0xff]  ;;  %vm6197_vm12 = vmor %vm1540_vm8, %vm1541_vm9  ;;  %635 = vmatmul.f32.gmra.mxu1 %v6215_v27 }
 0x17f   : > { %4417 = vrcp.f32 %v6154_v25  ;;  %v1544_v63 = vand.u32 2147483647, %v6038_v62  ;;  %829 = vmatmul.f32.gmra.mxu2 %v5984_v19  ;;  %v1546_v32 = vand.u32 2147483648, %v6038_v62  ;;  %v771_v17 = vadd.f32 %v770_v33, %v5568_v56 }
 0x180   : > { %v3937_v31 = vadd.f32 %v3874_v0, %v3811_v18  ;;  %4419 = vtanh.f32 %v3623_v40  ;;  %v418_v47 = vpop.f32.mrf.mxu0  ;;  %v3812_v12 = vmul.f32 %v4910_v42, %v3749_v22  ;;  %v1538_v2 = vmul.f32 %v6095_v57, %v1537_v51 }
 0x181   : > { %v419_v16 = vadd.f32 %v418_v47, %v5337_v14  ;;  %4421 = vpow2.f32 %v4195_v5  ;;  %vm6184_vm10 = vcmp.eq.f32.partialorder %v1544_v63, 8.507059e+37  ;;  %v1547_v18 = vor.u32 1.1754944e-38, %v1546_v32 }
 0x182   : > { %4000 = vst [vmem:[%s5881_s17 + $0x28] sm:$0xff] %v3937_v31  ;;  %v2495_v45 = vmul.f32 %v5937_v46, %v2494_v55  ;;  %vm2497_vm11 = vweird.f32 %v5884_v52  ;;  %v1539_v38 = vadd.f32 %v6095_v57, %v1538_v2  ;;  %vm2498_vm13 = vweird.f32 %v5937_v46 }
 0x183   : > { %v4414_v20 = vpop.eup %4413  ;;  %v4148_v35 = vmul.f32 -1.442695, %v419_v16  ;;  %465 = vmatmul.f32.gmra.mxu0 %v244_v7  ;;  %v2501_v61 = vand.u32 2147483647, %v5884_v52  ;;  %vm6208_vm14 = vmor %vm2497_vm11, %vm2498_vm13  ;;  %v2503_v62 = vand.u32 2147483648, %v5884_v52  ;;  %v580_v23 = vadd.f32 %v579_v54, %v5449_v13  ;;  %v773_v63 = vpop.f32.mrf.mxu2 }
 0x184   : > { %v6203_v55 = vpop.eup %4415  ;;  %v6205_v44 = vadd.f32 1.0, %v4414_v20  ;;  %v2496_v60 = vadd.f32 %v5937_v46, %v2495_v45  ;;  %v3449_v48 = vpop.f32.mrf.mxu3  ;;  %v1543_v10 = vsel %vm6197_vm12, %v6095_v57, %v1539_v38  ;;  %v1551_v7 = vmul.f32 %v6160_v24, %v6097_v8 }
 0x185   : > { %v6218_v9 = vpop.eup %4417  ;;  %4423 = vpow2.f32 %v4148_v35  ;;  %vm6223_vm15 = vcmp.eq.f32.partialorder %v2501_v61, 8.507059e+37  ;;  %v3624_v34 = vadd.f32 %v3449_v48, %v771_v17  ;;  %v1548_v58 = vsel %vm6184_vm10, %v1547_v18, %v1543_v10  ;;  %v4912_v35 = vld [vmem:[%s5123_s26 + $0x38] sm:$0xff]  ;;  %v582_v5 = vpop.f32.mrf.mxu1 }
 0x186   : > { %v4420_v52 = vpop.eup %4419  ;;  %4425 = vrcp.f32 %v6205_v44  ;;  %v6230_v40 = vmul.f32 %v6218_v9, %v6154_v25  ;;  %v2500_v57 = vsel %vm6208_vm14, %v5937_v46, %v2496_v60  ;;  %v3355_v22 = vmul.f32 %v5945_v59, %v1548_v58  ;;  %v245_v46 = vld [vmem:[%s5123_s26 + $0x160] sm:$0xff] }
 0x187   : > { %v4422_v33 = vpop.eup %4421  ;;  %v3875_v0 = vmul.f32 %v4420_v52, %v2490_v41  ;;  %v2504_v51 = vor.u32 1.1754944e-38, %v2503_v62  ;;  %4427 = vtanh.f32 %v3624_v34  ;;  %832 = vmatmul.f32.gmra.mxu2 %v6050_v4  ;;  %v4196_v17 = vmul.f32 -1.442695, %v580_v23  ;;  %v6262_v60 = vld [vmem:[%s5123_s26 + $0x100] sm:$0xff] }
 0x188   : > { %v2539_v31 = vsub.f32 1.0, %v6230_v40  ;;  %v6240_v47 = vadd.f32 1.0, %v4422_v33  ;;  %v421_v32 = vpop.f32.mrf.mxu0  ;;  %3496 = vmatmul.f32.gmra.mxu3 %v3355_v22  ;;  %vm1555_vm0 = vweird.f32 %v6097_v8  ;;  %v1552_v2 = vsub.f32 1.0, %v1551_v7  ;;  %638 = vmatmul.f32.gmra.mxu1 %v6262_v60 }
 0x189   : > { %v3938_v42 = vadd.f32 %v3875_v0, %v3812_v12  ;;  %v2505_v59 = vsel %vm6223_vm15, %v2504_v51, %v2500_v57  ;;  %v422_v41 = vadd.f32 %v421_v32, %v5337_v14  ;;  %vm1556_vm1 = vweird.f32 %v6160_v24 }
 0x18a   : > { %4429 = vrcp.f32 %v6240_v47  ;;  %v3750_v16 = vsub.f32 1.0, %v2505_v59  ;;  %v1559_v12 = vand.u32 2147483647, %v6097_v8  ;;  %v1561_v18 = vand.u32 2147483648, %v6097_v8  ;;  %vm6279_vm4 = vmor %vm1555_vm0, %vm1556_vm1 }
 0x18b   : > { %v4424_v54 = vpop.eup %4423  ;;  %4001 = vst [vmem:[%s5881_s17 + $0x30] sm:$0xff] %v3938_v42  ;;  %v4149_v39 = vmul.f32 -1.442695, %v422_v41  ;;  %4431 = vpow2.f32 %v4196_v17  ;;  %468 = vmatmul.f32.gmra.mxu0 %v245_v46  ;;  %v1553_v36 = vmul.f32 %v6160_v24, %v1552_v2  ;;  %v774_v61 = vadd.f32 %v773_v63, %v5568_v56  ;;  %v246_v17 = vld [vmem:[%s5123_s26 + $0x168] sm:$0xff] }
 0x18c   : > { %v6254_v45 = vpop.eup %4425  ;;  %v6256_v20 = vadd.f32 1.0, %v4424_v54  ;;  %v3813_v38 = vmul.f32 %v4912_v35, %v3750_v16  ;;  %vm6265_vm2 = vcmp.eq.f32.partialorder %v1559_v12, 8.507059e+37  ;;  %v1562_v48 = vor.u32 1.1754944e-38, %v1561_v18  ;;  %v3452_v10 = vpop.f32.mrf.mxu3 }
 0x18d   : > { %v4428_v3 = vpop.eup %4427  ;;  %4433 = vpow2.f32 %v4149_v39  ;;  %v2510_v23 = vmul.f32 %v6019_v53, %v2509_v15  ;;  %v1554_v52 = vadd.f32 %v6160_v24, %v1553_v36  ;;  %vm2512_vm3 = vweird.f32 %v5961_v49  ;;  %v6329_v36 = vld [vmem:[%s5123_s26 + $0x108] sm:$0xff] }
 0x18e   : > { %4435 = vrcp.f32 %v6256_v20  ;;  %v3876_v34 = vmul.f32 %v4428_v3, %v2505_v59  ;;  %vm2513_vm5 = vweird.f32 %v6019_v53  ;;  %v2516_v15 = vand.u32 2147483647, %v5961_v49  ;;  %v776_v59 = vpop.f32.mrf.mxu2 }
 0x18f   : > { %v2511_v29 = vadd.f32 %v6019_v53, %v2510_v23  ;;  %v2518_v57 = vand.u32 2147483648, %v5961_v49  ;;  %835 = vmatmul.f32.gmra.mxu2 %v6105_v11  ;;  %v1558_v8 = vsel %vm6279_vm4, %v6160_v24, %v1554_v52  ;;  %vm6293_vm6 = vmor %vm2512_vm3, %vm2513_vm5  ;;  %v3625_v51 = vadd.f32 %v3452_v10, %v774_v61  ;;  %v4915_v10 = vld [vmem:[%s5123_s26 + $0x40] sm:$0xff] }
 0x190   : > { %v6288_v33 = vpop.eup %4429  ;;  %v3939_v0 = vadd.f32 %v3876_v34, %v3813_v38  ;;  %v424_v63 = vpop.f32.mrf.mxu0  ;;  %v583_v32 = vadd.f32 %v582_v5, %v5449_v13  ;;  %v1563_v46 = vsel %vm6265_vm2, %v1562_v48, %v1558_v8  ;;  %vm6308_vm7 = vcmp.eq.f32.partialorder %v2516_v15, 8.507059e+37  ;;  %641 = vmatmul.f32.gmra.mxu1 %v6329_v36 }
 0x191   : > { %v4432_v49 = vpop.eup %4431  ;;  %v6301_v7 = vmul.f32 %v6288_v33, %v6240_v47  ;;  %v2515_v24 = vsel %vm6293_vm6, %v6019_v53, %v2511_v29  ;;  %v3356_v16 = vmul.f32 %v6006_v43, %v1563_v46  ;;  %v2519_v2 = vor.u32 1.1754944e-38, %v2518_v57  ;;  %v585_v29 = vpop.f32.mrf.mxu1  ;;  %v248_v57 = vld [vmem:[%s5123_s26 + $0x178] sm:$0xff] }
 0x192   : > { %4002 = vst [vmem:[%s5881_s17 + $0x38] sm:$0xff] %v3939_v0  ;;  %v6313_v41 = vadd.f32 1.0, %v4432_v49  ;;  %4437 = vtanh.f32 %v3625_v51  ;;  %v425_v12 = vadd.f32 %v424_v63, %v5337_v14  ;;  %v4197_v18 = vmul.f32 -1.442695, %v583_v32  ;;  %v247_v51 = vld [vmem:[%s5123_s26 + $0x170] sm:$0xff] }
 0x193   : > { %v4434_v54 = vpop.eup %4433  ;;  %v2554_v39 = vsub.f32 1.0, %v6301_v7  ;;  %v1566_v53 = vmul.f32 %v6203_v55, %v6162_v30  ;;  %471 = vmatmul.f32.gmra.mxu0 %v246_v17  ;;  %3499 = vmatmul.f32.gmra.mxu3 %v3356_v16  ;;  %v2520_v43 = vsel %vm6308_vm7, %v2519_v2, %v2515_v24  ;;  %vm1570_vm8 = vweird.f32 %v6162_v30 }
 0x194   : > { %v6320_v35 = vpop.eup %4435  ;;  %v6322_v38 = vadd.f32 1.0, %v4434_v54  ;;  %4439 = vrcp.f32 %v6313_v41  ;;  %v3751_v61 = vsub.f32 1.0, %v2520_v43  ;;  %v4150_v3 = vmul.f32 -1.442695, %v425_v12  ;;  %v3455_v58 = vpop.f32.mrf.mxu3 }
 0x195   : > { %4441 = vpow2.f32 %v4197_v18  ;;  %v1567_v62 = vsub.f32 1.0, %v1566_v53  ;;  %vm1571_vm9 = vweird.f32 %v6203_v55  ;;  %v1574_v48 = vand.u32 2147483647, %v6162_v30 }
 0x196   : > { %4443 = vrcp.f32 %v6322_v38  ;;  %v1576_v23 = vand.u32 2147483648, %v6162_v30  ;;  %v3814_v5 = vmul.f32 %v4915_v10, %v3751_v61  ;;  %v777_v52 = vadd.f32 %v776_v59, %v5568_v56  ;;  %vm6354_vm12 = vmor %vm1570_vm8, %vm1571_vm9  ;;  %v779_v18 = vpop.f32.mrf.mxu2 }
 0x197   : > { %4445 = vpow2.f32 %v4150_v3  ;;  %v1568_v34 = vmul.f32 %v6203_v55, %v1567_v62  ;;  %838 = vmatmul.f32.gmra.mxu2 %v6165_v21  ;;  %vm6340_vm10 = vcmp.eq.f32.partialorder %v1574_v48, 8.507059e+37  ;;  %v2525_v8 = vmul.f32 %v6117_v26, %v2524_v28  ;;  %v6390_v62 = vld [vmem:[%s5123_s26 + $0x110] sm:$0xff] }
 0x198   : > { %v4438_v15 = vpop.eup %4437  ;;  %v1577_v0 = vor.u32 1.1754944e-38, %v1576_v23  ;;  %vm2527_vm11 = vweird.f32 %v6061_v6  ;;  %v427_v22 = vpop.f32.mrf.mxu0  ;;  %vm2528_vm13 = vweird.f32 %v6117_v26  ;;  %v2531_v1 = vand.u32 2147483647, %v6061_v6  ;;  %644 = vmatmul.f32.gmra.mxu1 %v6390_v62 }
 0x199   : > { %v3877_v63 = vmul.f32 %v4438_v15, %v2520_v43  ;;  %v1569_v32 = vadd.f32 %v6203_v55, %v1568_v34  ;;  %v2526_v49 = vadd.f32 %v6117_v26, %v2525_v8  ;;  %vm6363_vm14 = vmor %vm2527_vm11, %vm2528_vm13  ;;  %v2533_v24 = vand.u32 2147483648, %v6061_v6 }
 0x19a   : > { %v6360_v28 = vpop.eup %4439  ;;  %v3626_v30 = vadd.f32 %v3455_v58, %v777_v52  ;;  %v428_v42 = vadd.f32 %v427_v22, %v5337_v14  ;;  %vm6376_vm15 = vcmp.eq.f32.partialorder %v2531_v1, 8.507059e+37  ;;  %v586_v34 = vadd.f32 %v585_v29, %v5449_v13 }
 0x19b   : > { %v4442_v59 = vpop.eup %4441  ;;  %v6371_v16 = vmul.f32 %v6360_v28, %v6313_v41  ;;  %v3940_v2 = vadd.f32 %v3877_v63, %v3814_v5  ;;  %v1573_v54 = vsel %vm6354_vm12, %v6203_v55, %v1569_v32  ;;  %474 = vmatmul.f32.gmra.mxu0 %v247_v51  ;;  %v2530_v61 = vsel %vm6363_vm14, %v6117_v26, %v2526_v49  ;;  %v588_v32 = vpop.f32.mrf.mxu1 }
 0x19c   : > { %v6380_v6 = vpop.eup %4443  ;;  %v6382_v53 = vadd.f32 1.0, %v4442_v59  ;;  %v1578_v43 = vsel %vm6340_vm10, %v1577_v0, %v1573_v54  ;;  %v2534_v3 = vor.u32 1.1754944e-38, %v2533_v24  ;;  %4447 = vtanh.f32 %v3626_v30  ;;  %v4917_v0 = vld [vmem:[%s5123_s26 + $0x48] sm:$0xff]  ;;  %v3458_v63 = vpop.f32.mrf.mxu3 }
 0x19d   : > { %v4446_v55 = vpop.eup %4445  ;;  %v2569_v48 = vsub.f32 1.0, %v6371_v16  ;;  %4003 = vst [vmem:[%s5881_s17 + $0x40] sm:$0xff] %v3940_v2  ;;  %v3357_v23 = vmul.f32 %v6072_v37, %v1578_v43  ;;  %v4151_v10 = vmul.f32 -1.442695, %v428_v42  ;;  %v1581_v58 = vmul.f32 %v6254_v45, %v6205_v44 }
 0x19e   : > { %v6396_v5 = vadd.f32 1.0, %v4446_v55  ;;  %4449 = vrcp.f32 %v6382_v53  ;;  %v2535_v26 = vsel %vm6376_vm15, %v2534_v3, %v2530_v61  ;;  %vm1585_vm0 = vweird.f32 %v6205_v44 }
 0x19f   : > { %3502 = vmatmul.f32.gmra.mxu3 %v3357_v23  ;;  %v3752_v52 = vsub.f32 1.0, %v2535_v26  ;;  %4451 = vpow2.f32 %v4151_v10  ;;  %841 = vmatmul.f32.gmra.mxu2 %v6215_v27  ;;  %v4198_v37 = vmul.f32 -1.442695, %v586_v34  ;;  %vm1586_vm1 = vweird.f32 %v6254_v45 }
 0x1a0   : > { %4453 = vrcp.f32 %v6396_v5  ;;  %v1589_v15 = vand.u32 2147483647, %v6205_v44  ;;  %v1582_v8 = vsub.f32 1.0, %v1581_v58  ;;  %v1591_v22 = vand.u32 2147483648, %v6205_v44  ;;  %v430_v49 = vpop.f32.mrf.mxu0  ;;  %vm1587_vm7 = vmor %vm1585_vm0, %vm1586_vm1 }
 0x1a1   : > { %v3815_v29 = vmul.f32 %v4917_v0, %v3752_v52  ;;  %v780_v51 = vadd.f32 %v779_v18, %v5568_v56  ;;  %4455 = vpow2.f32 %v4198_v37  ;;  %v2540_v1 = vmul.f32 %v6218_v9, %v2539_v31  ;;  %v6433_v18 = vld [vmem:[%s5123_s26 + $0x118] sm:$0xff] }
 0x1a2   : > { %vm6413_vm2 = vcmp.eq.f32.partialorder %v1589_v15, 8.507059e+37  ;;  %vm2542_vm3 = vweird.f32 %v6154_v25  ;;  %v4448_v46 = vpop.eup %4447  ;;  %v1583_v24 = vmul.f32 %v6254_v45, %v1582_v8  ;;  %v1592_v30 = vor.u32 1.1754944e-38, %v1591_v22  ;;  %647 = vmatmul.f32.gmra.mxu1 %v6433_v18  ;;  %v249_v8 = vld [vmem:[%s5123_s26 + $0x180] sm:$0xff] }
 0x1a3   : > { %vm2543_vm4 = vweird.f32 %v6218_v9  ;;  %v2546_v42 = vand.u32 2147483647, %v6154_v25  ;;  %477 = vmatmul.f32.gmra.mxu0 %v248_v57  ;;  %v3878_v2 = vmul.f32 %v4448_v46, %v2535_v26  ;;  %v2541_v40 = vadd.f32 %v6218_v9, %v2540_v1 }
 0x1a4   : > { %v6424_v59 = vpop.eup %4449  ;;  %vm6427_vm5 = vmor %vm2542_vm3, %vm2543_vm4  ;;  %v2548_v31 = vand.u32 2147483648, %v6154_v25  ;;  %v3627_v12 = vadd.f32 %v3458_v63, %v780_v51  ;;  %v1584_v3 = vadd.f32 %v6254_v45, %v1583_v24  ;;  %v431_v23 = vadd.f32 %v430_v49, %v5337_v14  ;;  %v782_v25 = vpop.f32.mrf.mxu2 }
 0x1a5   : > { %v4452_v43 = vpop.eup %4451  ;;  %v6438_v61 = vmul.f32 %v6424_v59, %v6382_v53  ;;  %vm6441_vm6 = vcmp.eq.f32.partialorder %v2546_v42, 8.507059e+37  ;;  %v3941_v26 = vadd.f32 %v3878_v2, %v3815_v29  ;;  %v2545_v52 = vsel %vm6427_vm5, %v6218_v9, %v2541_v40  ;;  %v591_v49 = vpop.f32.mrf.mxu1  ;;  %v6484_v40 = vld [vmem:[%s5123_s26 + $0x120] sm:$0xff] }
 0x1a6   : > { %v6446_v10 = vpop.eup %4453  ;;  %v6448_v34 = vadd.f32 1.0, %v4452_v43  ;;  %v2549_v58 = vor.u32 1.1754944e-38, %v2548_v31  ;;  %v1588_v15 = vsel %vm1587_vm7, %v6254_v45, %v1584_v3  ;;  %4457 = vtanh.f32 %v3627_v12  ;;  %v3461_v42 = vpop.f32.mrf.mxu3 }
 0x1a7   : > { %v2584_v37 = vsub.f32 1.0, %v6438_v61  ;;  %v4152_v57 = vmul.f32 -1.442695, %v431_v23  ;;  %844 = vmatmul.f32.gmra.mxu2 %v6262_v60  ;;  %v4456_v0 = vpop.eup %4455  ;;  %4004 = vst [vmem:[%s5881_s17 + $0x48] sm:$0xff] %v3941_v26  ;;  %v1593_v44 = vsel %vm6413_vm2, %v1592_v30, %v1588_v15  ;;  %v589_v29 = vadd.f32 %v588_v32, %v5449_v13  ;;  %v4919_v32 = vld [vmem:[%s5123_s26 + $0x50] sm:$0xff] }
 0x1a8   : > { %4459 = vrcp.f32 %v6448_v34  ;;  %v2550_v9 = vsel %vm6441_vm6, %v2549_v58, %v2545_v52  ;;  %v6468_v22 = vadd.f32 1.0, %v4456_v0  ;;  %v3358_v45 = vmul.f32 %v6125_v50, %v1593_v44  ;;  %v433_v2 = vpop.f32.mrf.mxu0 }
 0x1a9   : > { %v3753_v51 = vsub.f32 1.0, %v2550_v9  ;;  %4461 = vpow2.f32 %v4152_v57  ;;  %v4199_v60 = vmul.f32 -1.442695, %v589_v29  ;;  %v1596_v63 = vmul.f32 %v6320_v35, %v6256_v20 }
 0x1aa   : > { %vm1600_vm8 = vweird.f32 %v6256_v20  ;;  %vm1601_vm9 = vweird.f32 %v6320_v35  ;;  %4463 = vrcp.f32 %v6468_v22  ;;  %3505 = vmatmul.f32.gmra.mxu3 %v3358_v45  ;;  %v1604_v1 = vand.u32 2147483647, %v6256_v20  ;;  %650 = vmatmul.f32.gmra.mxu1 %v6484_v40 }
 0x1ab   : > { %v3816_v17 = vmul.f32 %v4919_v32, %v3753_v51  ;;  %v1606_v50 = vand.u32 2147483648, %v6256_v20  ;;  %480 = vmatmul.f32.gmra.mxu0 %v249_v8  ;;  %4465 = vpow2.f32 %v4199_v60  ;;  %v1597_v46 = vsub.f32 1.0, %v1596_v63  ;;  %vm1602_vm14 = vmor %vm1600_vm8, %vm1601_vm9 }
 0x1ac   : > { %v783_v24 = vadd.f32 %v782_v25, %v5568_v56  ;;  %v2555_v30 = vmul.f32 %v6288_v33, %v2554_v39  ;;  %v4458_v54 = vpop.eup %4457  ;;  %vm6487_vm10 = vcmp.eq.f32.partialorder %v1604_v1, 8.507059e+37  ;;  %vm2557_vm11 = vweird.f32 %v6240_v47  ;;  %v785_v57 = vpop.f32.mrf.mxu2 }
 0x1ad   : > { %v1607_v12 = vor.u32 1.1754944e-38, %v1606_v50  ;;  %vm2558_vm12 = vweird.f32 %v6288_v33  ;;  %v3879_v7 = vmul.f32 %v4458_v54, %v2550_v9  ;;  %v1598_v39 = vmul.f32 %v6320_v35, %v1597_v46  ;;  %v6533_v46 = vld [vmem:[%s5123_s26 + $0x128] sm:$0xff] }
 0x1ae   : > { %v6493_v43 = vpop.eup %4459  ;;  %v2556_v3 = vadd.f32 %v6288_v33, %v2555_v30  ;;  %vm6497_vm13 = vmor %vm2557_vm11, %vm2558_vm12  ;;  %v2561_v23 = vand.u32 2147483647, %v6240_v47  ;;  %v2563_v26 = vand.u32 2147483648, %v6240_v47  ;;  %v3628_v52 = vadd.f32 %v3461_v42, %v783_v24  ;;  %v4922_v24 = vld [vmem:[%s5123_s26 + $0x58] sm:$0xff]  ;;  %v3464_v54 = vpop.f32.mrf.mxu3 }
 0x1af   : > { %v4462_v25 = vpop.eup %4461  ;;  %v434_v58 = vadd.f32 %v433_v2, %v5337_v14  ;;  %v592_v15 = vadd.f32 %v591_v49, %v5449_v13  ;;  %847 = vmatmul.f32.gmra.mxu2 %v6329_v36  ;;  %v3942_v0 = vadd.f32 %v3879_v7, %v3816_v17  ;;  %v1599_v9 = vadd.f32 %v6320_v35, %v1598_v39  ;;  %v250_v17 = vld [vmem:[%s5123_s26 + $0x188] sm:$0xff] }
 0x1b0   : > { %v6506_v44 = vadd.f32 1.0, %v4462_v25  ;;  %v2560_v29 = vsel %vm6497_vm13, %v6288_v33, %v2556_v3  ;;  %v6512_v8 = vpop.eup %4463  ;;  %vm2562_vm15 = vcmp.eq.f32.partialorder %v2561_v23, 8.507059e+37  ;;  %v2564_v47 = vor.u32 1.1754944e-38, %v2563_v26  ;;  %v436_v39 = vpop.f32.mrf.mxu0 }
 0x1b1   : > { %4467 = vtanh.f32 %v3628_v52  ;;  %v4153_v36 = vmul.f32 -1.442695, %v434_v58  ;;  %v4466_v45 = vpop.eup %4465  ;;  %v6520_v51 = vmul.f32 %v6512_v8, %v6468_v22  ;;  %4005 = vst [vmem:[%s5881_s17 + $0x50] sm:$0xff] %v3942_v0  ;;  %v1603_v33 = vsel %vm1602_vm14, %v6320_v35, %v1599_v9  ;;  %v594_v3 = vpop.f32.mrf.mxu1 }
 0x1b2   : > { %4469 = vrcp.f32 %v6506_v44  ;;  %v4200_v60 = vmul.f32 -1.442695, %v592_v15  ;;  %v6525_v63 = vadd.f32 1.0, %v4466_v45  ;;  %v1608_v20 = vsel %vm6487_vm10, %v1607_v12, %v1603_v33  ;;  %653 = vmatmul.f32.gmra.mxu1 %v6533_v46 }
 0x1b3   : > { %v2565_v32 = vsel %vm2562_vm15, %v2564_v47, %v2560_v29  ;;  %4471 = vpow2.f32 %v4153_v36  ;;  %v2599_v1 = vsub.f32 1.0, %v6520_v51  ;;  %v3359_v50 = vmul.f32 %v5984_v19, %v1608_v20  ;;  %483 = vmatmul.f32.gmra.mxu0 %v250_v17 }
 0x1b4   : > { %v3754_v49 = vsub.f32 1.0, %v2565_v32  ;;  %4473 = vpow2.f32 %v4200_v60  ;;  %v1611_v35 = vmul.f32 %v6380_v6, %v6322_v38  ;;  %vm1615_vm0 = vweird.f32 %v6322_v38  ;;  %v788_v0 = vpop.f32.mrf.mxu2 }
 0x1b5   : > { %4475 = vrcp.f32 %v6525_v63  ;;  %vm1616_vm1 = vweird.f32 %v6380_v6  ;;  %3508 = vmatmul.f32.gmra.mxu3 %v3359_v50  ;;  %v1619_v19 = vand.u32 2147483647, %v6322_v38  ;;  %v1621_v42 = vand.u32 2147483648, %v6322_v38 }
 0x1b6   : > { %v3817_v30 = vmul.f32 %v4922_v24, %v3754_v49  ;;  %v786_v2 = vadd.f32 %v785_v57, %v5568_v56  ;;  %v1612_v12 = vsub.f32 1.0, %v1611_v35  ;;  %v2570_v7 = vmul.f32 %v6360_v28, %v2569_v48  ;;  %vm1617_vm7 = vmor %vm1615_vm0, %vm1616_vm1  ;;  %v6592_v35 = vld [vmem:[%s5123_s26 + $0x130] sm:$0xff] }
 0x1b7   : > { %v4468_v31 = vpop.eup %4467  ;;  %vm2572_vm2 = vweird.f32 %v6313_v41  ;;  %vm2573_vm3 = vweird.f32 %v6360_v28  ;;  %850 = vmatmul.f32.gmra.mxu2 %v6390_v62  ;;  %vm6553_vm4 = vcmp.eq.f32.partialorder %v1619_v19, 8.507059e+37  ;;  %v1622_v26 = vor.u32 1.1754944e-38, %v1621_v42 }
 0x1b8   : > { %v6551_v55 = vpop.eup %4469  ;;  %v3880_v23 = vmul.f32 %v4468_v31, %v2565_v32  ;;  %vm6557_vm5 = vmor %vm2572_vm2, %vm2573_vm3  ;;  %v2576_v48 = vand.u32 2147483647, %v6313_v41  ;;  %v1613_v58 = vmul.f32 %v6380_v6, %v1612_v12  ;;  %v2571_v62 = vadd.f32 %v6360_v28, %v2570_v7 }
 0x1b9   : > { %v4472_v52 = vpop.eup %4471  ;;  %v2578_v15 = vand.u32 2147483648, %v6313_v41  ;;  %v3629_v57 = vadd.f32 %v3464_v54, %v786_v2  ;;  %v437_v45 = vadd.f32 %v436_v39, %v5337_v14  ;;  %v595_v49 = vadd.f32 %v594_v3, %v5449_v13  ;;  %v251_v2 = vld [vmem:[%s5123_s26 + $0x190] sm:$0xff]  ;;  %v3467_v3 = vpop.f32.mrf.mxu3 }
 0x1ba   : > { %v4474_v9 = vpop.eup %4473  ;;  %v3943_v29 = vadd.f32 %v3880_v23, %v3817_v30  ;;  %v6565_v47 = vadd.f32 1.0, %v4472_v52  ;;  %vm6567_vm6 = vcmp.eq.f32.partialorder %v2576_v48, 8.507059e+37  ;;  %v1614_v20 = vadd.f32 %v6380_v6, %v1613_v58  ;;  %656 = vmatmul.f32.gmra.mxu1 %v6592_v35  ;;  %v597_v16 = vpop.f32.mrf.mxu1 }
 0x1bb   : > { %v6572_v33 = vpop.eup %4475  ;;  %v6574_v60 = vadd.f32 1.0, %v4474_v9  ;;  %v2575_v41 = vsel %vm6557_vm5, %v6360_v28, %v2571_v62  ;;  %v2579_v32 = vor.u32 1.1754944e-38, %v2578_v15  ;;  %v4154_v50 = vmul.f32 -1.442695, %v437_v45  ;;  %486 = vmatmul.f32.gmra.mxu0 %v251_v2 }
 0x1bc   : > { %v6582_v17 = vmul.f32 %v6572_v33, %v6525_v63  ;;  %4006 = vst [vmem:[%s5881_s17 + $0x58] sm:$0xff] %v3943_v29  ;;  %4477 = vrcp.f32 %v6565_v47  ;;  %v1618_v28 = vsel %vm1617_vm7, %v6380_v6, %v1614_v20  ;;  %v1626_v30 = vmul.f32 %v6446_v10, %v6396_v5  ;;  %v4924_v6 = vld [vmem:[%s5123_s26 + $0x60] sm:$0xff]  ;;  %v791_v9 = vpop.f32.mrf.mxu2 }
 0x1bd   : > { %4479 = vrcp.f32 %v6574_v60  ;;  %v2580_v24 = vsel %vm6567_vm6, %v2579_v32, %v2575_v41  ;;  %v1623_v19 = vsel %vm6553_vm4, %v1622_v26, %v1618_v28  ;;  %v4201_v31 = vmul.f32 -1.442695, %v595_v49  ;;  %v439_v26 = vpop.f32.mrf.mxu0  ;;  %v6645_v41 = vld [vmem:[%s5123_s26 + $0x138] sm:$0xff] }
 0x1be   : > { %v2614_v38 = vsub.f32 1.0, %v6582_v17  ;;  %4481 = vtanh.f32 %v3629_v57  ;;  %v3755_v42 = vsub.f32 1.0, %v2580_v24  ;;  %v3360_v54 = vmul.f32 %v6050_v4, %v1623_v19  ;;  %v6683_v57 = vld [vmem:[%s5123_s26 + $0x140] sm:$0xff] }
 0x1bf   : > { %4483 = vpow2.f32 %v4154_v50  ;;  %v1627_v12 = vsub.f32 1.0, %v1626_v30  ;;  %853 = vmatmul.f32.gmra.mxu2 %v6433_v18  ;;  %vm1630_vm8 = vweird.f32 %v6396_v5  ;;  %vm1631_vm9 = vweird.f32 %v6446_v10 }
 0x1c0   : > { %v3818_v7 = vmul.f32 %v4924_v6, %v3755_v42  ;;  %v1634_v39 = vand.u32 2147483647, %v6396_v5  ;;  %3511 = vmatmul.f32.gmra.mxu3 %v3360_v54  ;;  %4485 = vpow2.f32 %v4201_v31  ;;  %v1636_v4 = vand.u32 2147483648, %v6396_v5  ;;  %vm1632_vm14 = vmor %vm1630_vm8, %vm1631_vm9 }
 0x1c1   : > { %v1628_v23 = vmul.f32 %v6446_v10, %v1627_v12  ;;  %v789_v25 = vadd.f32 %v788_v0, %v5568_v56  ;;  %v2585_v52 = vmul.f32 %v6424_v59, %v2584_v37  ;;  %vm2587_vm11 = vweird.f32 %v6382_v53 }
 0x1c2   : > { %v6614_v18 = vpop.eup %4477  ;;  %vm6616_vm10 = vcmp.eq.f32.partialorder %v1634_v39, 8.507059e+37  ;;  %vm2588_vm12 = vweird.f32 %v6424_v59  ;;  %v1637_v15 = vor.u32 1.1754944e-38, %v1636_v4  ;;  %v2591_v0 = vand.u32 2147483647, %v6382_v53  ;;  %659 = vmatmul.f32.gmra.mxu1 %v6645_v41 }
 0x1c3   : > { %v6625_v58 = vpop.eup %4479  ;;  %v1629_v62 = vadd.f32 %v6446_v10, %v1628_v23  ;;  %vm6628_vm13 = vmor %vm2587_vm11, %vm2588_vm12  ;;  %v2593_v61 = vand.u32 2147483648, %v6382_v53  ;;  %v2586_v36 = vadd.f32 %v6424_v59, %v2585_v52  ;;  %v3630_v45 = vadd.f32 %v3467_v3, %v789_v25 }
 0x1c4   : > { %v4482_v37 = vpop.eup %4481  ;;  %v6636_v29 = vmul.f32 %v6625_v58, %v6574_v60  ;;  %v440_v20 = vadd.f32 %v439_v26, %v5337_v14  ;;  %vm2592_vm15 = vcmp.eq.f32.partialorder %v2591_v0, 8.507059e+37  ;;  %vm1645_vm0 = vweird.f32 %v6448_v34  ;;  %v3470_v26 = vpop.f32.mrf.mxu3 }
 0x1c5   : > { %v4484_v53 = vpop.eup %4483  ;;  %v3881_v32 = vmul.f32 %v4482_v37, %v2580_v24  ;;  %v1633_v50 = vsel %vm1632_vm14, %v6446_v10, %v1629_v62  ;;  %v2594_v49 = vor.u32 1.1754944e-38, %v2593_v61  ;;  %v2590_v19 = vsel %vm6628_vm13, %v6424_v59, %v2586_v36  ;;  %v252_v10 = vld [vmem:[%s5123_s26 + $0x198] sm:$0xff]  ;;  %v794_v37 = vpop.f32.mrf.mxu2 }
 0x1c6   : > { %v2629_v28 = vsub.f32 1.0, %v6636_v29  ;;  %v6650_v5 = vadd.f32 1.0, %v4484_v53  ;;  %v1638_v30 = vsel %vm6616_vm10, %v1637_v15, %v1633_v50  ;;  %v4486_v42 = vpop.eup %4485  ;;  %4487 = vtanh.f32 %v3630_v45  ;;  %489 = vmatmul.f32.gmra.mxu0 %v252_v10  ;;  %v442_v15 = vpop.f32.mrf.mxu0 }
 0x1c7   : > { %v3944_v2 = vadd.f32 %v3881_v32, %v3818_v7  ;;  %v3361_v24 = vmul.f32 %v6105_v11, %v1638_v30  ;;  %v2595_v54 = vsel %vm2592_vm15, %v2594_v49, %v2590_v19  ;;  %856 = vmatmul.f32.gmra.mxu2 %v6484_v40  ;;  %v6661_v31 = vadd.f32 1.0, %v4486_v42  ;;  %v4926_v40 = vld [vmem:[%s5123_s26 + $0x68] sm:$0xff] }
 0x1c8   : > { %4489 = vrcp.f32 %v6650_v5  ;;  %v3756_v12 = vsub.f32 1.0, %v2595_v54  ;;  %v4155_v6 = vmul.f32 -1.442695, %v440_v20  ;;  %v598_v59 = vadd.f32 %v597_v16, %v5449_v13  ;;  %v600_v16 = vpop.f32.mrf.mxu1 }
 0x1c9   : > { %4007 = vst [vmem:[%s5881_s17 + $0x60] sm:$0xff] %v3944_v2  ;;  %3514 = vmatmul.f32.gmra.mxu3 %v3361_v24  ;;  %v1641_v11 = vmul.f32 %v6493_v43, %v6448_v34  ;;  %vm1646_vm1 = vweird.f32 %v6493_v43  ;;  %4491 = vrcp.f32 %v6661_v31  ;;  %v1649_v39 = vand.u32 2147483647, %v6448_v34 }
 0x1ca   : > { %v3819_v7 = vmul.f32 %v4926_v40, %v3756_v12  ;;  %v1651_v3 = vand.u32 2147483648, %v6448_v34  ;;  %4493 = vpow2.f32 %v4155_v6  ;;  %v4202_v23 = vmul.f32 -1.442695, %v598_v59  ;;  %662 = vmatmul.f32.gmra.mxu1 %v6683_v57  ;;  %vm1647_vm7 = vmor %vm1645_vm0, %vm1646_vm1 }
 0x1cb   : > { %v1642_v4 = vsub.f32 1.0, %v1641_v11  ;;  %v792_v25 = vadd.f32 %v791_v9, %v5568_v56  ;;  %vm6674_vm2 = vcmp.eq.f32.partialorder %v1649_v39, 8.507059e+37  ;;  %v2600_v62 = vmul.f32 %v6512_v8, %v2599_v1  ;;  %v253_v39 = vld [vmem:[%s5123_s26 + $0x1a0] sm:$0xff] }
 0x1cc   : > { %v1652_v52 = vor.u32 1.1754944e-38, %v1651_v3  ;;  %vm2602_vm3 = vweird.f32 %v6468_v22  ;;  %v4488_v0 = vpop.eup %4487  ;;  %4495 = vpow2.f32 %v4202_v23  ;;  %vm2603_vm4 = vweird.f32 %v6512_v8 }
 0x1cd   : > { %v1643_v61 = vmul.f32 %v6493_v43, %v1642_v4  ;;  %v2606_v9 = vand.u32 2147483647, %v6468_v22  ;;  %v3882_v51 = vmul.f32 %v4488_v0, %v2595_v54  ;;  %v2601_v1 = vadd.f32 %v6512_v8, %v2600_v62  ;;  %vm6692_vm5 = vmor %vm2602_vm3, %vm2603_vm4  ;;  %v6736_v4 = vld [vmem:[%s5123_s26 + $0x148] sm:$0xff]  ;;  %v3473_v0 = vpop.f32.mrf.mxu3  ;;  %v797_v45 = vpop.f32.mrf.mxu2 }
 0x1ce   : > { %v6689_v36 = vpop.eup %4489  ;;  %v2608_v20 = vand.u32 2147483648, %v6468_v22  ;;  %v3631_v53 = vadd.f32 %v3470_v26, %v792_v25  ;;  %v443_v49 = vadd.f32 %v442_v15, %v5337_v14  ;;  %v601_v30 = vadd.f32 %v600_v16, %v5449_v13  ;;  %492 = vmatmul.f32.gmra.mxu0 %v253_v39  ;;  %v4929_v25 = vld [vmem:[%s5123_s26 + $0x70] sm:$0xff] }
 0x1cf   : > { %v1644_v32 = vadd.f32 %v6493_v43, %v1643_v61  ;;  %vm6698_vm6 = vcmp.eq.f32.partialorder %v2606_v9, 8.507059e+37  ;;  %859 = vmatmul.f32.gmra.mxu2 %v6533_v46  ;;  %v6705_v19 = vpop.eup %4491  ;;  %v3945_v42 = vadd.f32 %v3882_v51, %v3819_v7  ;;  %v2605_v22 = vsel %vm6692_vm5, %v6512_v8, %v2601_v1  ;;  %v445_v1 = vpop.f32.mrf.mxu0 }
 0x1d0   : > { %v2609_v2 = vor.u32 1.1754944e-38, %v2608_v20  ;;  %4497 = vtanh.f32 %v3631_v53  ;;  %v4494_v24 = vpop.eup %4493  ;;  %v6716_v54 = vmul.f32 %v6705_v19, %v6661_v31  ;;  %v4156_v10 = vmul.f32 -1.442695, %v443_v49  ;;  %v603_v16 = vpop.f32.mrf.mxu1 }
 0x1d1   : > { %v1648_v46 = vsel %vm1647_vm7, %v6493_v43, %v1644_v32  ;;  %v4203_v12 = vmul.f32 -1.442695, %v601_v30  ;;  %4008 = vst [vmem:[%s5881_s17 + $0x68] sm:$0xff] %v3945_v42  ;;  %v6720_v34 = vadd.f32 1.0, %v4494_v24  ;;  %v1656_v59 = vmul.f32 %v6551_v55, %v6506_v44 }
 0x1d2   : > { %v1653_v6 = vsel %vm6674_vm2, %v1652_v52, %v1648_v46  ;;  %v2610_v8 = vsel %vm6698_vm6, %v2609_v2, %v2605_v22  ;;  %v4496_v11 = vpop.eup %4495  ;;  %v2644_v40 = vsub.f32 1.0, %v6716_v54  ;;  %4499 = vpow2.f32 %v4156_v10  ;;  %665 = vmatmul.f32.gmra.mxu1 %v6736_v4 }
 0x1d3   : > { %v3362_v43 = vmul.f32 %v6165_v21, %v1653_v6  ;;  %v3757_v7 = vsub.f32 1.0, %v2610_v8  ;;  %4501 = vrcp.f32 %v6720_v34  ;;  %v6732_v3 = vadd.f32 1.0, %v4496_v11  ;;  %v6797_v11 = vld [vmem:[%s5123_s26 + $0x150] sm:$0xff] }
 0x1d4   : > { %v1657_v23 = vsub.f32 1.0, %v1656_v59  ;;  %vm1660_vm8 = vweird.f32 %v6506_v44  ;;  %4503 = vpow2.f32 %v4203_v12  ;;  %vm1661_vm9 = vweird.f32 %v6551_v55 }
 0x1d5   : > { %3517 = vmatmul.f32.gmra.mxu3 %v3362_v43  ;;  %v3820_v26 = vmul.f32 %v4929_v25, %v3757_v7  ;;  %v1664_v21 = vand.u32 2147483647, %v6506_v44  ;;  %4505 = vrcp.f32 %v6732_v3  ;;  %v1666_v62 = vand.u32 2147483648, %v6506_v44  ;;  %vm6760_vm12 = vmor %vm1660_vm8, %vm1661_vm9 }
 0x1d6   : > { %v4498_v48 = vpop.eup %4497  ;;  %v1658_v52 = vmul.f32 %v6551_v55, %v1657_v23  ;;  %v795_v15 = vadd.f32 %v794_v37, %v5568_v56  ;;  %v2615_v51 = vmul.f32 %v6572_v33, %v2614_v38  ;;  %vm2617_vm11 = vweird.f32 %v6525_v63  ;;  %v6810_v23 = vld [vmem:[%s5123_s26 + $0x1a8] sm:$0xff] }
 0x1d7   : > { %v3883_v61 = vmul.f32 %v4498_v48, %v2610_v8  ;;  %vm6746_vm10 = vcmp.eq.f32.partialorder %v1664_v21, 8.507059e+37  ;;  %862 = vmatmul.f32.gmra.mxu2 %v6592_v35  ;;  %v1667_v17 = vor.u32 1.1754944e-38, %v1666_v62  ;;  %vm2618_vm13 = vweird.f32 %v6572_v33  ;;  %495 = vmatmul.f32.gmra.mxu0 %v6810_v23  ;;  %v4931_v48 = vld [vmem:[%s5123_s26 + $0x78] sm:$0xff] }
 0x1d8   : > { %v1659_v20 = vadd.f32 %v6551_v55, %v1658_v52  ;;  %v2621_v38 = vand.u32 2147483647, %v6525_v63  ;;  %v4500_v53 = vpop.eup %4499  ;;  %v2616_v35 = vadd.f32 %v6572_v33, %v2615_v51  ;;  %vm6767_vm14 = vmor %vm2617_vm11, %vm2618_vm13  ;;  %v2623_v44 = vand.u32 2147483648, %v6525_v63 }
 0x1d9   : > { %v3946_v32 = vadd.f32 %v3883_v61, %v3820_v26  ;;  %v3632_v49 = vadd.f32 %v3473_v0, %v795_v15  ;;  %v6772_v30 = vpop.eup %4501  ;;  %v6774_v42 = vadd.f32 1.0, %v4500_v53  ;;  %v446_v24 = vadd.f32 %v445_v1, %v5337_v14  ;;  %v3476_v61 = vpop.f32.mrf.mxu3 }
 0x1da   : > { %v1663_v22 = vsel %vm6760_vm12, %v6551_v55, %v1659_v20  ;;  %vm6779_vm15 = vcmp.eq.f32.partialorder %v2621_v38, 8.507059e+37  ;;  %v4504_v46 = vpop.eup %4503  ;;  %v2620_v10 = vsel %vm6767_vm14, %v6572_v33, %v2616_v35  ;;  %v2624_v12 = vor.u32 1.1754944e-38, %v2623_v44  ;;  %668 = vmatmul.f32.gmra.mxu1 %v6797_v11  ;;  %v800_v20 = vpop.f32.mrf.mxu2 }
 0x1db   : > { %4009 = vst [vmem:[%s5881_s17 + $0x70] sm:$0xff] %v3946_v32  ;;  %v1668_v63 = vsel %vm6746_vm10, %v1667_v17, %v1663_v22  ;;  %4507 = vtanh.f32 %v3632_v49  ;;  %v6790_v6 = vpop.eup %4505  ;;  %v6793_v55 = vadd.f32 1.0, %v4504_v46  ;;  %v4157_v59 = vmul.f32 -1.442695, %v446_v24  ;;  %v6851_v24 = vld [vmem:[%s5123_s26 + $0x158] sm:$0xff] }
 0x1dc   : > { %4509 = vrcp.f32 %v6774_v42  ;;  %v3363_v8 = vmul.f32 %v6215_v27, %v1668_v63  ;;  %v6802_v43 = vmul.f32 %v6790_v6, %v6732_v3  ;;  %v2625_v33 = vsel %vm6779_vm15, %v2624_v12, %v2620_v10 }
 0x1dd   : > { %v604_v7 = vadd.f32 %v603_v16, %v5449_v13  ;;  %v1671_v39 = vmul.f32 %v6614_v18, %v6565_v47  ;;  %4511 = vrcp.f32 %v6793_v55  ;;  %v3758_v27 = vsub.f32 1.0, %v2625_v33  ;;  %v606_v16 = vpop.f32.mrf.mxu1 }
 0x1de   : > { %3520 = vmatmul.f32.gmra.mxu3 %v3363_v8  ;;  %vm1675_vm0 = vweird.f32 %v6565_v47  ;;  %vm1676_vm1 = vweird.f32 %v6614_v18  ;;  %v2659_v25 = vsub.f32 1.0, %v6802_v43  ;;  %4513 = vpow2.f32 %v4157_v59 }
 0x1df   : > { %v4204_v26 = vmul.f32 -1.442695, %v604_v7  ;;  %v1672_v21 = vsub.f32 1.0, %v1671_v39  ;;  %865 = vmatmul.f32.gmra.mxu2 %v6645_v41  ;;  %v3821_v52 = vmul.f32 %v4931_v48, %v3758_v27  ;;  %v1679_v62 = vand.u32 2147483647, %v6565_v47  ;;  %v448_v41 = vpop.f32.mrf.mxu0  ;;  %vm1677_vm6 = vmor %vm1675_vm0, %vm1676_vm1 }
 0x1e0   : > { %v1681_v15 = vand.u32 2147483648, %v6565_v47  ;;  %v798_v0 = vadd.f32 %v797_v45, %v5568_v56  ;;  %v2630_v1 = vmul.f32 %v6625_v58, %v2629_v28  ;;  %vm2632_vm2 = vweird.f32 %v6574_v60 }
 0x1e1   : > { %v4508_v9 = vpop.eup %4507  ;;  %4515 = vpow2.f32 %v4204_v26  ;;  %v1673_v51 = vmul.f32 %v6614_v18, %v1672_v21  ;;  %vm6829_vm3 = vcmp.eq.f32.partialorder %v1679_v62, 8.507059e+37  ;;  %vm2633_vm4 = vweird.f32 %v6625_v58 }
 0x1e2   : > { %v6827_v37 = vpop.eup %4509  ;;  %v3884_v17 = vmul.f32 %v4508_v9, %v2625_v33  ;;  %v1682_v45 = vor.u32 1.1754944e-38, %v1681_v15  ;;  %v2631_v29 = vadd.f32 %v6625_v58, %v2630_v1  ;;  %vm6836_vm5 = vmor %vm2632_vm2, %vm2633_vm4  ;;  %v2636_v32 = vand.u32 2147483647, %v6574_v60  ;;  %671 = vmatmul.f32.gmra.mxu1 %v6851_v24  ;;  %v4934_v9 = vld [vmem:[%s5123_s26 + $0x80] sm:$0xff]  ;;  %v6895_v38 = vpop.f32.mrf.mxu2 }
 0x1e3   : > { %v1674_v53 = vadd.f32 %v6614_v18, %v1673_v51  ;;  %v2638_v35 = vand.u32 2147483648, %v6574_v60  ;;  %v6842_v50 = vpop.eup %4511  ;;  %v3633_v49 = vadd.f32 %v3476_v61, %v798_v0  ;;  %v449_v22 = vadd.f32 %v448_v41, %v5337_v14  ;;  %v3479_v61 = vpop.f32.mrf.mxu3 }
 0x1e4   : > { %v3947_v44 = vadd.f32 %v3884_v17, %v3821_v52  ;;  %v607_v2 = vadd.f32 %v606_v16, %v5449_v13  ;;  %v4514_v46 = vpop.eup %4513  ;;  %v6856_v60 = vmul.f32 %v6842_v50, %v6793_v55  ;;  %v2635_v47 = vsel %vm6836_vm5, %v6625_v58, %v2631_v29  ;;  %v6874_v58 = vld [vmem:[%s5123_s26 + $0x1b0] sm:$0xff] }
 0x1e5   : > { %v1678_v63 = vsel %vm1677_vm6, %v6614_v18, %v1674_v53  ;;  %vm6862_vm7 = vcmp.eq.f32.partialorder %v2636_v32, 8.507059e+37  ;;  %v6867_v12 = vadd.f32 1.0, %v4514_v46  ;;  %v2639_v59 = vor.u32 1.1754944e-38, %v2638_v35  ;;  %v4933_v18 = vld [vmem:[%s5123_s26 + $0x100] sm:$0xff]  ;;  %498 = vmatmul.f32.gmra.mxu0 %v6874_v58 }
 0x1e6   : > { %4010 = vst [vmem:[%s5881_s17 + $0x78] sm:$0xff] %v3947_v44  ;;  %v1683_v8 = vsel %vm6829_vm3, %v1682_v45, %v1678_v63  ;;  %4517 = vtanh.f32 %v3633_v49  ;;  %v2674_v7 = vsub.f32 1.0, %v6856_v60  ;;  %v4158_v27 = vmul.f32 -1.442695, %v449_v22  ;;  %v6904_v32 = vld [vmem:[%s5123_s26 + $0x160] sm:$0xff] }
 0x1e7   : > { %v4516_v33 = vpop.eup %4515  ;;  %v3364_v39 = vmul.f32 %v4933_v18, %v1683_v8  ;;  %v4205_v26 = vmul.f32 -1.442695, %v607_v2  ;;  %868 = vmatmul.f32.gmra.mxu2 %v6683_v57  ;;  %4519 = vrcp.f32 %v6867_v12  ;;  %v2640_v16 = vsel %vm6862_vm7, %v2639_v59, %v2635_v47  ;;  %v609_v57 = vpop.f32.mrf.mxu1 }
 0x1e8   : > { %v6878_v21 = vadd.f32 1.0, %v4516_v33  ;;  %v1686_v48 = vmul.f32 %v6689_v36, %v6650_v5  ;;  %v3759_v52 = vsub.f32 1.0, %v2640_v16  ;;  %4521 = vpow2.f32 %v4158_v27  ;;  %v451_v17 = vpop.f32.mrf.mxu0 }
 0x1e9   : > { %3523 = vmatmul.f32.gmra.mxu3 %v3364_v39  ;;  %vm1690_vm8 = vweird.f32 %v6650_v5  ;;  %vm1691_vm9 = vweird.f32 %v6689_v36  ;;  %v1694_v15 = vand.u32 2147483647, %v6650_v5  ;;  %v1696_v0 = vand.u32 2147483648, %v6650_v5 }
 0x1ea   : > { %4523 = vrcp.f32 %v6878_v21  ;;  %v1687_v62 = vsub.f32 1.0, %v1686_v48  ;;  %v3822_v51 = vmul.f32 %v4934_v9, %v3759_v52  ;;  %v801_v1 = vadd.f32 %v800_v20, %v5568_v56  ;;  %674 = vmatmul.f32.gmra.mxu1 %v6904_v32  ;;  %vm1692_vm14 = vmor %vm1690_vm8, %vm1691_vm9  ;;  %v4936_v48 = vld [vmem:[%s5123_s26 + $0x108] sm:$0xff]  ;;  %v6967_v29 = vpop.f32.mrf.mxu2 }
 0x1eb   : > { %4525 = vpow2.f32 %v4205_v26  ;;  %v2645_v41 = vmul.f32 %v6705_v19, %v2644_v40  ;;  %vm6898_vm10 = vcmp.eq.f32.partialorder %v1694_v15, 8.507059e+37  ;;  %v1697_v28 = vor.u32 1.1754944e-38, %v1696_v0 }
 0x1ec   : > { %v4518_v45 = vpop.eup %4517  ;;  %v1688_v53 = vmul.f32 %v6689_v36, %v1687_v62  ;;  %vm2647_vm11 = vweird.f32 %v6661_v31  ;;  %vm2648_vm12 = vweird.f32 %v6705_v19  ;;  %v2651_v20 = vand.u32 2147483647, %v6661_v31 }
 0x1ed   : > { %v3885_v54 = vmul.f32 %v4518_v45, %v2640_v16  ;;  %v2646_v40 = vadd.f32 %v6705_v19, %v2645_v41  ;;  %v6910_v35 = vpop.eup %4519  ;;  %vm6913_vm13 = vmor %vm2647_vm11, %vm2648_vm12  ;;  %v2653_v22 = vand.u32 2147483648, %v6661_v31  ;;  %v3634_v2 = vadd.f32 %v3479_v61, %v801_v1  ;;  %v4938_v1 = vld [vmem:[%s5123_s26 + $0x88] sm:$0xff] }
 0x1ee   : > { %v1689_v44 = vadd.f32 %v6689_v36, %v1688_v53  ;;  %v452_v46 = vadd.f32 %v451_v17, %v5337_v14  ;;  %v4522_v63 = vpop.eup %4521  ;;  %vm6926_vm15 = vcmp.eq.f32.partialorder %v2651_v20, 8.507059e+37  ;;  %v610_v31 = vadd.f32 %v609_v57, %v5449_v13  ;;  %v6951_v57 = vld [vmem:[%s5123_s26 + $0x1b8] sm:$0xff]  ;;  %v3482_v53 = vpop.f32.mrf.mxu3 }
 0x1ef   : > { %v3948_v47 = vadd.f32 %v3885_v54, %v3822_v51  ;;  %v2650_v10 = vsel %vm6913_vm13, %v6705_v19, %v2646_v40  ;;  %871 = vmatmul.f32.gmra.mxu2 %v6736_v4  ;;  %v6934_v33 = vadd.f32 1.0, %v4522_v63  ;;  %v2654_v18 = vor.u32 1.1754944e-38, %v2653_v22  ;;  %v612_v61 = vpop.f32.mrf.mxu1  ;;  %501 = vmatmul.f32.gmra.mxu0 %v6951_v57  ;;  %v6962_v51 = vld [vmem:[%s5123_s26 + $0x168] sm:$0xff] }
 0x1f0   : > { %v6932_v59 = vpop.eup %4523  ;;  %v1693_v5 = vsel %vm1692_vm14, %v6689_v36, %v1689_v44  ;;  %4527 = vtanh.f32 %v3634_v2  ;;  %v4159_v26 = vmul.f32 -1.442695, %v452_v46  ;;  %v4206_v4 = vmul.f32 -1.442695, %v610_v31  ;;  %v454_v44 = vpop.f32.mrf.mxu0 }
 0x1f1   : > { %v4526_v39 = vpop.eup %4525  ;;  %v6939_v19 = vmul.f32 %v6932_v59, %v6878_v21  ;;  %4011 = vst [vmem:[%s5881_s17 + $0x80] sm:$0xff] %v3948_v47  ;;  %v1698_v27 = vsel %vm6898_vm10, %v1697_v28, %v1693_v5  ;;  %4529 = vrcp.f32 %v6934_v33  ;;  %v2655_v52 = vsel %vm6926_vm15, %v2654_v18, %v2650_v10 }
 0x1f2   : > { %v6945_v16 = vadd.f32 1.0, %v4526_v39  ;;  %v3365_v36 = vmul.f32 %v4936_v48, %v1698_v27  ;;  %v3760_v15 = vsub.f32 1.0, %v2655_v52  ;;  %4531 = vpow2.f32 %v4159_v26  ;;  %677 = vmatmul.f32.gmra.mxu1 %v6962_v51 }
 0x1f3   : > { %v2689_v62 = vsub.f32 1.0, %v6939_v19  ;;  %v1701_v0 = vmul.f32 %v6772_v30, %v6720_v34  ;;  %vm1705_vm0 = vweird.f32 %v6720_v34  ;;  %vm1706_vm1 = vweird.f32 %v6772_v30 }
 0x1f4   : > { %4533 = vrcp.f32 %v6945_v16  ;;  %3526 = vmatmul.f32.gmra.mxu3 %v3365_v36  ;;  %v1709_v9 = vand.u32 2147483647, %v6720_v34  ;;  %v3823_v41 = vmul.f32 %v4938_v1, %v3760_v15  ;;  %v1711_v45 = vand.u32 2147483648, %v6720_v34  ;;  %vm1707_vm6 = vmor %vm1705_vm0, %vm1706_vm1  ;;  %v7017_v15 = vld [vmem:[%s5123_s26 + $0x1c0] sm:$0xff] }
 0x1f5   : > { %4535 = vpow2.f32 %v4206_v4  ;;  %v1702_v17 = vsub.f32 1.0, %v1701_v0  ;;  %v804_v40 = vadd.f32 %v6895_v38, %v5568_v56  ;;  %v2660_v20 = vmul.f32 %v6790_v6, %v2659_v25  ;;  %v7020_v0 = vld [vmem:[%s5123_s26 + $0x170] sm:$0xff] }
 0x1f6   : > { %v4528_v28 = vpop.eup %4527  ;;  %vm6969_vm2 = vcmp.eq.f32.partialorder %v1709_v9, 8.507059e+37  ;;  %vm2662_vm3 = vweird.f32 %v6732_v3  ;;  %v1712_v2 = vor.u32 1.1754944e-38, %v1711_v45  ;;  %vm2663_vm4 = vweird.f32 %v6790_v6 }
 0x1f7   : > { %v3886_v49 = vmul.f32 %v4528_v28, %v2655_v52  ;;  %v1703_v22 = vmul.f32 %v6772_v30, %v1702_v17  ;;  %874 = vmatmul.f32.gmra.mxu2 %v6797_v11  ;;  %v6982_v46 = vpop.eup %4529  ;;  %v2661_v63 = vadd.f32 %v6790_v6, %v2660_v20  ;;  %vm6985_vm5 = vmor %vm2662_vm3, %vm2663_vm4  ;;  %v2666_v43 = vand.u32 2147483647, %v6732_v3  ;;  %504 = vmatmul.f32.gmra.mxu0 %v7017_v15  ;;  %v3485_v20 = vpop.f32.mrf.mxu3 }
 0x1f8   : > { %v2668_v25 = vand.u32 2147483648, %v6732_v3  ;;  %v3635_v47 = vadd.f32 %v3482_v53, %v804_v40  ;;  %v4532_v10 = vpop.eup %4531  ;;  %v455_v11 = vadd.f32 %v454_v44, %v5337_v14  ;;  %v613_v5 = vadd.f32 %v612_v61, %v5449_v13  ;;  %v4941_v53 = vld [vmem:[%s5123_s26 + $0x90] sm:$0xff]  ;;  %v7034_v44 = vpop.f32.mrf.mxu2 }
 0x1f9   : > { %v3949_v8 = vadd.f32 %v3886_v49, %v3823_v41  ;;  %v1704_v31 = vadd.f32 %v6772_v30, %v1703_v22  ;;  %v6996_v39 = vadd.f32 1.0, %v4532_v10  ;;  %v2665_v3 = vsel %vm6985_vm5, %v6790_v6, %v2661_v63  ;;  %v615_v41 = vpop.f32.mrf.mxu1  ;;  %v457_v63 = vpop.f32.mrf.mxu0 }
 0x1fa   : > { %v6994_v18 = vpop.eup %4533  ;;  %vm2667_vm7 = vcmp.eq.f32.partialorder %v2666_v43, 8.507059e+37  ;;  %v2669_v27 = vor.u32 1.1754944e-38, %v2668_v25  ;;  %4537 = vtanh.f32 %v3635_v47  ;;  %v4160_v36 = vmul.f32 -1.442695, %v455_v11  ;;  %680 = vmatmul.f32.gmra.mxu1 %v7020_v0 }
 0x1fb   : > { %v4536_v26 = vpop.eup %4535  ;;  %v7007_v4 = vmul.f32 %v6994_v18, %v6945_v16  ;;  %4012 = vst [vmem:[%s5881_s17 + $0x88] sm:$0xff] %v3949_v8  ;;  %v1708_v48 = vsel %vm1707_vm6, %v6772_v30, %v1704_v31  ;;  %4539 = vrcp.f32 %v6996_v39  ;;  %v4940_v30 = vld [vmem:[%s5123_s26 + $0x110] sm:$0xff]  ;;  %v4207_v17 = vmul.f32 -1.442695, %v613_v5 }
 0x1fc   : > { %v7012_v34 = vadd.f32 1.0, %v4536_v26  ;;  %v1713_v6 = vsel %vm6969_vm2, %v1712_v2, %v1708_v48  ;;  %v2670_v52 = vsel %vm2667_vm7, %v2669_v27, %v2665_v3  ;;  %4541 = vpow2.f32 %v4160_v36 }
 0x1fd   : > { %v2704_v61 = vsub.f32 1.0, %v7007_v4  ;;  %v3366_v9 = vmul.f32 %v4940_v30, %v1713_v6  ;;  %v3761_v1 = vsub.f32 1.0, %v2670_v52  ;;  %v1716_v45 = vmul.f32 %v6827_v37, %v6774_v42 }
 0x1fe   : > { %4543 = vrcp.f32 %v7012_v34  ;;  %vm1720_vm8 = vweird.f32 %v6774_v42  ;;  %vm1721_vm9 = vweird.f32 %v6827_v37  ;;  %v1724_v54 = vand.u32 2147483647, %v6774_v42 }
 0x1ff   : > { %3529 = vmatmul.f32.gmra.mxu3 %v3366_v9  ;;  %v3824_v28 = vmul.f32 %v4941_v53, %v3761_v1  ;;  %v1726_v40 = vand.u32 2147483648, %v6774_v42  ;;  %877 = vmatmul.f32.gmra.mxu2 %v6851_v24  ;;  %4545 = vpow2.f32 %v4207_v17  ;;  %v1717_v49 = vsub.f32 1.0, %v1716_v45  ;;  %vm1722_vm14 = vmor %vm1720_vm8, %vm1721_vm9 }
 0x200   : > { %v807_v22 = vadd.f32 %v6967_v29, %v5568_v56  ;;  %v2675_v2 = vmul.f32 %v6842_v50, %v2674_v7  ;;  %v4538_v38 = vpop.eup %4537  ;;  %vm7042_vm10 = vcmp.eq.f32.partialorder %v1724_v54, 8.507059e+37  ;;  %vm2677_vm11 = vweird.f32 %v6793_v55  ;;  %v4943_v54 = vld [vmem:[%s5123_s26 + $0x118] sm:$0xff] }
 0x201   : > { %v1727_v25 = vor.u32 1.1754944e-38, %v1726_v40  ;;  %vm2678_vm12 = vweird.f32 %v6842_v50  ;;  %v7048_v24 = vpop.eup %4539  ;;  %v3887_v47 = vmul.f32 %v4538_v38, %v2670_v52  ;;  %v1718_v29 = vmul.f32 %v6827_v37, %v1717_v49  ;;  %v7069_v52 = vld [vmem:[%s5123_s26 + $0x178] sm:$0xff]  ;;  %v7095_v49 = vld [vmem:[%s5123_s26 + $0x1c8] sm:$0xff] }
 0x202   : > { %v2676_v60 = vadd.f32 %v6842_v50, %v2675_v2  ;;  %vm7052_vm13 = vmor %vm2677_vm11, %vm2678_vm12  ;;  %v2681_v10 = vand.u32 2147483647, %v6793_v55  ;;  %v4542_v8 = vpop.eup %4541  ;;  %v2683_v31 = vand.u32 2147483648, %v6793_v55  ;;  %v3636_v11 = vadd.f32 %v3485_v20, %v807_v22  ;;  %683 = vmatmul.f32.gmra.mxu1 %v7069_v52  ;;  %v3488_v2 = vpop.f32.mrf.mxu3  ;;  %507 = vmatmul.f32.gmra.mxu0 %v7095_v49 }
 0x203   : > { %v458_v5 = vadd.f32 %v457_v63, %v5337_v14  ;;  %v616_v3 = vadd.f32 %v615_v41, %v5449_v13  ;;  %v3950_v26 = vadd.f32 %v3887_v47, %v3824_v28  ;;  %v7062_v48 = vadd.f32 1.0, %v4542_v8  ;;  %v7088_v28 = vpop.f32.mrf.mxu1  ;;  %v7101_v63 = vpop.f32.mrf.mxu2 }
 0x204   : > { %v7060_v27 = vpop.eup %4543  ;;  %v1719_v36 = vadd.f32 %v6827_v37, %v1718_v29  ;;  %v2680_v6 = vsel %vm7052_vm13, %v6842_v50, %v2676_v60  ;;  %vm2682_vm15 = vcmp.eq.f32.partialorder %v2681_v10, 8.507059e+37  ;;  %v2684_v30 = vor.u32 1.1754944e-38, %v2683_v31  ;;  %v460_v10 = vpop.f32.mrf.mxu0 }
 0x205   : > { %v7074_v55 = vmul.f32 %v7060_v27, %v7012_v34  ;;  %4547 = vtanh.f32 %v3636_v11  ;;  %v4546_v9 = vpop.eup %4545  ;;  %4013 = vst [vmem:[%s5881_s17 + $0x90] sm:$0xff] %v3950_v26  ;;  %v4161_v1 = vmul.f32 -1.442695, %v458_v5  ;;  %v4208_v41 = vmul.f32 -1.442695, %v616_v3  ;;  %v7121_v3 = vld [vmem:[%s5123_s26 + $0x180] sm:$0xff] }
 0x206   : > { %4549 = vrcp.f32 %v7062_v48  ;;  %v1723_v50 = vsel %vm1722_vm14, %v6827_v37, %v1719_v36  ;;  %v7084_v45 = vadd.f32 1.0, %v4546_v9  ;;  %v2685_v53 = vsel %vm2682_vm15, %v2684_v30, %v2680_v6 }
 0x207   : > { %v2719_v17 = vsub.f32 1.0, %v7074_v55  ;;  %v1728_v42 = vsel %vm7042_vm10, %v1727_v25, %v1723_v50  ;;  %880 = vmatmul.f32.gmra.mxu2 %v6904_v32  ;;  %v3762_v20 = vsub.f32 1.0, %v2685_v53  ;;  %4551 = vpow2.f32 %v4161_v1  ;;  %v4944_v32 = vld [vmem:[%s5123_s26 + $0x98] sm:$0xff] }
 0x208   : > { %v3367_v40 = vmul.f32 %v4943_v54, %v1728_v42  ;;  %v1731_v37 = vmul.f32 %v6910_v35, %v6867_v12  ;;  %4553 = vrcp.f32 %v7084_v45  ;;  %vm1735_vm0 = vweird.f32 %v6867_v12 }
 0x209   : > { %vm1736_vm1 = vweird.f32 %v6910_v35  ;;  %v1739_v22 = vand.u32 2147483647, %v6867_v12  ;;  %v3825_v38 = vmul.f32 %v4944_v32, %v3762_v20  ;;  %4555 = vpow2.f32 %v4208_v41  ;;  %v4946_v32 = vld [vmem:[%s5123_s26 + $0x120] sm:$0xff] }
 0x20a   : > { %3532 = vmatmul.f32.gmra.mxu3 %v3367_v40  ;;  %v1732_v43 = vsub.f32 1.0, %v1731_v37  ;;  %v1741_v25 = vand.u32 2147483648, %v6867_v12  ;;  %v810_v60 = vadd.f32 %v7034_v44, %v5568_v56  ;;  %v2690_v7 = vmul.f32 %v6932_v59, %v2689_v62  ;;  %686 = vmatmul.f32.gmra.mxu1 %v7121_v3  ;;  %vm1737_vm6 = vmor %vm1735_vm0, %vm1736_vm1 }
 0x20b   : > { %v4548_v47 = vpop.eup %4547  ;;  %vm7106_vm2 = vcmp.eq.f32.partialorder %v1739_v22, 8.507059e+37  ;;  %vm2692_vm3 = vweird.f32 %v6878_v21  ;;  %vm2693_vm4 = vweird.f32 %v6932_v59  ;;  %v2696_v26 = vand.u32 2147483647, %v6878_v21  ;;  %v621_v22 = vpop.f32.mrf.mxu1 }
 0x20c   : > { %v7116_v8 = vpop.eup %4549  ;;  %v3888_v31 = vmul.f32 %v4548_v47, %v2685_v53  ;;  %v1733_v11 = vmul.f32 %v6910_v35, %v1732_v43  ;;  %v1742_v5 = vor.u32 1.1754944e-38, %v1741_v25  ;;  %v2691_v62 = vadd.f32 %v6932_v59, %v2690_v7  ;;  %vm7129_vm5 = vmor %vm2692_vm3, %vm2693_vm4  ;;  %v3491_v47 = vpop.f32.mrf.mxu3  ;;  %v4947_v7 = vld [vmem:[%s5123_s26 + $0xa0] sm:$0xff] }
 0x20d   : > { %v7126_v19 = vmul.f32 %v7116_v8, %v7062_v48  ;;  %v2698_v36 = vand.u32 2147483648, %v6878_v21  ;;  %v4552_v6 = vpop.eup %4551  ;;  %v3637_v50 = vadd.f32 %v3488_v2, %v810_v60  ;;  %v461_v1 = vadd.f32 %v460_v10, %v5337_v14  ;;  %v7168_v29 = vpop.f32.mrf.mxu2  ;;  %v7171_v60 = vld [vmem:[%s5123_s26 + $0x1d0] sm:$0xff] }
 0x20e   : > { %v3951_v30 = vadd.f32 %v3888_v31, %v3825_v38  ;;  %v1734_v9 = vadd.f32 %v6910_v35, %v1733_v11  ;;  %v7137_v41 = vpop.eup %4553  ;;  %v7139_v42 = vadd.f32 1.0, %v4552_v6  ;;  %v2695_v21 = vsel %vm7129_vm5, %v6932_v59, %v2691_v62  ;;  %510 = vmatmul.f32.gmra.mxu0 %v7171_v60 }
 0x20f   : > { %vm2697_vm7 = vcmp.eq.f32.partialorder %v2696_v26, 8.507059e+37  ;;  %v2699_v53 = vor.u32 1.1754944e-38, %v2698_v36  ;;  %883 = vmatmul.f32.gmra.mxu2 %v6962_v51  ;;  %v4556_v54 = vpop.eup %4555  ;;  %v7151_v40 = vmul.f32 %v7137_v41, %v7084_v45  ;;  %4557 = vtanh.f32 %v3637_v50  ;;  %v7184_v26 = vld [vmem:[%s5123_s26 + $0x188] sm:$0xff] }
 0x210   : > { %4014 = vst [vmem:[%s5881_s17 + $0x98] sm:$0xff] %v3951_v30  ;;  %v1738_v20 = vsel %vm1737_vm6, %v6910_v35, %v1734_v9  ;;  %v4162_v12 = vmul.f32 -1.442695, %v461_v1  ;;  %4559 = vrcp.f32 %v7139_v42  ;;  %v7156_v37 = vadd.f32 1.0, %v4556_v54  ;;  %v463_v1 = vpop.f32.mrf.mxu0 }
 0x211   : > { %v1743_v59 = vsel %vm7106_vm2, %v1742_v5, %v1738_v20  ;;  %v2700_v51 = vsel %vm2697_vm7, %v2699_v53, %v2695_v21  ;;  %v2734_v2 = vsub.f32 1.0, %v7151_v40  ;;  %v619_v35 = vadd.f32 %v7088_v28, %v5449_v13 }
 0x212   : > { %v3368_v38 = vmul.f32 %v4946_v32, %v1743_v59  ;;  %v3763_v43 = vsub.f32 1.0, %v2700_v51  ;;  %4561 = vpow2.f32 %v4162_v12  ;;  %v1746_v25 = vmul.f32 %v6982_v46, %v6934_v33  ;;  %689 = vmatmul.f32.gmra.mxu1 %v7184_v26 }
 0x213   : > { %4563 = vrcp.f32 %v7156_v37  ;;  %vm1750_vm8 = vweird.f32 %v6934_v33  ;;  %vm1751_vm9 = vweird.f32 %v6982_v46  ;;  %v1754_v31 = vand.u32 2147483647, %v6934_v33 }
 0x214   : > { %3535 = vmatmul.f32.gmra.mxu3 %v3368_v38  ;;  %v3826_v10 = vmul.f32 %v4947_v7, %v3763_v43  ;;  %v1756_v28 = vand.u32 2147483648, %v6934_v33  ;;  %v4209_v11 = vmul.f32 -1.442695, %v619_v35  ;;  %v1747_v5 = vsub.f32 1.0, %v1746_v25  ;;  %vm1752_vm14 = vmor %vm1750_vm8, %vm1751_vm9 }
 0x215   : > { %v813_v62 = vadd.f32 %v7101_v63, %v5568_v56  ;;  %v2705_v44 = vmul.f32 %v6994_v18, %v2704_v61  ;;  %v4558_v36 = vpop.eup %4557  ;;  %vm7187_vm10 = vcmp.eq.f32.partialorder %v1754_v31, 8.507059e+37  ;;  %vm2707_vm11 = vweird.f32 %v6945_v16 }
 0x216   : > { %v1757_v30 = vor.u32 1.1754944e-38, %v1756_v28  ;;  %vm2708_vm12 = vweird.f32 %v6994_v18  ;;  %v7193_v9 = vpop.eup %4559  ;;  %v3889_v63 = vmul.f32 %v4558_v36, %v2700_v51  ;;  %4565 = vpow2.f32 %v4209_v11  ;;  %v4949_v11 = vld [vmem:[%s5123_s26 + $0x128] sm:$0xff]  ;;  %v3494_v36 = vpop.f32.mrf.mxu3 }
 0x217   : > { %v1748_v4 = vmul.f32 %v6982_v46, %v1747_v5  ;;  %v2706_v61 = vadd.f32 %v6994_v18, %v2705_v44  ;;  %vm7197_vm13 = vmor %vm2707_vm11, %vm2708_vm12  ;;  %886 = vmatmul.f32.gmra.mxu2 %v7020_v0  ;;  %v7204_v53 = vmul.f32 %v7193_v9, %v7139_v42  ;;  %v2711_v54 = vand.u32 2147483647, %v6945_v16 }
 0x218   : > { %v4562_v21 = vpop.eup %4561  ;;  %v2713_v20 = vand.u32 2147483648, %v6945_v16  ;;  %v3638_v12 = vadd.f32 %v3491_v47, %v813_v62  ;;  %v3952_v51 = vadd.f32 %v3889_v63, %v3826_v10  ;;  %v622_v25 = vadd.f32 %v621_v22, %v5449_v13  ;;  %v624_v47 = vpop.f32.mrf.mxu1  ;;  %v7238_v22 = vld [vmem:[%s5123_s26 + $0x1d8] sm:$0xff] }
 0x219   : > { %v7208_v59 = vpop.eup %4563  ;;  %v7210_v32 = vadd.f32 1.0, %v4562_v21  ;;  %v1749_v38 = vadd.f32 %v6982_v46, %v1748_v4  ;;  %v2710_v0 = vsel %vm7197_vm13, %v6994_v18, %v2706_v61  ;;  %vm2712_vm15 = vcmp.eq.f32.partialorder %v2711_v54, 8.507059e+37  ;;  %v7235_v63 = vpop.f32.mrf.mxu2  ;;  %v7241_v4 = vld [vmem:[%s5123_s26 + $0x190] sm:$0xff]  ;;  %513 = vmatmul.f32.gmra.mxu0 %v7238_v22  ;;  %v4951_v61 = vld [vmem:[%s5123_s26 + $0xa8] sm:$0xff] }
 0x21a   : > { %v7218_v43 = vmul.f32 %v7208_v59, %v7156_v37  ;;  %v2714_v16 = vor.u32 1.1754944e-38, %v2713_v20  ;;  %4567 = vtanh.f32 %v3638_v12  ;;  %4015 = vst [vmem:[%s5881_s17 + $0xa0] sm:$0xff] %v3952_v51  ;;  %v464_v18 = vadd.f32 %v463_v1, %v5337_v14  ;;  %692 = vmatmul.f32.gmra.mxu1 %v7241_v4 }
 0x21b   : > { %4569 = vrcp.f32 %v7210_v32  ;;  %v1753_v35 = vsel %vm1752_vm14, %v6982_v46, %v1749_v38  ;;  %v1761_v31 = vmul.f32 %v7048_v24, %v6996_v39  ;;  %v4210_v44 = vmul.f32 -1.442695, %v622_v25 }
 0x21c   : > { %v2749_v7 = vsub.f32 1.0, %v7218_v43  ;;  %v1758_v33 = vsel %vm7187_vm10, %v1757_v30, %v1753_v35  ;;  %v2715_v10 = vsel %vm2712_vm15, %v2714_v16, %v2710_v0  ;;  %v4566_v28 = vpop.eup %4565  ;;  %v4163_v62 = vmul.f32 -1.442695, %v464_v18  ;;  %v466_v35 = vpop.f32.mrf.mxu0 }
 0x21d   : > { %v3369_v46 = vmul.f32 %v4949_v11, %v1758_v33  ;;  %v3764_v5 = vsub.f32 1.0, %v2715_v10  ;;  %v7244_v6 = vadd.f32 1.0, %v4566_v28  ;;  %v1762_v30 = vsub.f32 1.0, %v1761_v31 }
 0x21e   : > { %vm1765_vm0 = vweird.f32 %v6996_v39  ;;  %vm1766_vm1 = vweird.f32 %v7048_v24  ;;  %4571 = vpow2.f32 %v4163_v62  ;;  %v1769_v1 = vand.u32 2147483647, %v6996_v39 }
 0x21f   : > { %3538 = vmatmul.f32.gmra.mxu3 %v3369_v46  ;;  %v3827_v50 = vmul.f32 %v4951_v61, %v3764_v5  ;;  %v1771_v21 = vand.u32 2147483648, %v6996_v39  ;;  %889 = vmatmul.f32.gmra.mxu2 %v7069_v52  ;;  %4573 = vrcp.f32 %v7244_v6  ;;  %v1763_v20 = vmul.f32 %v7048_v24, %v1762_v30  ;;  %vm1767_vm4 = vmor %vm1765_vm0, %vm1766_vm1  ;;  %v4953_v30 = vld [vmem:[%s5123_s26 + $0x130] sm:$0xff] }
 0x220   : > { %v4568_v54 = vpop.eup %4567  ;;  %v816_v12 = vadd.f32 %v7168_v29, %v5568_v56  ;;  %v2720_v51 = vmul.f32 %v7060_v27, %v2719_v17  ;;  %4575 = vpow2.f32 %v4210_v44  ;;  %vm7262_vm2 = vcmp.eq.f32.partialorder %v1769_v1, 8.507059e+37  ;;  %v7293_v62 = vpop.f32.mrf.mxu1  ;;  %v7296_v44 = vld [vmem:[%s5123_s26 + $0x198] sm:$0xff] }
 0x221   : > { %v7260_v38 = vpop.eup %4569  ;;  %v3890_v0 = vmul.f32 %v4568_v54, %v2715_v10  ;;  %v1772_v52 = vor.u32 1.1754944e-38, %v1771_v21  ;;  %v1764_v29 = vadd.f32 %v7048_v24, %v1763_v20  ;;  %vm2722_vm3 = vweird.f32 %v7012_v34 }
 0x222   : > { %v7268_v18 = vmul.f32 %v7260_v38, %v7210_v32  ;;  %v2721_v55 = vadd.f32 %v7060_v27, %v2720_v51  ;;  %vm2723_vm5 = vweird.f32 %v7060_v27  ;;  %v2726_v25 = vand.u32 2147483647, %v7012_v34  ;;  %695 = vmatmul.f32.gmra.mxu1 %v7296_v44  ;;  %v7309_v51 = vpop.f32.mrf.mxu2 }
 0x223   : > { %v3953_v17 = vadd.f32 %v3890_v0, %v3827_v50  ;;  %v2728_v33 = vand.u32 2147483648, %v7012_v34  ;;  %v1768_v10 = vsel %vm1767_vm4, %v7048_v24, %v1764_v29  ;;  %vm7281_vm6 = vmor %vm2722_vm3, %vm2723_vm5  ;;  %v3639_v28 = vadd.f32 %v3494_v36, %v816_v12  ;;  %v3497_v12 = vpop.f32.mrf.mxu3  ;;  %v7312_v0 = vld [vmem:[%s5123_s26 + $0x1e0] sm:$0xff] }
 0x224   : > { %v467_v11 = vadd.f32 %v466_v35, %v5337_v14  ;;  %v625_v39 = vadd.f32 %v624_v47, %v5449_v13  ;;  %v4572_v46 = vpop.eup %4571  ;;  %v1773_v5 = vsel %vm7262_vm2, %v1772_v52, %v1768_v10  ;;  %v2725_v34 = vsel %vm7281_vm6, %v7060_v27, %v2721_v55  ;;  %516 = vmatmul.f32.gmra.mxu0 %v7312_v0  ;;  %v469_v31 = vpop.f32.mrf.mxu0 }
 0x225   : > { %4016 = vst [vmem:[%s5881_s17 + $0xa8] sm:$0xff] %v3953_v17  ;;  %vm2727_vm7 = vcmp.eq.f32.partialorder %v2726_v25, 8.507059e+37  ;;  %v2729_v24 = vor.u32 1.1754944e-38, %v2728_v33  ;;  %v7299_v36 = vpop.eup %4573  ;;  %v7301_v47 = vadd.f32 1.0, %v4572_v46  ;;  %v3370_v61 = vmul.f32 %v4953_v30, %v1773_v5 }
 0x226   : > { %4577 = vtanh.f32 %v3639_v28  ;;  %v4164_v50 = vmul.f32 -1.442695, %v467_v11  ;;  %v4576_v1 = vpop.eup %4575  ;;  %v7306_v27 = vmul.f32 %v7299_v36, %v7244_v6  ;;  %v4211_v54 = vmul.f32 -1.442695, %v625_v39 }
 0x227   : > { %v2730_v21 = vsel %vm2727_vm7, %v2729_v24, %v2725_v34  ;;  %v1777_v20 = vsub.f32 1.0, %v7126_v19  ;;  %892 = vmatmul.f32.gmra.mxu2 %v7121_v3  ;;  %4579 = vrcp.f32 %v7301_v47  ;;  %v7316_v16 = vadd.f32 1.0, %v4576_v1  ;;  %3541 = vmatmul.f32.gmra.mxu3 %v3370_v61  ;;  %v4954_v3 = vld [vmem:[%s5123_s26 + $0xb0] sm:$0xff] }
 0x228   : > { %v3765_v52 = vsub.f32 1.0, %v2730_v21  ;;  %vm1780_vm8 = vweird.f32 %v7062_v48  ;;  %v2764_v19 = vsub.f32 1.0, %v7306_v27  ;;  %4581 = vpow2.f32 %v4164_v50 }
 0x229   : > { %v1778_v35 = vmul.f32 %v7116_v8, %v1777_v20  ;;  %vm1781_vm9 = vweird.f32 %v7116_v8  ;;  %4583 = vrcp.f32 %v7316_v16  ;;  %v1784_v55 = vand.u32 2147483647, %v7062_v48 }
 0x22a   : > { %v3828_v29 = vmul.f32 %v4954_v3, %v3765_v52  ;;  %v1786_v17 = vand.u32 2147483648, %v7062_v48  ;;  %4585 = vpow2.f32 %v4211_v54  ;;  %v819_v33 = vadd.f32 %v7235_v63, %v5568_v56  ;;  %vm1782_vm10 = vmor %vm1780_vm8, %vm1781_vm9  ;;  %v7345_v48 = vld [vmem:[%s5123_s26 + $0x1a0] sm:$0xff]  ;;  %v7360_v52 = vpop.f32.mrf.mxu1 }
 0x22b   : > { %v1779_v25 = vadd.f32 %v7116_v8, %v1778_v35  ;;  %v2735_v10 = vmul.f32 %v7137_v41, %v2734_v2  ;;  %vm1785_vm11 = vcmp.eq.f32.partialorder %v1784_v55, 8.507059e+37  ;;  %vm2737_vm12 = vweird.f32 %v7084_v45  ;;  %698 = vmatmul.f32.gmra.mxu1 %v7345_v48 }
 0x22c   : > { %v4578_v28 = vpop.eup %4577  ;;  %v1787_v11 = vor.u32 1.1754944e-38, %v1786_v17  ;;  %vm2738_vm13 = vweird.f32 %v7137_v41  ;;  %v2741_v2 = vand.u32 2147483647, %v7084_v45  ;;  %v2743_v24 = vand.u32 2147483648, %v7084_v45 }
 0x22d   : > { %v3891_v39 = vmul.f32 %v4578_v28, %v2730_v21  ;;  %v1783_v46 = vsel %vm1782_vm10, %v7116_v8, %v1779_v25  ;;  %v2736_v63 = vadd.f32 %v7137_v41, %v2735_v10  ;;  %vm7339_vm14 = vmor %vm2737_vm12, %vm2738_vm13  ;;  %v7348_v5 = vpop.eup %4579  ;;  %v3640_v30 = vadd.f32 %v3497_v12, %v819_v33  ;;  %v4956_v21 = vld [vmem:[%s5123_s26 + $0x138] sm:$0xff]  ;;  %v3500_v25 = vpop.f32.mrf.mxu3  ;;  %v7381_v28 = vld [vmem:[%s5123_s26 + $0x1e8] sm:$0xff] }
 0x22e   : > { %v1788_v34 = vsel %vm1785_vm11, %v1787_v11, %v1783_v46  ;;  %v470_v8 = vadd.f32 %v469_v31, %v5337_v14  ;;  %v4582_v61 = vpop.eup %4581  ;;  %v7354_v50 = vmul.f32 %v7348_v5, %v7301_v47  ;;  %vm2742_vm15 = vcmp.eq.f32.partialorder %v2741_v2, 8.507059e+37  ;;  %v7378_v31 = vpop.f32.mrf.mxu2  ;;  %519 = vmatmul.f32.gmra.mxu0 %v7381_v28 }
 0x22f   : > { %v3954_v1 = vadd.f32 %v3891_v39, %v3828_v29  ;;  %v3371_v54 = vmul.f32 %v4956_v21, %v1788_v34  ;;  %v2740_v20 = vsel %vm7339_vm14, %v7137_v41, %v2736_v63  ;;  %v7362_v35 = vpop.eup %4583  ;;  %v7364_v45 = vadd.f32 1.0, %v4582_v61  ;;  %895 = vmatmul.f32.gmra.mxu2 %v7184_v26  ;;  %v4957_v63 = vld [vmem:[%s5123_s26 + $0xb8] sm:$0xff] }
 0x230   : > { %v2744_v12 = vor.u32 1.1754944e-38, %v2743_v24  ;;  %4587 = vtanh.f32 %v3640_v30  ;;  %v4586_v3 = vpop.eup %4585  ;;  %v7368_v29 = vmul.f32 %v7362_v35, %v7316_v16  ;;  %v4165_v55 = vmul.f32 -1.442695, %v470_v8 }
 0x231   : > { %4017 = vst [vmem:[%s5881_s17 + $0xb0] sm:$0xff] %v3954_v1  ;;  %3544 = vmatmul.f32.gmra.mxu3 %v3371_v54  ;;  %v628_v41 = vadd.f32 %v7293_v62, %v5449_v13  ;;  %v1792_v17 = vsub.f32 1.0, %v7204_v53  ;;  %4589 = vrcp.f32 %v7364_v45  ;;  %v7375_v33 = vadd.f32 1.0, %v4586_v3  ;;  %v472_v1 = vpop.f32.mrf.mxu0 }
 0x232   : > { %v2745_v10 = vsel %vm2742_vm15, %v2744_v12, %v2740_v20  ;;  %vm1795_vm0 = vweird.f32 %v7139_v42  ;;  %v2779_v11 = vsub.f32 1.0, %v7368_v29  ;;  %4591 = vpow2.f32 %v4165_v55 }
 0x233   : > { %v3766_v62 = vsub.f32 1.0, %v2745_v10  ;;  %v4212_v53 = vmul.f32 -1.442695, %v628_v41  ;;  %4593 = vrcp.f32 %v7375_v33  ;;  %v1793_v39 = vmul.f32 %v7193_v9, %v1792_v17  ;;  %701 = vmatmul.f32.gmra.mxu1 %v6810_v23  ;;  %v7427_v17 = vpop.f32.mrf.mxu1 }
 0x234   : > { %vm1796_vm1 = vweird.f32 %v7193_v9  ;;  %v1799_v46 = vand.u32 2147483647, %v7139_v42  ;;  %v1801_v26 = vand.u32 2147483648, %v7139_v42  ;;  %v822_v2 = vadd.f32 %v7309_v51, %v5568_v56 }
 0x235   : > { %v3829_v40 = vmul.f32 %v4957_v63, %v3766_v62  ;;  %4595 = vpow2.f32 %v4212_v53  ;;  %v1794_v24 = vadd.f32 %v7193_v9, %v1793_v39  ;;  %v2750_v8 = vmul.f32 %v7208_v59, %v2749_v7  ;;  %vm1797_vm4 = vmor %vm1795_vm0, %vm1796_vm1 }
 0x236   : > { %v4588_v34 = vpop.eup %4587  ;;  %vm7396_vm2 = vcmp.eq.f32.partialorder %v1799_v46, 8.507059e+37  ;;  %vm2752_vm3 = vweird.f32 %v7156_v37  ;;  %v1802_v51 = vor.u32 1.1754944e-38, %v1801_v26  ;;  %vm2753_vm5 = vweird.f32 %v7208_v59 }
 0x237   : > { %v3892_v61 = vmul.f32 %v4588_v34, %v2745_v10  ;;  %v2756_v23 = vand.u32 2147483647, %v7156_v37  ;;  %v7408_v21 = vpop.eup %4589  ;;  %v1798_v54 = vsel %vm1797_vm4, %v7193_v9, %v1794_v24  ;;  %v2751_v43 = vadd.f32 %v7208_v59, %v2750_v8  ;;  %vm7412_vm6 = vmor %vm2752_vm3, %vm2753_vm5 }
 0x238   : > { %v2758_v42 = vand.u32 2147483648, %v7156_v37  ;;  %v3641_v20 = vadd.f32 %v3500_v25, %v822_v2  ;;  %v4592_v12 = vpop.eup %4591  ;;  %v7419_v3 = vmul.f32 %v7408_v21, %v7364_v45  ;;  %v1803_v41 = vsel %vm7396_vm2, %v1802_v51, %v1798_v54  ;;  %v4958_v25 = vld [vmem:[%s5123_s26 + $0x140] sm:$0xff]  ;;  %v3503_v2 = vpop.f32.mrf.mxu3 }
 0x239   : > { %v3955_v55 = vadd.f32 %v3892_v61, %v3829_v40  ;;  %vm7423_vm7 = vcmp.eq.f32.partialorder %v2756_v23, 8.507059e+37  ;;  %v7429_v10 = vpop.eup %4593  ;;  %v7431_v37 = vadd.f32 1.0, %v4592_v12  ;;  %v3372_v62 = vmul.f32 %v4958_v25, %v1803_v41  ;;  %v7452_v23 = vpop.f32.mrf.mxu2  ;;  %898 = vmatmul.f32.gmra.mxu2 %v7241_v4 }
 0x23a   : > { %v2755_v53 = vsel %vm7412_vm6, %v7208_v59, %v2751_v43  ;;  %v2759_v39 = vor.u32 1.1754944e-38, %v2758_v42  ;;  %v7439_v63 = vmul.f32 %v7429_v10, %v7375_v33  ;;  %4597 = vtanh.f32 %v3641_v20 }
 0x23b   : > { %v4596_v46 = vpop.eup %4595  ;;  %4018 = vst [vmem:[%s5881_s17 + $0xb8] sm:$0xff] %v3955_v55  ;;  %v473_v40 = vadd.f32 %v472_v1, %v5337_v14  ;;  %v631_v26 = vadd.f32 %v7360_v52, %v5449_v13  ;;  %4599 = vrcp.f32 %v7431_v37  ;;  %3547 = vmatmul.f32.gmra.mxu3 %v3372_v62  ;;  %v1807_v24 = vsub.f32 1.0, %v7268_v18  ;;  %704 = vmatmul.f32.gmra.mxu1 %v6874_v58  ;;  %v7461_v18 = vld [vmem:[%s5123_s26 + $0x1f0] sm:$0xff]  ;;  %v4959_v1 = vld [vmem:[%s5123_s26 + $0xc0] sm:$0xff] }
 0x23c   : > { %v7446_v34 = vadd.f32 1.0, %v4596_v46  ;;  %v2760_v59 = vsel %vm7423_vm7, %v2759_v39, %v2755_v53  ;;  %v2794_v30 = vsub.f32 1.0, %v7439_v63  ;;  %vm1810_vm8 = vweird.f32 %v7210_v32  ;;  %522 = vmatmul.f32.gmra.mxu0 %v7461_v18  ;;  %v7489_v46 = vpop.f32.mrf.mxu1 }
 0x23d   : > { %v3767_v8 = vsub.f32 1.0, %v2760_v59  ;;  %v4166_v61 = vmul.f32 -1.442695, %v473_v40  ;;  %v4213_v51 = vmul.f32 -1.442695, %v631_v26  ;;  %v1808_v52 = vmul.f32 %v7260_v38, %v1807_v24  ;;  %v4960_v26 = vld [vmem:[%s5123_s26 + $0x148] sm:$0xff] }
 0x23e   : > { %4601 = vrcp.f32 %v7446_v34  ;;  %vm1811_vm9 = vweird.f32 %v7260_v38  ;;  %v1814_v43 = vand.u32 2147483647, %v7210_v32  ;;  %v1816_v7 = vand.u32 2147483648, %v7210_v32  ;;  %v475_v32 = vpop.f32.mrf.mxu0 }
 0x23f   : > { %v3830_v54 = vmul.f32 %v4959_v1, %v3767_v8  ;;  %4603 = vpow2.f32 %v4166_v61  ;;  %v1809_v58 = vadd.f32 %v7260_v38, %v1808_v52  ;;  %v825_v4 = vadd.f32 %v7378_v31, %v5568_v56  ;;  %vm1812_vm10 = vmor %vm1810_vm8, %vm1811_vm9  ;;  %v4962_v8 = vld [vmem:[%s5123_s26 + $0x150] sm:$0xff] }
 0x240   : > { %4605 = vpow2.f32 %v4213_v51  ;;  %v2765_v42 = vmul.f32 %v7299_v36, %v2764_v19  ;;  %v4598_v20 = vpop.eup %4597  ;;  %vm1815_vm11 = vcmp.eq.f32.partialorder %v1814_v43, 8.507059e+37  ;;  %v1817_v12 = vor.u32 1.1754944e-38, %v1816_v7  ;;  %v3506_v52 = vpop.f32.mrf.mxu3 }
 0x241   : > { %vm2767_vm12 = vweird.f32 %v7244_v6  ;;  %vm2768_vm13 = vweird.f32 %v7299_v36  ;;  %v7475_v55 = vpop.eup %4599  ;;  %v3893_v41 = vmul.f32 %v4598_v20, %v2760_v59  ;;  %v1813_v9 = vsel %vm1812_vm10, %v7260_v38, %v1809_v58 }
 0x242   : > { %v2766_v31 = vadd.f32 %v7299_v36, %v2765_v42  ;;  %vm7479_vm14 = vmor %vm2767_vm12, %vm2768_vm13  ;;  %v2771_v19 = vand.u32 2147483647, %v7244_v6  ;;  %v7486_v25 = vmul.f32 %v7475_v55, %v7431_v37  ;;  %v1818_v62 = vsel %vm1815_vm11, %v1817_v12, %v1813_v9  ;;  %v7519_v42 = vpop.f32.mrf.mxu2  ;;  %901 = vmatmul.f32.gmra.mxu2 %v7296_v44 }
 0x243   : > { %v2773_v53 = vand.u32 2147483648, %v7244_v6  ;;  %v3642_v39 = vadd.f32 %v3503_v2, %v825_v4  ;;  %v3956_v40 = vadd.f32 %v3893_v41, %v3830_v54  ;;  %v3373_v59 = vmul.f32 %v4960_v26, %v1818_v62  ;;  %707 = vmatmul.f32.gmra.mxu1 %v6951_v57  ;;  %v4961_v41 = vld [vmem:[%s5123_s26 + $0xc8] sm:$0xff] }
 0x244   : > { %v7491_v38 = vpop.eup %4601  ;;  %v2770_v24 = vsel %vm7479_vm14, %v7299_v36, %v2766_v31  ;;  %vm7497_vm15 = vcmp.eq.f32.partialorder %v2771_v19, 8.507059e+37  ;;  %v476_v51 = vadd.f32 %v475_v32, %v5337_v14  ;;  %v634_v36 = vadd.f32 %v7427_v17, %v5449_v13 }
 0x245   : > { %v4604_v61 = vpop.eup %4603  ;;  %v7503_v6 = vmul.f32 %v7491_v38, %v7446_v34  ;;  %v2774_v2 = vor.u32 1.1754944e-38, %v2773_v53  ;;  %4607 = vtanh.f32 %v3642_v39  ;;  %4019 = vst [vmem:[%s5881_s17 + $0xc0] sm:$0xff] %v3956_v40  ;;  %3550 = vmatmul.f32.gmra.mxu3 %v3373_v59  ;;  %v1822_v43 = vsub.f32 1.0, %v7354_v50 }
 0x246   : > { %v4606_v1 = vpop.eup %4605  ;;  %v7508_v54 = vadd.f32 1.0, %v4604_v61  ;;  %vm1825_vm0 = vweird.f32 %v7301_v47  ;;  %v4167_v4 = vmul.f32 -1.442695, %v476_v51  ;;  %v4214_v20 = vmul.f32 -1.442695, %v634_v36  ;;  %v478_v53 = vpop.f32.mrf.mxu0 }
 0x247   : > { %v2809_v7 = vsub.f32 1.0, %v7503_v6  ;;  %v7515_v58 = vadd.f32 1.0, %v4606_v1  ;;  %v2775_v57 = vsel %vm7497_vm15, %v2774_v2, %v2770_v24  ;;  %v1823_v50 = vmul.f32 %v7348_v5, %v1822_v43 }
 0x248   : > { %4609 = vrcp.f32 %v7508_v54  ;;  %v3768_v17 = vsub.f32 1.0, %v2775_v57  ;;  %vm1826_vm1 = vweird.f32 %v7348_v5  ;;  %v1829_v12 = vand.u32 2147483647, %v7301_v47  ;;  %v3509_v43 = vpop.f32.mrf.mxu3 }
 0x249   : > { %4611 = vrcp.f32 %v7515_v58  ;;  %v1831_v32 = vand.u32 2147483648, %v7301_v47  ;;  %v1824_v31 = vadd.f32 %v7348_v5, %v1823_v50  ;;  %v828_v44 = vadd.f32 %v7452_v23, %v5568_v56  ;;  %vm1827_vm2 = vmor %vm1825_vm0, %vm1826_vm1 }
 0x24a   : > { %v3831_v9 = vmul.f32 %v4961_v41, %v3768_v17  ;;  %4613 = vpow2.f32 %v4167_v4  ;;  %vm1830_vm3 = vcmp.eq.f32.partialorder %v1829_v12, 8.507059e+37  ;;  %v2780_v62 = vmul.f32 %v7362_v35, %v2779_v11  ;;  %v7547_v11 = vpop.f32.mrf.mxu1 }
 0x24b   : > { %v4608_v27 = vpop.eup %4607  ;;  %4615 = vpow2.f32 %v4214_v20  ;;  %v1832_v19 = vor.u32 1.1754944e-38, %v1831_v32  ;;  %v1828_v40 = vsel %vm1827_vm2, %v7348_v5, %v1824_v31  ;;  %vm2782_vm4 = vweird.f32 %v7316_v16  ;;  %710 = vmatmul.f32.gmra.mxu1 %v7017_v15  ;;  %v7574_v32 = vpop.f32.mrf.mxu2  ;;  %904 = vmatmul.f32.gmra.mxu2 %v7345_v48 }
 0x24c   : > { %v3894_v39 = vmul.f32 %v4608_v27, %v2775_v57  ;;  %vm2783_vm5 = vweird.f32 %v7362_v35  ;;  %v2781_v26 = vadd.f32 %v7362_v35, %v2780_v62  ;;  %v2786_v29 = vand.u32 2147483647, %v7316_v16 }
 0x24d   : > { %v1833_v23 = vsel %vm1830_vm3, %v1832_v19, %v1828_v40  ;;  %vm7541_vm6 = vmor %vm2782_vm4, %vm2783_vm5  ;;  %v2788_v59 = vand.u32 2147483648, %v7316_v16  ;;  %v3643_v2 = vadd.f32 %v3506_v52, %v828_v44  ;;  %v479_v51 = vadd.f32 %v478_v53, %v5337_v14 }
 0x24e   : > { %v7550_v5 = vpop.eup %4609  ;;  %v3957_v24 = vadd.f32 %v3894_v39, %v3831_v9  ;;  %v3374_v61 = vmul.f32 %v4962_v8, %v1833_v23  ;;  %v2785_v16 = vsel %vm7541_vm6, %v7362_v35, %v2781_v26  ;;  %vm2787_vm7 = vcmp.eq.f32.partialorder %v2786_v29, 8.507059e+37  ;;  %v481_v40 = vpop.f32.mrf.mxu0 }
 0x24f   : > { %v7554_v1 = vpop.eup %4611  ;;  %v7558_v36 = vmul.f32 %v7550_v5, %v7508_v54  ;;  %v2789_v15 = vor.u32 1.1754944e-38, %v2788_v59  ;;  %4617 = vtanh.f32 %v3643_v2  ;;  %v4168_v52 = vmul.f32 -1.442695, %v479_v51 }
 0x250   : > { %v4614_v57 = vpop.eup %4613  ;;  %v7565_v4 = vmul.f32 %v7554_v1, %v7515_v58  ;;  %4020 = vst [vmem:[%s5881_s17 + $0xc8] sm:$0xff] %v3957_v24  ;;  %3553 = vmatmul.f32.gmra.mxu3 %v3374_v61  ;;  %v637_v17 = vadd.f32 %v7489_v46, %v5449_v13  ;;  %v1837_v12 = vsub.f32 1.0, %v7419_v3  ;;  %vm1840_vm8 = vweird.f32 %v7364_v45  ;;  %v4963_v3 = vld [vmem:[%s5123_s26 + $0xd0] sm:$0xff] }
 0x251   : > { %v4616_v20 = vpop.eup %4615  ;;  %v7570_v50 = vadd.f32 1.0, %v4614_v57  ;;  %v2790_v35 = vsel %vm2787_vm7, %v2789_v15, %v2785_v16  ;;  %4619 = vpow2.f32 %v4168_v52  ;;  %vm1841_vm9 = vweird.f32 %v7408_v21  ;;  %v4964_v16 = vld [vmem:[%s5123_s26 + $0x158] sm:$0xff]  ;;  %v3512_v52 = vpop.f32.mrf.mxu3 }
 0x252   : > { %v2824_v41 = vsub.f32 1.0, %v7565_v4  ;;  %v7578_v9 = vadd.f32 1.0, %v4616_v20  ;;  %v3769_v31 = vsub.f32 1.0, %v2790_v35  ;;  %v4215_v46 = vmul.f32 -1.442695, %v637_v17  ;;  %vm1842_vm10 = vmor %vm1840_vm8, %vm1841_vm9  ;;  %v7614_v17 = vpop.f32.mrf.mxu1 }
 0x253   : > { %4621 = vrcp.f32 %v7570_v50  ;;  %v1838_v44 = vmul.f32 %v7408_v21, %v1837_v12  ;;  %v1844_v19 = vand.u32 2147483647, %v7364_v45  ;;  %v1846_v48 = vand.u32 2147483648, %v7364_v45  ;;  %713 = vmatmul.f32.gmra.mxu1 %v7095_v49 }
 0x254   : > { %4623 = vrcp.f32 %v7578_v9  ;;  %v3832_v27 = vmul.f32 %v4963_v3, %v3769_v31  ;;  %v831_v53 = vadd.f32 %v7519_v42, %v5568_v56  ;;  %v2795_v39 = vmul.f32 %v7429_v10, %v2794_v30  ;;  %v7635_v3 = vpop.f32.mrf.mxu2 }
 0x255   : > { %4625 = vpow2.f32 %v4215_v46  ;;  %v1839_v62 = vadd.f32 %v7408_v21, %v1838_v44  ;;  %v4618_v23 = vpop.eup %4617  ;;  %vm1845_vm11 = vcmp.eq.f32.partialorder %v1844_v19, 8.507059e+37  ;;  %v1847_v26 = vor.u32 1.1754944e-38, %v1846_v48 }
 0x256   : > { %vm2797_vm12 = vweird.f32 %v7375_v33  ;;  %vm2798_vm13 = vweird.f32 %v7429_v10  ;;  %v3895_v47 = vmul.f32 %v4618_v23, %v2790_v35  ;;  %v2796_v42 = vadd.f32 %v7429_v10, %v2795_v39 }
 0x257   : > { %v1843_v29 = vsel %vm1842_vm10, %v7408_v21, %v1839_v62  ;;  %vm7599_vm14 = vmor %vm2797_vm12, %vm2798_vm13  ;;  %v2801_v30 = vand.u32 2147483647, %v7375_v33  ;;  %v4620_v45 = vpop.eup %4619  ;;  %v2803_v24 = vand.u32 2147483648, %v7375_v33  ;;  %v3644_v8 = vadd.f32 %v3509_v43, %v831_v53 }
 0x258   : > { %v1848_v59 = vsel %vm1845_vm11, %v1847_v26, %v1843_v29  ;;  %v482_v61 = vadd.f32 %v481_v40, %v5337_v14  ;;  %v3958_v51 = vadd.f32 %v3895_v47, %v3832_v27  ;;  %v7608_v21 = vadd.f32 1.0, %v4620_v45  ;;  %v4965_v27 = vld [vmem:[%s5123_s26 + $0x1a8] sm:$0xff] }
 0x259   : > { %v7606_v2 = vpop.eup %4621  ;;  %v3375_v15 = vmul.f32 %v4964_v16, %v1848_v59  ;;  %v2800_v57 = vsel %vm7599_vm14, %v7429_v10, %v2796_v42  ;;  %vm2802_vm15 = vcmp.eq.f32.partialorder %v2801_v30, 8.507059e+37  ;;  %v2804_v20 = vor.u32 1.1754944e-38, %v2803_v24  ;;  %907 = vmatmul.f32.gmra.mxu2 %v4965_v27  ;;  %v484_v59 = vpop.f32.mrf.mxu0 }
 0x25a   : > { %v7617_v33 = vpop.eup %4623  ;;  %v7621_v43 = vmul.f32 %v7606_v2, %v7570_v50  ;;  %4627 = vtanh.f32 %v3644_v8  ;;  %4021 = vst [vmem:[%s5881_s17 + $0xd0] sm:$0xff] %v3958_v51  ;;  %v4169_v49 = vmul.f32 -1.442695, %v482_v61  ;;  %v640_v10 = vadd.f32 %v7547_v11, %v5449_v13 }
 0x25b   : > { %v4626_v35 = vpop.eup %4625  ;;  %v7625_v12 = vmul.f32 %v7617_v33, %v7578_v9  ;;  %4629 = vrcp.f32 %v7608_v21  ;;  %3556 = vmatmul.f32.gmra.mxu3 %v3375_v15  ;;  %v2805_v46 = vsel %vm2802_vm15, %v2804_v20, %v2800_v57  ;;  %v1852_v44 = vsub.f32 1.0, %v7486_v25  ;;  %v4966_v25 = vld [vmem:[%s5123_s26 + $0xd8] sm:$0xff]  ;;  %v7679_v20 = vpop.f32.mrf.mxu1  ;;  %716 = vmatmul.f32.gmra.mxu1 %v7171_v60 }
 0x25c   : > { %v7631_v31 = vadd.f32 1.0, %v4626_v35  ;;  %vm1855_vm0 = vweird.f32 %v7431_v37  ;;  %v3770_v48 = vsub.f32 1.0, %v2805_v46  ;;  %4631 = vpow2.f32 %v4169_v49 }
 0x25d   : > { %v2839_v19 = vsub.f32 1.0, %v7625_v12  ;;  %v4216_v62 = vmul.f32 -1.442695, %v640_v10  ;;  %v1853_v11 = vmul.f32 %v7475_v55, %v1852_v44  ;;  %vm1856_vm1 = vweird.f32 %v7475_v55 }
 0x25e   : > { %4633 = vrcp.f32 %v7631_v31  ;;  %v1859_v53 = vand.u32 2147483647, %v7431_v37  ;;  %v3833_v39 = vmul.f32 %v4966_v25, %v3770_v48  ;;  %v1861_v40 = vand.u32 2147483648, %v7431_v37  ;;  %vm1857_vm4 = vmor %vm1855_vm0, %vm1856_vm1 }
 0x25f   : > { %4635 = vpow2.f32 %v4216_v62  ;;  %v834_v23 = vadd.f32 %v7574_v32, %v5568_v56  ;;  %v1854_v47 = vadd.f32 %v7475_v55, %v1853_v11  ;;  %v2810_v42 = vmul.f32 %v7491_v38, %v2809_v7 }
 0x260   : > { %v4628_v26 = vpop.eup %4627  ;;  %vm7648_vm2 = vcmp.eq.f32.partialorder %v1859_v53, 8.507059e+37  ;;  %vm2812_vm3 = vweird.f32 %v7446_v34  ;;  %v1862_v32 = vor.u32 1.1754944e-38, %v1861_v40  ;;  %vm2813_vm5 = vweird.f32 %v7491_v38 }
 0x261   : > { %v7656_v63 = vpop.eup %4629  ;;  %v3896_v30 = vmul.f32 %v4628_v26, %v2805_v46  ;;  %v2816_v45 = vand.u32 2147483647, %v7446_v34  ;;  %v1858_v7 = vsel %vm1857_vm4, %v7475_v55, %v1854_v47  ;;  %v2811_v24 = vadd.f32 %v7491_v38, %v2810_v42  ;;  %vm7668_vm6 = vmor %vm2812_vm3, %vm2813_vm5  ;;  %v3515_v55 = vpop.f32.mrf.mxu3  ;;  %v4968_v26 = vld [vmem:[%s5123_s26 + $0x1b0] sm:$0xff]  ;;  %v4969_v47 = vld [vmem:[%s5123_s26 + $0xe0] sm:$0xff] }
 0x262   : > { %v7664_v6 = vmul.f32 %v7656_v63, %v7608_v21  ;;  %v2818_v37 = vand.u32 2147483648, %v7446_v34  ;;  %v4632_v61 = vpop.eup %4631  ;;  %v1863_v16 = vsel %vm7648_vm2, %v1862_v32, %v1858_v7  ;;  %v3645_v57 = vadd.f32 %v3512_v52, %v834_v23  ;;  %v4967_v34 = vld [vmem:[%s5123_s26 + $0x160] sm:$0xff]  ;;  %v7705_v23 = vpop.f32.mrf.mxu2  ;;  %910 = vmatmul.f32.gmra.mxu2 %v4968_v26 }
 0x263   : > { %v3959_v51 = vadd.f32 %v3896_v30, %v3833_v39  ;;  %vm7675_vm7 = vcmp.eq.f32.partialorder %v2816_v45, 8.507059e+37  ;;  %v7684_v49 = vadd.f32 1.0, %v4632_v61  ;;  %v3376_v10 = vmul.f32 %v4967_v34, %v1863_v16 }
 0x264   : > { %v7682_v35 = vpop.eup %4633  ;;  %v2815_v46 = vsel %vm7668_vm6, %v7491_v38, %v2811_v24  ;;  %v2819_v44 = vor.u32 1.1754944e-38, %v2818_v37  ;;  %4637 = vtanh.f32 %v3645_v57  ;;  %v485_v60 = vadd.f32 %v484_v59, %v5337_v14 }
 0x265   : > { %v4636_v27 = vpop.eup %4635  ;;  %v7692_v52 = vmul.f32 %v7682_v35, %v7631_v31  ;;  %4022 = vst [vmem:[%s5881_s17 + $0xd8] sm:$0xff] %v3959_v51  ;;  %v643_v48 = vadd.f32 %v7614_v17, %v5449_v13  ;;  %4639 = vrcp.f32 %v7684_v49  ;;  %3559 = vmatmul.f32.gmra.mxu3 %v3376_v10  ;;  %v1867_v11 = vsub.f32 1.0, %v7558_v36  ;;  %v7738_v51 = vpop.f32.mrf.mxu1  ;;  %719 = vmatmul.f32.gmra.mxu1 %v7238_v22 }
 0x266   : > { %v7699_v62 = vadd.f32 1.0, %v4636_v27  ;;  %v2820_v38 = vsel %vm7675_vm7, %v2819_v44, %v2815_v46  ;;  %v4170_v39 = vmul.f32 -1.442695, %v485_v60  ;;  %vm1870_vm8 = vweird.f32 %v7508_v54  ;;  %v4970_v44 = vld [vmem:[%s5123_s26 + $0x168] sm:$0xff] }
 0x267   : > { %v2854_v53 = vsub.f32 1.0, %v7692_v52  ;;  %v3771_v25 = vsub.f32 1.0, %v2820_v38  ;;  %v4217_v40 = vmul.f32 -1.442695, %v643_v48  ;;  %v1868_v17 = vmul.f32 %v7550_v5, %v1867_v11 }
 0x268   : > { %4641 = vrcp.f32 %v7699_v62  ;;  %vm1871_vm9 = vweird.f32 %v7550_v5  ;;  %v1874_v36 = vand.u32 2147483647, %v7508_v54  ;;  %v1876_v42 = vand.u32 2147483648, %v7508_v54  ;;  %v487_v54 = vpop.f32.mrf.mxu0 }
 0x269   : > { %v3834_v29 = vmul.f32 %v4969_v47, %v3771_v25  ;;  %4643 = vpow2.f32 %v4170_v39  ;;  %v1869_v30 = vadd.f32 %v7550_v5, %v1868_v17  ;;  %v837_v32 = vadd.f32 %v7635_v3, %v5568_v56  ;;  %vm7721_vm10 = vmor %vm1870_vm8, %vm1871_vm9  ;;  %v3518_v34 = vpop.f32.mrf.mxu3 }
 0x26a   : > { %4645 = vpow2.f32 %v4217_v40  ;;  %v2825_v45 = vmul.f32 %v7554_v1, %v2824_v41  ;;  %v4638_v59 = vpop.eup %4637  ;;  %vm1875_vm11 = vcmp.eq.f32.partialorder %v1874_v36, 8.507059e+37  ;;  %v1877_v24 = vor.u32 1.1754944e-38, %v1876_v42  ;;  %v7767_v47 = vpop.f32.mrf.mxu2 }
 0x26b   : > { %vm2827_vm12 = vweird.f32 %v7515_v58  ;;  %vm2828_vm13 = vweird.f32 %v7554_v1  ;;  %v7727_v8 = vpop.eup %4639  ;;  %v3897_v3 = vmul.f32 %v4638_v59, %v2820_v38  ;;  %v1873_v4 = vsel %vm7721_vm10, %v7550_v5, %v1869_v30 }
 0x26c   : > { %v2826_v41 = vadd.f32 %v7554_v1, %v2825_v45  ;;  %vm7733_vm14 = vmor %vm2827_vm12, %vm2828_vm13  ;;  %v2831_v61 = vand.u32 2147483647, %v7515_v58  ;;  %v7743_v16 = vmul.f32 %v7727_v8, %v7684_v49  ;;  %v1878_v15 = vsel %vm1875_vm11, %v1877_v24, %v1873_v4 }
 0x26d   : > { %v2833_v5 = vand.u32 2147483648, %v7515_v58  ;;  %v3646_v57 = vadd.f32 %v3515_v55, %v837_v32  ;;  %v3960_v46 = vadd.f32 %v3897_v3, %v3834_v29  ;;  %v3377_v27 = vmul.f32 %v4970_v44, %v1878_v15  ;;  %v4971_v29 = vld [vmem:[%s5123_s26 + $0x1b8] sm:$0xff]  ;;  %v4972_v32 = vld [vmem:[%s5123_s26 + $0xe8] sm:$0xff] }
 0x26e   : > { %v7746_v10 = vpop.eup %4641  ;;  %v2830_v60 = vsel %vm7733_vm14, %v7554_v1, %v2826_v41  ;;  %vm2832_vm15 = vcmp.eq.f32.partialorder %v2831_v61, 8.507059e+37  ;;  %v488_v58 = vadd.f32 %v487_v54, %v5337_v14  ;;  %v646_v25 = vadd.f32 %v7679_v20, %v5449_v13  ;;  %913 = vmatmul.f32.gmra.mxu2 %v4971_v29 }
 0x26f   : > { %v4644_v22 = vpop.eup %4643  ;;  %v7754_v48 = vmul.f32 %v7746_v10, %v7699_v62  ;;  %v2834_v38 = vor.u32 1.1754944e-38, %v2833_v5  ;;  %4647 = vtanh.f32 %v3646_v57  ;;  %4023 = vst [vmem:[%s5881_s17 + $0xe0] sm:$0xff] %v3960_v46  ;;  %3562 = vmatmul.f32.gmra.mxu3 %v3377_v27  ;;  %v1882_v1 = vsub.f32 1.0, %v7621_v43  ;;  %v7795_v5 = vpop.f32.mrf.mxu1  ;;  %722 = vmatmul.f32.gmra.mxu1 %v7312_v0  ;;  %v4973_v46 = vld [vmem:[%s5123_s26 + $0x170] sm:$0xff] }
 0x270   : > { %v4646_v55 = vpop.eup %4645  ;;  %v7758_v11 = vadd.f32 1.0, %v4644_v22  ;;  %vm1885_vm0 = vweird.f32 %v7570_v50  ;;  %v4171_v17 = vmul.f32 -1.442695, %v488_v58  ;;  %v4218_v42 = vmul.f32 -1.442695, %v646_v25  ;;  %v490_v4 = vpop.f32.mrf.mxu0 }
 0x271   : > { %v2869_v39 = vsub.f32 1.0, %v7754_v48  ;;  %v7765_v40 = vadd.f32 1.0, %v4646_v55  ;;  %v2835_v26 = vsel %vm2832_vm15, %v2834_v38, %v2830_v60  ;;  %v1883_v20 = vmul.f32 %v7606_v2, %v1882_v1  ;;  %v3521_v15 = vpop.f32.mrf.mxu3 }
 0x272   : > { %4649 = vrcp.f32 %v7758_v11  ;;  %v3772_v36 = vsub.f32 1.0, %v2835_v26  ;;  %vm1886_vm1 = vweird.f32 %v7606_v2  ;;  %v1889_v43 = vand.u32 2147483647, %v7570_v50  ;;  %v7822_v29 = vpop.f32.mrf.mxu2 }
 0x273   : > { %4651 = vrcp.f32 %v7765_v40  ;;  %v1891_v30 = vand.u32 2147483648, %v7570_v50  ;;  %v1884_v59 = vadd.f32 %v7606_v2, %v1883_v20  ;;  %v840_v7 = vadd.f32 %v7705_v23, %v5568_v56  ;;  %vm1887_vm2 = vmor %vm1885_vm0, %vm1886_vm1 }
 0x274   : > { %v3835_v45 = vmul.f32 %v4972_v32, %v3772_v36  ;;  %4653 = vpow2.f32 %v4171_v17  ;;  %vm1890_vm3 = vcmp.eq.f32.partialorder %v1889_v43, 8.507059e+37  ;;  %v2840_v3 = vmul.f32 %v7617_v33, %v2839_v19  ;;  %v4974_v36 = vld [vmem:[%s5123_s26 + $0x1c0] sm:$0xff] }
 0x275   : > { %v4648_v24 = vpop.eup %4647  ;;  %4655 = vpow2.f32 %v4218_v42  ;;  %v1892_v54 = vor.u32 1.1754944e-38, %v1891_v30  ;;  %v1888_v37 = vsel %vm1887_vm2, %v7606_v2, %v1884_v59  ;;  %vm2842_vm4 = vweird.f32 %v7578_v9 }
 0x276   : > { %v3898_v41 = vmul.f32 %v4648_v24, %v2835_v26  ;;  %vm2843_vm5 = vweird.f32 %v7617_v33  ;;  %v2841_v61 = vadd.f32 %v7617_v33, %v2840_v3  ;;  %v2846_v12 = vand.u32 2147483647, %v7578_v9  ;;  %916 = vmatmul.f32.gmra.mxu2 %v4974_v36 }
 0x277   : > { %v1893_v23 = vsel %vm1890_vm3, %v1892_v54, %v1888_v37  ;;  %vm7789_vm6 = vmor %vm2842_vm4, %vm2843_vm5  ;;  %v2848_v19 = vand.u32 2147483648, %v7578_v9  ;;  %v3647_v27 = vadd.f32 %v3518_v34, %v840_v7  ;;  %v491_v60 = vadd.f32 %v490_v4, %v5337_v14 }
 0x278   : > { %v7798_v2 = vpop.eup %4649  ;;  %v3961_v57 = vadd.f32 %v3898_v41, %v3835_v45  ;;  %v3378_v44 = vmul.f32 %v4973_v46, %v1893_v23  ;;  %v2845_v9 = vsel %vm7789_vm6, %v7617_v33, %v2841_v61  ;;  %vm2847_vm7 = vcmp.eq.f32.partialorder %v2846_v12, 8.507059e+37  ;;  %v493_v3 = vpop.f32.mrf.mxu0 }
 0x279   : > { %v7802_v22 = vpop.eup %4651  ;;  %v7806_v38 = vmul.f32 %v7798_v2, %v7758_v11  ;;  %v2849_v0 = vor.u32 1.1754944e-38, %v2848_v19  ;;  %4657 = vtanh.f32 %v3647_v27  ;;  %v4172_v34 = vmul.f32 -1.442695, %v491_v60  ;;  %v4976_v27 = vld [vmem:[%s5123_s26 + $0x178] sm:$0xff] }
 0x27a   : > { %v4654_v58 = vpop.eup %4653  ;;  %v7813_v55 = vmul.f32 %v7802_v22, %v7765_v40  ;;  %4024 = vst [vmem:[%s5881_s17 + $0xe8] sm:$0xff] %v3961_v57  ;;  %3565 = vmatmul.f32.gmra.mxu3 %v3378_v44  ;;  %v649_v25 = vadd.f32 %v7738_v51, %v5449_v13  ;;  %v1897_v17 = vsub.f32 1.0, %v7664_v6  ;;  %vm1900_vm8 = vweird.f32 %v7608_v21  ;;  %v4975_v6 = vld [vmem:[%s5123_s26 + $0xf0] sm:$0xff]  ;;  %v7885_v36 = vpop.f32.mrf.mxu2 }
 0x27b   : > { %v4656_v1 = vpop.eup %4655  ;;  %v7818_v26 = vadd.f32 1.0, %v4654_v58  ;;  %v2850_v33 = vsel %vm2847_vm7, %v2849_v0, %v2845_v9  ;;  %4659 = vpow2.f32 %v4172_v34  ;;  %vm1901_vm9 = vweird.f32 %v7656_v63  ;;  %v7864_v0 = vpop.f32.mrf.mxu1  ;;  %725 = vmatmul.f32.gmra.mxu1 %v7381_v28 }
 0x27c   : > { %v2884_v42 = vsub.f32 1.0, %v7813_v55  ;;  %v7826_v20 = vadd.f32 1.0, %v4656_v1  ;;  %v3773_v43 = vsub.f32 1.0, %v2850_v33  ;;  %v4219_v51 = vmul.f32 -1.442695, %v649_v25  ;;  %vm1902_vm10 = vmor %vm1900_vm8, %vm1901_vm9 }
 0x27d   : > { %4661 = vrcp.f32 %v7818_v26  ;;  %v1898_v30 = vmul.f32 %v7656_v63, %v1897_v17  ;;  %v1904_v45 = vand.u32 2147483647, %v7608_v21  ;;  %v1906_v59 = vand.u32 2147483648, %v7608_v21  ;;  %v7852_v21 = vpop.f32.mrf.mxu3 }
 0x27e   : > { %4663 = vrcp.f32 %v7826_v20  ;;  %v3836_v32 = vmul.f32 %v4975_v6, %v3773_v43  ;;  %v843_v24 = vadd.f32 %v7767_v47, %v5568_v56  ;;  %v2855_v54 = vmul.f32 %v7682_v35, %v2854_v53  ;;  %v4977_v43 = vld [vmem:[%s5123_s26 + $0x1c8] sm:$0xff] }
 0x27f   : > { %4665 = vpow2.f32 %v4219_v51  ;;  %v1899_v7 = vadd.f32 %v7656_v63, %v1898_v30  ;;  %v4658_v4 = vpop.eup %4657  ;;  %vm1905_vm11 = vcmp.eq.f32.partialorder %v1904_v45, 8.507059e+37  ;;  %v1907_v41 = vor.u32 1.1754944e-38, %v1906_v59  ;;  %919 = vmatmul.f32.gmra.mxu2 %v4977_v43 }
 0x280   : > { %vm2857_vm12 = vweird.f32 %v7631_v31  ;;  %vm2858_vm13 = vweird.f32 %v7682_v35  ;;  %v3899_v37 = vmul.f32 %v4658_v4, %v2850_v33  ;;  %v2856_v47 = vadd.f32 %v7682_v35, %v2855_v54 }
 0x281   : > { %v1903_v23 = vsel %vm1902_vm10, %v7656_v63, %v1899_v7  ;;  %vm7847_vm14 = vmor %vm2857_vm12, %vm2858_vm13  ;;  %v2861_v53 = vand.u32 2147483647, %v7631_v31  ;;  %v4660_v61 = vpop.eup %4659  ;;  %v2863_v12 = vand.u32 2147483648, %v7631_v31  ;;  %v3648_v19 = vadd.f32 %v3521_v15, %v843_v24 }
 0x282   : > { %v1908_v50 = vsel %vm1905_vm11, %v1907_v41, %v1903_v23  ;;  %v494_v57 = vadd.f32 %v493_v3, %v5337_v14  ;;  %v3962_v63 = vadd.f32 %v3899_v37, %v3836_v32  ;;  %v7858_v44 = vadd.f32 1.0, %v4660_v61 }
 0x283   : > { %v7856_v46 = vpop.eup %4661  ;;  %v3379_v60 = vmul.f32 %v4976_v27, %v1908_v50  ;;  %v2860_v9 = vsel %vm7847_vm14, %v7682_v35, %v2856_v47  ;;  %vm2862_vm15 = vcmp.eq.f32.partialorder %v2861_v53, 8.507059e+37  ;;  %v2864_v58 = vor.u32 1.1754944e-38, %v2863_v12  ;;  %v496_v47 = vpop.f32.mrf.mxu0 }
 0x284   : > { %v7867_v31 = vpop.eup %4663  ;;  %v7871_v15 = vmul.f32 %v7856_v46, %v7818_v26  ;;  %4667 = vtanh.f32 %v3648_v19  ;;  %4025 = vst [vmem:[%s5881_s17 + $0xf0] sm:$0xff] %v3962_v63  ;;  %v4173_v28 = vmul.f32 -1.442695, %v494_v57  ;;  %v652_v35 = vadd.f32 %v7795_v5, %v5449_v13  ;;  %v7932_v63 = vpop.f32.mrf.mxu1  ;;  %728 = vmatmul.f32.gmra.mxu1 %v7461_v18 }
 0x285   : > { %v4666_v34 = vpop.eup %4665  ;;  %v7875_v25 = vmul.f32 %v7867_v31, %v7826_v20  ;;  %4669 = vrcp.f32 %v7858_v44  ;;  %3568 = vmatmul.f32.gmra.mxu3 %v3379_v60  ;;  %v2865_v33 = vsel %vm2862_vm15, %v2864_v58, %v2860_v9  ;;  %v1912_v17 = vsub.f32 1.0, %v7743_v16  ;;  %v4978_v16 = vld [vmem:[%s5123_s26 + $0xf8] sm:$0xff]  ;;  %v7912_v52 = vpop.f32.mrf.mxu3 }
 0x286   : > { %v7881_v1 = vadd.f32 1.0, %v4666_v34  ;;  %vm1915_vm0 = vweird.f32 %v7684_v49  ;;  %v3774_v30 = vsub.f32 1.0, %v2865_v33  ;;  %4671 = vpow2.f32 %v4173_v28 }
 0x287   : > { %v2899_v51 = vsub.f32 1.0, %v7875_v25  ;;  %v4220_v6 = vmul.f32 -1.442695, %v652_v35  ;;  %v1913_v5 = vmul.f32 %v7727_v8, %v1912_v17  ;;  %vm1916_vm1 = vweird.f32 %v7727_v8 }
 0x288   : > { %4673 = vrcp.f32 %v7881_v1  ;;  %v1919_v32 = vand.u32 2147483647, %v7684_v49  ;;  %v3837_v45 = vmul.f32 %v4978_v16, %v3774_v30  ;;  %v1921_v59 = vand.u32 2147483648, %v7684_v49  ;;  %vm1917_vm4 = vmor %vm1915_vm0, %vm1916_vm1  ;;  %v4980_v16 = vld [vmem:[%s5123_s26 + $0x1d0] sm:$0xff] }
 0x289   : > { %4675 = vpow2.f32 %v4220_v6  ;;  %v846_v7 = vadd.f32 %v7822_v29, %v5568_v56  ;;  %v1914_v54 = vadd.f32 %v7727_v8, %v1913_v5  ;;  %v2870_v4 = vmul.f32 %v7746_v10, %v2869_v39 }
 0x28a   : > { %v4668_v24 = vpop.eup %4667  ;;  %vm7898_vm2 = vcmp.eq.f32.partialorder %v1919_v32, 8.507059e+37  ;;  %vm2872_vm3 = vweird.f32 %v7699_v62  ;;  %v1922_v29 = vor.u32 1.1754944e-38, %v1921_v59  ;;  %vm2873_vm5 = vweird.f32 %v7746_v10  ;;  %v7958_v32 = vpop.f32.mrf.mxu2  ;;  %922 = vmatmul.f32.gmra.mxu2 %v4980_v16 }
 0x28b   : > { %v7906_v41 = vpop.eup %4669  ;;  %v3900_v37 = vmul.f32 %v4668_v24, %v2865_v33  ;;  %v2876_v23 = vand.u32 2147483647, %v7699_v62  ;;  %v1918_v39 = vsel %vm1917_vm4, %v7727_v8, %v1914_v54  ;;  %v2871_v53 = vadd.f32 %v7746_v10, %v2870_v4  ;;  %vm7920_vm6 = vmor %vm2872_vm3, %vm2873_vm5 }
 0x28c   : > { %v7916_v48 = vmul.f32 %v7906_v41, %v7858_v44  ;;  %v2878_v61 = vand.u32 2147483648, %v7699_v62  ;;  %v4672_v50 = vpop.eup %4671  ;;  %v1923_v19 = vsel %vm7898_vm2, %v1922_v29, %v1918_v39  ;;  %v3649_v8 = vadd.f32 %v7852_v21, %v846_v7  ;;  %v4979_v62 = vld [vmem:[%s5123_s26 + $0x180] sm:$0xff] }
 0x28d   : > { %v3963_v12 = vadd.f32 %v3900_v37, %v3837_v45  ;;  %vm7927_vm7 = vcmp.eq.f32.partialorder %v2876_v23, 8.507059e+37  ;;  %v7937_v60 = vadd.f32 1.0, %v4672_v50  ;;  %v3380_v9 = vmul.f32 %v4979_v62, %v1923_v19  ;;  %v4981_v45 = vld [vmem:[%s5123_s26 + $0x100] sm:$0xff]  ;;  %v7976_v29 = vpop.f32.mrf.mxu3  ;;  %v4982_v19 = vld [vmem:[%s5123_s26 + $0x188] sm:$0xff] }
 0x28e   : > { %v7935_v27 = vpop.eup %4673  ;;  %v2875_v58 = vsel %vm7920_vm6, %v7746_v10, %v2871_v53  ;;  %v2879_v34 = vor.u32 1.1754944e-38, %v2878_v61  ;;  %4677 = vtanh.f32 %v3649_v8  ;;  %v497_v18 = vadd.f32 %v496_v47, %v5337_v14 }
 0x28f   : > { %v4676_v28 = vpop.eup %4675  ;;  %v7945_v21 = vmul.f32 %v7935_v27, %v7881_v1  ;;  %4026 = vst [vmem:[%s5881_s17 + $0xf8] sm:$0xff] %v3963_v12  ;;  %v655_v35 = vadd.f32 %v7864_v0, %v5449_v13  ;;  %4679 = vrcp.f32 %v7937_v60  ;;  %3571 = vmatmul.f32.gmra.mxu3 %v3380_v9  ;;  %v1927_v17 = vsub.f32 1.0, %v7806_v38 }
 0x290   : > { %v7952_v33 = vadd.f32 1.0, %v4676_v28  ;;  %v2880_v10 = vsel %vm7927_vm7, %v2879_v34, %v2875_v58  ;;  %v4174_v6 = vmul.f32 -1.442695, %v497_v18  ;;  %vm1930_vm8 = vweird.f32 %v7758_v11 }
 0x291   : > { %v2914_v43 = vsub.f32 1.0, %v7945_v21  ;;  %v3775_v30 = vsub.f32 1.0, %v2880_v10  ;;  %v4221_v5 = vmul.f32 -1.442695, %v655_v35  ;;  %v1928_v0 = vmul.f32 %v7798_v2, %v1927_v17 }
 0x292   : > { %4681 = vrcp.f32 %v7952_v33  ;;  %vm1931_vm9 = vweird.f32 %v7798_v2  ;;  %v1934_v38 = vand.u32 2147483647, %v7758_v11  ;;  %v1936_v7 = vand.u32 2147483648, %v7758_v11  ;;  %v499_v11 = vpop.f32.mrf.mxu0 }
 0x293   : > { %v3838_v59 = vmul.f32 %v4981_v45, %v3775_v30  ;;  %4683 = vpow2.f32 %v4174_v6  ;;  %v1929_v24 = vadd.f32 %v7798_v2, %v1928_v0  ;;  %v849_v54 = vadd.f32 %v7885_v36, %v5568_v56  ;;  %vm1932_vm10 = vmor %vm1930_vm8, %vm1931_vm9  ;;  %v660_v30 = vpop.f32.mrf.mxu1  ;;  %v8014_v6 = vpop.f32.mrf.mxu2 }
 0x294   : > { %4685 = vpow2.f32 %v4221_v5  ;;  %v2885_v3 = vmul.f32 %v7802_v22, %v2884_v42  ;;  %v4678_v4 = vpop.eup %4677  ;;  %vm1935_vm11 = vcmp.eq.f32.partialorder %v1934_v38, 8.507059e+37  ;;  %v1937_v37 = vor.u32 1.1754944e-38, %v1936_v7  ;;  %v4983_v5 = vld [vmem:[%s5123_s26 + $0x1d8] sm:$0xff] }
 0x295   : > { %vm2887_vm12 = vweird.f32 %v7765_v40  ;;  %vm2888_vm13 = vweird.f32 %v7802_v22  ;;  %v7978_v23 = vpop.eup %4679  ;;  %v3901_v47 = vmul.f32 %v4678_v4, %v2880_v10  ;;  %v1933_v36 = vsel %vm1932_vm10, %v7798_v2, %v1929_v24  ;;  %925 = vmatmul.f32.gmra.mxu2 %v4983_v5 }
 0x296   : > { %v2886_v55 = vadd.f32 %v7802_v22, %v2885_v3  ;;  %vm7982_vm14 = vmor %vm2887_vm12, %vm2888_vm13  ;;  %v2891_v39 = vand.u32 2147483647, %v7765_v40  ;;  %v7989_v53 = vmul.f32 %v7978_v23, %v7937_v60  ;;  %v1938_v49 = vsel %vm1935_vm11, %v1937_v37, %v1933_v36 }
 0x297   : > { %v2893_v61 = vand.u32 2147483648, %v7765_v40  ;;  %v3650_v50 = vadd.f32 %v7912_v52, %v849_v54  ;;  %v3964_v2 = vadd.f32 %v3901_v47, %v3838_v59  ;;  %v3381_v57 = vmul.f32 %v4982_v19, %v1938_v49  ;;  %v4984_v59 = vld [vmem:[%s5123_s26 + $0x108] sm:$0xff] }
 0x298   : > { %v7993_v12 = vpop.eup %4681  ;;  %v2890_v8 = vsel %vm7982_vm14, %v7802_v22, %v2886_v55  ;;  %vm2892_vm15 = vcmp.eq.f32.partialorder %v2891_v39, 8.507059e+37  ;;  %v500_v40 = vadd.f32 %v499_v11, %v5337_v14  ;;  %v658_v28 = vadd.f32 %v7932_v63, %v5449_v13  ;;  %v8032_v11 = vpop.f32.mrf.mxu3 }
 0x299   : > { %v4684_v62 = vpop.eup %4683  ;;  %v8001_v9 = vmul.f32 %v7993_v12, %v7952_v33  ;;  %v2894_v58 = vor.u32 1.1754944e-38, %v2893_v61  ;;  %4687 = vtanh.f32 %v3650_v50  ;;  %4027 = vst [vmem:[%s5881_s17 + $0x100] sm:$0xff] %v3964_v2  ;;  %3574 = vmatmul.f32.gmra.mxu3 %v3381_v57  ;;  %v1942_v22 = vsub.f32 1.0, %v7871_v15 }
 0x29a   : > { %v4686_v52 = vpop.eup %4685  ;;  %v8005_v34 = vadd.f32 1.0, %v4684_v62  ;;  %vm1945_vm0 = vweird.f32 %v7818_v26  ;;  %v4175_v17 = vmul.f32 -1.442695, %v500_v40  ;;  %v4222_v63 = vmul.f32 -1.442695, %v658_v28  ;;  %v502_v37 = vpop.f32.mrf.mxu0 }
 0x29b   : > { %v2929_v18 = vsub.f32 1.0, %v8001_v9  ;;  %v8012_v35 = vadd.f32 1.0, %v4686_v52  ;;  %v2895_v10 = vsel %vm2892_vm15, %v2894_v58, %v2890_v8  ;;  %v1943_v15 = vmul.f32 %v7856_v46, %v1942_v22  ;;  %v663_v22 = vpop.f32.mrf.mxu1 }
 0x29c   : > { %4689 = vrcp.f32 %v8005_v34  ;;  %v3776_v16 = vsub.f32 1.0, %v2895_v10  ;;  %vm1946_vm1 = vweird.f32 %v7856_v46  ;;  %v1949_v0 = vand.u32 2147483647, %v7818_v26 }
 0x29d   : > { %4691 = vrcp.f32 %v8012_v35  ;;  %v1951_v45 = vand.u32 2147483648, %v7818_v26  ;;  %v1944_v7 = vadd.f32 %v7856_v46, %v1943_v15  ;;  %v852_v24 = vadd.f32 %v7958_v32, %v5568_v56  ;;  %vm1947_vm2 = vmor %vm1945_vm0, %vm1946_vm1 }
 0x29e   : > { %v3839_v38 = vmul.f32 %v4984_v59, %v3776_v16  ;;  %4693 = vpow2.f32 %v4175_v17  ;;  %vm1950_vm3 = vcmp.eq.f32.partialorder %v1949_v0, 8.507059e+37  ;;  %v2900_v4 = vmul.f32 %v7867_v31, %v2899_v51  ;;  %v4986_v17 = vld [vmem:[%s5123_s26 + $0x1e0] sm:$0xff] }
 0x29f   : > { %v4688_v54 = vpop.eup %4687  ;;  %4695 = vpow2.f32 %v4222_v63  ;;  %v1952_v3 = vor.u32 1.1754944e-38, %v1951_v45  ;;  %v1948_v36 = vsel %vm1947_vm2, %v7856_v46, %v1944_v7  ;;  %vm2902_vm4 = vweird.f32 %v7826_v20  ;;  %v4985_v46 = vld [vmem:[%s5123_s26 + $0x190] sm:$0xff] }
 0x2a0   : > { %v3902_v47 = vmul.f32 %v4688_v54, %v2895_v10  ;;  %vm2903_vm5 = vweird.f32 %v7867_v31  ;;  %v2901_v26 = vadd.f32 %v7867_v31, %v2900_v4  ;;  %v2906_v25 = vand.u32 2147483647, %v7826_v20  ;;  %v8068_v10 = vpop.f32.mrf.mxu2  ;;  %928 = vmatmul.f32.gmra.mxu2 %v4986_v17  ;;  %v4989_v17 = vld [vmem:[%s5123_s26 + $0x1e8] sm:$0xff] }
 0x2a1   : > { %v1953_v32 = vsel %vm1950_vm3, %v1952_v3, %v1948_v36  ;;  %vm8038_vm6 = vmor %vm2902_vm4, %vm2903_vm5  ;;  %v2908_v51 = vand.u32 2147483648, %v7826_v20  ;;  %v3651_v61 = vadd.f32 %v7976_v29, %v852_v24  ;;  %v503_v50 = vadd.f32 %v502_v37, %v5337_v14  ;;  %v8087_v3 = vpop.f32.mrf.mxu3 }
 0x2a2   : > { %v8044_v42 = vpop.eup %4689  ;;  %v3965_v39 = vadd.f32 %v3902_v47, %v3839_v38  ;;  %v3382_v49 = vmul.f32 %v4985_v46, %v1953_v32  ;;  %v2905_v57 = vsel %vm8038_vm6, %v7867_v31, %v2901_v26  ;;  %vm2907_vm7 = vcmp.eq.f32.partialorder %v2906_v25, 8.507059e+37  ;;  %v505_v54 = vpop.f32.mrf.mxu0  ;;  %v4988_v46 = vld [vmem:[%s5123_s26 + $0x198] sm:$0xff] }
 0x2a3   : > { %v8049_v2 = vpop.eup %4691  ;;  %v8053_v19 = vmul.f32 %v8044_v42, %v8005_v34  ;;  %v2909_v20 = vor.u32 1.1754944e-38, %v2908_v51  ;;  %4697 = vtanh.f32 %v3651_v61  ;;  %v4176_v29 = vmul.f32 -1.442695, %v503_v50 }
 0x2a4   : > { %v4694_v8 = vpop.eup %4693  ;;  %v8060_v62 = vmul.f32 %v8049_v2, %v8012_v35  ;;  %4028 = vst [vmem:[%s5881_s17 + $0x108] sm:$0xff] %v3965_v39  ;;  %3577 = vmatmul.f32.gmra.mxu3 %v3382_v49  ;;  %v661_v58 = vadd.f32 %v660_v30, %v5449_v13  ;;  %v1957_v31 = vsub.f32 1.0, %v7916_v48  ;;  %vm1960_vm8 = vweird.f32 %v7858_v44  ;;  %v4987_v48 = vld [vmem:[%s5123_s26 + $0x110] sm:$0xff] }
 0x2a5   : > { %v4696_v40 = vpop.eup %4695  ;;  %v8064_v52 = vadd.f32 1.0, %v4694_v8  ;;  %v2910_v28 = vsel %vm2907_vm7, %v2909_v20, %v2905_v57  ;;  %4699 = vpow2.f32 %v4176_v29  ;;  %vm1961_vm9 = vweird.f32 %v7906_v41  ;;  %v666_v29 = vpop.f32.mrf.mxu1 }
 0x2a6   : > { %v2944_v5 = vsub.f32 1.0, %v8060_v62  ;;  %v8072_v16 = vadd.f32 1.0, %v4696_v40  ;;  %v3777_v63 = vsub.f32 1.0, %v2910_v28  ;;  %v4223_v30 = vmul.f32 -1.442695, %v661_v58  ;;  %vm1962_vm10 = vmor %vm1960_vm8, %vm1961_vm9 }
 0x2a7   : > { %4701 = vrcp.f32 %v8064_v52  ;;  %v1958_v15 = vmul.f32 %v7906_v41, %v1957_v31  ;;  %v1964_v45 = vand.u32 2147483647, %v7858_v44  ;;  %v1966_v59 = vand.u32 2147483648, %v7858_v44 }
 0x2a8   : > { %4703 = vrcp.f32 %v8072_v16  ;;  %v3840_v0 = vmul.f32 %v4987_v48, %v3777_v63  ;;  %v855_v7 = vadd.f32 %v8014_v6, %v5568_v56  ;;  %v2915_v24 = vmul.f32 %v7935_v27, %v2914_v43  ;;  %v8128_v31 = vpop.f32.mrf.mxu2  ;;  %931 = vmatmul.f32.gmra.mxu2 %v4989_v17 }
 0x2a9   : > { %4705 = vpow2.f32 %v4223_v30  ;;  %v1959_v38 = vadd.f32 %v7906_v41, %v1958_v15  ;;  %v4698_v4 = vpop.eup %4697  ;;  %vm1965_vm11 = vcmp.eq.f32.partialorder %v1964_v45, 8.507059e+37  ;;  %v1967_v37 = vor.u32 1.1754944e-38, %v1966_v59 }
 0x2aa   : > { %vm2917_vm12 = vweird.f32 %v7881_v1  ;;  %vm2918_vm13 = vweird.f32 %v7935_v27  ;;  %v3903_v47 = vmul.f32 %v4698_v4, %v2910_v28  ;;  %v2916_v21 = vadd.f32 %v7935_v27, %v2915_v24 }
 0x2ab   : > { %v1963_v6 = vsel %vm1962_vm10, %v7906_v41, %v1959_v38  ;;  %vm8095_vm14 = vmor %vm2917_vm12, %vm2918_vm13  ;;  %v2921_v36 = vand.u32 2147483647, %v7881_v1  ;;  %v4700_v44 = vpop.eup %4699  ;;  %v2923_v26 = vand.u32 2147483648, %v7881_v1  ;;  %v3652_v55 = vadd.f32 %v8032_v11, %v855_v7  ;;  %v8140_v38 = vpop.f32.mrf.mxu3 }
 0x2ac   : > { %v1968_v32 = vsel %vm1965_vm11, %v1967_v37, %v1963_v6  ;;  %v506_v25 = vadd.f32 %v505_v54, %v5337_v14  ;;  %v3966_v41 = vadd.f32 %v3903_v47, %v3840_v0  ;;  %v8105_v39 = vadd.f32 1.0, %v4700_v44 }
 0x2ad   : > { %v8103_v51 = vpop.eup %4701  ;;  %v3383_v49 = vmul.f32 %v4988_v46, %v1968_v32  ;;  %v2920_v61 = vsel %vm8095_vm14, %v7935_v27, %v2916_v21  ;;  %vm2922_vm15 = vcmp.eq.f32.partialorder %v2921_v36, 8.507059e+37  ;;  %v2924_v11 = vor.u32 1.1754944e-38, %v2923_v26  ;;  %v508_v21 = vpop.f32.mrf.mxu0  ;;  %v4991_v46 = vld [vmem:[%s5123_s26 + $0x1a0] sm:$0xff] }
 0x2ae   : > { %v8111_v50 = vpop.eup %4703  ;;  %v8115_v1 = vmul.f32 %v8103_v51, %v8064_v52  ;;  %4707 = vtanh.f32 %v3652_v55  ;;  %4029 = vst [vmem:[%s5881_s17 + $0x110] sm:$0xff] %v3966_v41  ;;  %v4177_v27 = vmul.f32 -1.442695, %v506_v25  ;;  %v664_v8 = vadd.f32 %v663_v22, %v5449_v13 }
 0x2af   : > { %v4706_v57 = vpop.eup %4705  ;;  %v8119_v20 = vmul.f32 %v8111_v50, %v8072_v16  ;;  %4709 = vrcp.f32 %v8105_v39  ;;  %3580 = vmatmul.f32.gmra.mxu3 %v3383_v49  ;;  %v2925_v40 = vsel %vm2922_vm15, %v2924_v11, %v2920_v61  ;;  %v1972_v28 = vsub.f32 1.0, %v7989_v53  ;;  %v4990_v53 = vld [vmem:[%s5123_s26 + $0x118] sm:$0xff] }
 0x2b0   : > { %v8124_v58 = vadd.f32 1.0, %v4706_v57  ;;  %vm1975_vm0 = vweird.f32 %v7937_v60  ;;  %v3778_v30 = vsub.f32 1.0, %v2925_v40  ;;  %4711 = vpow2.f32 %v4177_v27 }
 0x2b1   : > { %v2959_v63 = vsub.f32 1.0, %v8119_v20  ;;  %v4224_v15 = vmul.f32 -1.442695, %v664_v8  ;;  %v1973_v22 = vmul.f32 %v7978_v23, %v1972_v28  ;;  %vm1976_vm1 = vweird.f32 %v7978_v23  ;;  %v669_v8 = vpop.f32.mrf.mxu1 }
 0x2b2   : > { %4713 = vrcp.f32 %v8124_v58  ;;  %v1979_v48 = vand.u32 2147483647, %v7937_v60  ;;  %v3841_v0 = vmul.f32 %v4990_v53, %v3778_v30  ;;  %v1981_v45 = vand.u32 2147483648, %v7937_v60  ;;  %vm1977_vm4 = vmor %vm1975_vm0, %vm1976_vm1 }
 0x2b3   : > { %4715 = vpow2.f32 %v4224_v15  ;;  %v858_v59 = vadd.f32 %v8068_v10, %v5568_v56  ;;  %v1974_v24 = vadd.f32 %v7978_v23, %v1973_v22  ;;  %v2930_v4 = vmul.f32 %v7993_v12, %v2929_v18 }
 0x2b4   : > { %v4708_v7 = vpop.eup %4707  ;;  %vm8143_vm2 = vcmp.eq.f32.partialorder %v1979_v48, 8.507059e+37  ;;  %vm2932_vm3 = vweird.f32 %v7952_v33  ;;  %v1982_v10 = vor.u32 1.1754944e-38, %v1981_v45  ;;  %vm2933_vm5 = vweird.f32 %v7993_v12  ;;  %v8199_v48 = vpop.f32.mrf.mxu2 }
 0x2b5   : > { %v8151_v37 = vpop.eup %4709  ;;  %v3904_v47 = vmul.f32 %v4708_v7, %v2925_v40  ;;  %v2936_v6 = vand.u32 2147483647, %v7952_v33  ;;  %v1978_v18 = vsel %vm1977_vm4, %v7978_v23, %v1974_v24  ;;  %v2931_v43 = vadd.f32 %v7993_v12, %v2930_v4  ;;  %vm8165_vm6 = vmor %vm2932_vm3, %vm2933_vm5  ;;  %v8212_v7 = vpop.f32.mrf.mxu3 }
 0x2b6   : > { %v8161_v9 = vmul.f32 %v8151_v37, %v8105_v39  ;;  %v2938_v60 = vand.u32 2147483648, %v7952_v33  ;;  %v4712_v44 = vpop.eup %4711  ;;  %v1983_v26 = vsel %vm8143_vm2, %v1982_v10, %v1978_v18  ;;  %v3653_v23 = vadd.f32 %v8087_v3, %v858_v59 }
 0x2b7   : > { %v3967_v32 = vadd.f32 %v3904_v47, %v3841_v0  ;;  %vm8172_vm7 = vcmp.eq.f32.partialorder %v2936_v6, 8.507059e+37  ;;  %v8179_v41 = vadd.f32 1.0, %v4712_v44  ;;  %v3384_v49 = vmul.f32 %v4991_v46, %v1983_v26  ;;  %v4994_v26 = vld [vmem:[%s5123_s26 + $0x1a8] sm:$0xff] }
 0x2b8   : > { %v8177_v25 = vpop.eup %4713  ;;  %v2935_v33 = vsel %vm8165_vm6, %v7993_v12, %v2931_v43  ;;  %v2939_v61 = vor.u32 1.1754944e-38, %v2938_v60  ;;  %4717 = vtanh.f32 %v3653_v23  ;;  %v509_v3 = vadd.f32 %v508_v21, %v5337_v14 }
 0x2b9   : > { %v4716_v11 = vpop.eup %4715  ;;  %v8187_v57 = vmul.f32 %v8177_v25, %v8124_v58  ;;  %4030 = vst [vmem:[%s5881_s17 + $0x118] sm:$0xff] %v3967_v32  ;;  %v667_v27 = vadd.f32 %v666_v29, %v5449_v13  ;;  %4719 = vrcp.f32 %v8179_v41  ;;  %3583 = vmatmul.f32.gmra.mxu3 %v3384_v49  ;;  %v1987_v28 = vsub.f32 1.0, %v8053_v19  ;;  %v8202_v29 = vld [vmem:[%s5123_s26 + $0x1f0] sm:$0xff]  ;;  %v4993_v19 = vld [vmem:[%s5123_s26 + $0x120] sm:$0xff] }
 0x2ba   : > { %v8193_v40 = vadd.f32 1.0, %v4716_v11  ;;  %v2940_v12 = vsel %vm8172_vm7, %v2939_v61, %v2935_v33  ;;  %v4178_v15 = vmul.f32 -1.442695, %v509_v3  ;;  %934 = vmatmul.f32.gmra.mxu2 %v8202_v29  ;;  %vm1990_vm8 = vweird.f32 %v8005_v34  ;;  %v672_v61 = vpop.f32.mrf.mxu1 }
 0x2bb   : > { %v2974_v17 = vsub.f32 1.0, %v8187_v57  ;;  %v3779_v30 = vsub.f32 1.0, %v2940_v12  ;;  %v4225_v22 = vmul.f32 -1.442695, %v667_v27  ;;  %v1988_v53 = vmul.f32 %v8044_v42, %v1987_v28 }
 0x2bc   : > { %4721 = vrcp.f32 %v8193_v40  ;;  %vm1991_vm9 = vweird.f32 %v8044_v42  ;;  %v1994_v45 = vand.u32 2147483647, %v8005_v34  ;;  %v1996_v59 = vand.u32 2147483648, %v8005_v34  ;;  %v511_v34 = vpop.f32.mrf.mxu0 }
 0x2bd   : > { %v3842_v0 = vmul.f32 %v4993_v19, %v3779_v30  ;;  %4723 = vpow2.f32 %v4178_v15  ;;  %v1989_v24 = vadd.f32 %v8044_v42, %v1988_v53  ;;  %v861_v54 = vadd.f32 %v8128_v31, %v5568_v56  ;;  %vm1992_vm10 = vmor %vm1990_vm8, %vm1991_vm9 }
 0x2be   : > { %4725 = vpow2.f32 %v4225_v22  ;;  %v2945_v4 = vmul.f32 %v8049_v2, %v2944_v5  ;;  %v4718_v47 = vpop.eup %4717  ;;  %vm1995_vm11 = vcmp.eq.f32.partialorder %v1994_v45, 8.507059e+37  ;;  %v1997_v10 = vor.u32 1.1754944e-38, %v1996_v59  ;;  %v8271_v45 = vpop.f32.mrf.mxu3  ;;  %v4995_v59 = vld [vmem:[%s5123_s26 + $0x128] sm:$0xff] }
 0x2bf   : > { %vm2947_vm12 = vweird.f32 %v8012_v35  ;;  %vm2948_vm13 = vweird.f32 %v8049_v2  ;;  %v8222_v6 = vpop.eup %4719  ;;  %v3905_v21 = vmul.f32 %v4718_v47, %v2940_v12  ;;  %v1993_v18 = vsel %vm1992_vm10, %v8044_v42, %v1989_v24 }
 0x2c0   : > { %v2946_v31 = vadd.f32 %v8049_v2, %v2945_v4  ;;  %vm8226_vm14 = vmor %vm2947_vm12, %vm2948_vm13  ;;  %v2951_v5 = vand.u32 2147483647, %v8012_v35  ;;  %v8233_v43 = vmul.f32 %v8222_v6, %v8179_v41  ;;  %v1998_v36 = vsel %vm1995_vm11, %v1997_v10, %v1993_v18 }
 0x2c1   : > { %v2953_v60 = vand.u32 2147483648, %v8012_v35  ;;  %v3654_v44 = vadd.f32 %v8140_v38, %v861_v54  ;;  %v3968_v42 = vadd.f32 %v3905_v21, %v3842_v0  ;;  %v3385_v55 = vmul.f32 %v4994_v26, %v1998_v36  ;;  %v8269_v0 = vpop.f32.mrf.mxu2 }
 0x2c2   : > { %v8237_v32 = vpop.eup %4721  ;;  %v2950_v23 = vsel %vm8226_vm14, %v8049_v2, %v2946_v31  ;;  %vm8243_vm15 = vcmp.eq.f32.partialorder %v2951_v5, 8.507059e+37  ;;  %v512_v38 = vadd.f32 %v511_v34, %v5337_v14  ;;  %v670_v2 = vadd.f32 %v669_v8, %v5449_v13  ;;  %v8306_v46 = vpop.f32.mrf.mxu1 }
 0x2c3   : > { %v4724_v49 = vpop.eup %4723  ;;  %v8249_v33 = vmul.f32 %v8237_v32, %v8193_v40  ;;  %v2954_v35 = vor.u32 1.1754944e-38, %v2953_v60  ;;  %4727 = vtanh.f32 %v3654_v44  ;;  %4031 = vst [vmem:[%s5881_s17 + $0x120] sm:$0xff] %v3968_v42  ;;  %3586 = vmatmul.f32.gmra.mxu3 %v3385_v55  ;;  %v2002_v27 = vsub.f32 1.0, %v8115_v1 }
 0x2c4   : > { %v4726_v11 = vpop.eup %4725  ;;  %v8253_v3 = vadd.f32 1.0, %v4724_v49  ;;  %vm2005_vm0 = vweird.f32 %v8064_v52  ;;  %v4179_v15 = vmul.f32 -1.442695, %v512_v38  ;;  %v4226_v53 = vmul.f32 -1.442695, %v670_v2  ;;  %v514_v21 = vpop.f32.mrf.mxu0 }
 0x2c5   : > { %v2989_v12 = vsub.f32 1.0, %v8249_v33  ;;  %v8259_v28 = vadd.f32 1.0, %v4726_v11  ;;  %v2955_v30 = vsel %vm8243_vm15, %v2954_v35, %v2950_v23  ;;  %v2003_v19 = vmul.f32 %v8103_v51, %v2002_v27 }
 0x2c6   : > { %4729 = vrcp.f32 %v8253_v3  ;;  %v3780_v22 = vsub.f32 1.0, %v2955_v30  ;;  %vm2006_vm1 = vweird.f32 %v8103_v51  ;;  %v2009_v1 = vand.u32 2147483647, %v8064_v52 }
 0x2c7   : > { %4731 = vrcp.f32 %v8259_v28  ;;  %v2011_v8 = vand.u32 2147483648, %v8064_v52  ;;  %v2004_v54 = vadd.f32 %v8103_v51, %v2003_v19  ;;  %v864_v4 = vadd.f32 %v8199_v48, %v5568_v56  ;;  %vm2007_vm2 = vmor %vm2005_vm0, %vm2006_vm1 }
 0x2c8   : > { %v3843_v24 = vmul.f32 %v4995_v59, %v3780_v22  ;;  %4733 = vpow2.f32 %v4179_v15  ;;  %vm2010_vm3 = vcmp.eq.f32.partialorder %v2009_v1, 8.507059e+37  ;;  %v2960_v34 = vmul.f32 %v8111_v50, %v2959_v63  ;;  %v8326_v1 = vpop.f32.mrf.mxu3 }
 0x2c9   : > { %v4728_v47 = vpop.eup %4727  ;;  %4735 = vpow2.f32 %v4226_v53  ;;  %v2012_v10 = vor.u32 1.1754944e-38, %v2011_v8  ;;  %v2008_v31 = vsel %vm2007_vm2, %v8103_v51, %v2004_v54  ;;  %vm2962_vm4 = vweird.f32 %v8072_v16  ;;  %v4996_v51 = vld [vmem:[%s5123_s26 + $0x1b0] sm:$0xff]  ;;  %v8324_v19 = vpop.f32.mrf.mxu2 }
 0x2ca   : > { %v3906_v18 = vmul.f32 %v4728_v47, %v2955_v30  ;;  %vm2963_vm5 = vweird.f32 %v8111_v50  ;;  %v2961_v62 = vadd.f32 %v8111_v50, %v2960_v34  ;;  %v2966_v5 = vand.u32 2147483647, %v8072_v16 }
 0x2cb   : > { %v2013_v48 = vsel %vm2010_vm3, %v2012_v10, %v2008_v31  ;;  %vm8286_vm6 = vmor %vm2962_vm4, %vm2963_vm5  ;;  %v2968_v20 = vand.u32 2147483648, %v8072_v16  ;;  %v3655_v44 = vadd.f32 %v8212_v7, %v864_v4  ;;  %v515_v42 = vadd.f32 %v514_v21, %v5337_v14 }
 0x2cc   : > { %v8292_v63 = vpop.eup %4729  ;;  %v3969_v36 = vadd.f32 %v3906_v18, %v3843_v24  ;;  %v3386_v60 = vmul.f32 %v4996_v51, %v2013_v48  ;;  %v2965_v23 = vsel %vm8286_vm6, %v8111_v50, %v2961_v62  ;;  %vm2967_vm7 = vcmp.eq.f32.partialorder %v2966_v5, 8.507059e+37  ;;  %v517_v10 = vpop.f32.mrf.mxu0  ;;  %v4998_v51 = vld [vmem:[%s5123_s26 + $0x1b8] sm:$0xff] }
 0x2cd   : > { %v8297_v26 = vpop.eup %4731  ;;  %v8301_v55 = vmul.f32 %v8292_v63, %v8253_v3  ;;  %v2969_v16 = vor.u32 1.1754944e-38, %v2968_v20  ;;  %4737 = vtanh.f32 %v3655_v44  ;;  %v4180_v35 = vmul.f32 -1.442695, %v515_v42  ;;  %v8360_v42 = vpop.f32.mrf.mxu1 }
 0x2ce   : > { %v4734_v49 = vpop.eup %4733  ;;  %v8310_v7 = vmul.f32 %v8297_v26, %v8259_v28  ;;  %4032 = vst [vmem:[%s5881_s17 + $0x128] sm:$0xff] %v3969_v36  ;;  %3589 = vmatmul.f32.gmra.mxu3 %v3386_v60  ;;  %v673_v38 = vadd.f32 %v672_v61, %v5449_v13  ;;  %v2017_v27 = vsub.f32 1.0, %v8161_v9  ;;  %vm2020_vm8 = vweird.f32 %v8105_v39  ;;  %v4997_v9 = vld [vmem:[%s5123_s26 + $0x130] sm:$0xff] }
 0x2cf   : > { %v4736_v11 = vpop.eup %4735  ;;  %v8314_v2 = vadd.f32 1.0, %v4734_v49  ;;  %v2970_v50 = vsel %vm2967_vm7, %v2969_v16, %v2965_v23  ;;  %4739 = vpow2.f32 %v4180_v35  ;;  %vm2021_vm9 = vweird.f32 %v8151_v37 }
 0x2d0   : > { %v3004_v30 = vsub.f32 1.0, %v8310_v7  ;;  %v8319_v15 = vadd.f32 1.0, %v4736_v11  ;;  %v3781_v22 = vsub.f32 1.0, %v2970_v50  ;;  %v4227_v53 = vmul.f32 -1.442695, %v673_v38  ;;  %vm2022_vm10 = vmor %vm2020_vm8, %vm2021_vm9 }
 0x2d1   : > { %4741 = vrcp.f32 %v8314_v2  ;;  %v2018_v61 = vmul.f32 %v8151_v37, %v2017_v27  ;;  %v2024_v59 = vand.u32 2147483647, %v8105_v39  ;;  %v2026_v24 = vand.u32 2147483648, %v8105_v39 }
 0x2d2   : > { %4743 = vrcp.f32 %v8319_v15  ;;  %v3844_v8 = vmul.f32 %v4997_v9, %v3781_v22  ;;  %v867_v4 = vadd.f32 %v8269_v0, %v5568_v56  ;;  %v2975_v47 = vmul.f32 %v8177_v25, %v2974_v17  ;;  %v8383_v9 = vpop.f32.mrf.mxu3 }
 0x2d3   : > { %4745 = vpow2.f32 %v4227_v53  ;;  %v2019_v54 = vadd.f32 %v8151_v37, %v2018_v61  ;;  %v4738_v34 = vpop.eup %4737  ;;  %vm2025_vm11 = vcmp.eq.f32.partialorder %v2024_v59, 8.507059e+37  ;;  %v2027_v21 = vor.u32 1.1754944e-38, %v2026_v24  ;;  %v8381_v61 = vpop.f32.mrf.mxu2 }
 0x2d4   : > { %vm2977_vm12 = vweird.f32 %v8124_v58  ;;  %vm2978_vm13 = vweird.f32 %v8177_v25  ;;  %v3907_v18 = vmul.f32 %v4738_v34, %v2970_v50  ;;  %v2976_v0 = vadd.f32 %v8177_v25, %v2975_v47 }
 0x2d5   : > { %v2023_v31 = vsel %vm2022_vm10, %v8151_v37, %v2019_v54  ;;  %vm8344_vm14 = vmor %vm2977_vm12, %vm2978_vm13  ;;  %v2981_v17 = vand.u32 2147483647, %v8124_v58  ;;  %v4740_v39 = vpop.eup %4739  ;;  %v2983_v62 = vand.u32 2147483648, %v8124_v58  ;;  %v3656_v52 = vadd.f32 %v8271_v45, %v867_v4 }
 0x2d6   : > { %v2028_v48 = vsel %vm2025_vm11, %v2027_v21, %v2023_v31  ;;  %v518_v5 = vadd.f32 %v517_v10, %v5337_v14  ;;  %v3970_v37 = vadd.f32 %v3907_v18, %v3844_v8  ;;  %v8354_v36 = vadd.f32 1.0, %v4740_v39 }
 0x2d7   : > { %v8352_v20 = vpop.eup %4741  ;;  %v3387_v60 = vmul.f32 %v4998_v51, %v2028_v48  ;;  %v2980_v44 = vsel %vm8344_vm14, %v8177_v25, %v2976_v0  ;;  %vm2982_vm15 = vcmp.eq.f32.partialorder %v2981_v17, 8.507059e+37  ;;  %v2984_v45 = vor.u32 1.1754944e-38, %v2983_v62  ;;  %v520_v17 = vpop.f32.mrf.mxu0 }
 0x2d8   : > { %v8362_v23 = vpop.eup %4743  ;;  %v8366_v58 = vmul.f32 %v8352_v20, %v8314_v2  ;;  %4747 = vtanh.f32 %v3656_v52  ;;  %4033 = vst [vmem:[%s5881_s17 + $0x130] sm:$0xff] %v3970_v37  ;;  %v4181_v25 = vmul.f32 -1.442695, %v518_v5  ;;  %v676_v35 = vadd.f32 %v8306_v46, %v5449_v13  ;;  %v8426_v5 = vpop.f32.mrf.mxu1  ;;  %v5002_v52 = vld [vmem:[%s5123_s26 + $0x1c8] sm:$0xff] }
 0x2d9   : > { %v4746_v16 = vpop.eup %4745  ;;  %v8370_v49 = vmul.f32 %v8362_v23, %v8319_v15  ;;  %4749 = vrcp.f32 %v8354_v36  ;;  %3592 = vmatmul.f32.gmra.mxu3 %v3387_v60  ;;  %v2985_v11 = vsel %vm2982_vm15, %v2984_v45, %v2980_v44  ;;  %v2032_v50 = vsub.f32 1.0, %v8233_v43  ;;  %v4999_v43 = vld [vmem:[%s5123_s26 + $0x138] sm:$0xff] }
 0x2da   : > { %v8376_v38 = vadd.f32 1.0, %v4746_v16  ;;  %vm2035_vm0 = vweird.f32 %v8179_v41  ;;  %v3782_v22 = vsub.f32 1.0, %v2985_v11  ;;  %4751 = vpow2.f32 %v4181_v25 }
 0x2db   : > { %v3019_v27 = vsub.f32 1.0, %v8370_v49  ;;  %v4228_v53 = vmul.f32 -1.442695, %v676_v35  ;;  %v2033_v46 = vmul.f32 %v8222_v6, %v2032_v50  ;;  %vm2036_vm1 = vweird.f32 %v8222_v6 }
 0x2dc   : > { %4753 = vrcp.f32 %v8376_v38  ;;  %v2039_v8 = vand.u32 2147483647, %v8179_v41  ;;  %v3845_v59 = vmul.f32 %v4999_v43, %v3782_v22  ;;  %v2041_v24 = vand.u32 2147483648, %v8179_v41  ;;  %vm2037_vm4 = vmor %vm2035_vm0, %vm2036_vm1  ;;  %v8451_v43 = vpop.f32.mrf.mxu2 }
 0x2dd   : > { %4755 = vpow2.f32 %v4228_v53  ;;  %v870_v54 = vadd.f32 %v8324_v19, %v5568_v56  ;;  %v2034_v47 = vadd.f32 %v8222_v6, %v2033_v46  ;;  %v2990_v34 = vmul.f32 %v8237_v32, %v2989_v12 }
 0x2de   : > { %v4748_v4 = vpop.eup %4747  ;;  %vm8394_vm2 = vcmp.eq.f32.partialorder %v2039_v8, 8.507059e+37  ;;  %vm2992_vm3 = vweird.f32 %v8193_v40  ;;  %v2042_v19 = vor.u32 1.1754944e-38, %v2041_v24  ;;  %vm2993_vm5 = vweird.f32 %v8237_v32  ;;  %v5001_v24 = vld [vmem:[%s5123_s26 + $0x140] sm:$0xff] }
 0x2df   : > { %v8402_v21 = vpop.eup %4749  ;;  %v3908_v18 = vmul.f32 %v4748_v4, %v2985_v11  ;;  %v2996_v31 = vand.u32 2147483647, %v8193_v40  ;;  %v2038_v33 = vsel %vm2037_vm4, %v8222_v6, %v2034_v47  ;;  %v2991_v12 = vadd.f32 %v8237_v32, %v2990_v34  ;;  %vm8414_vm6 = vmor %vm2992_vm3, %vm2993_vm5  ;;  %v523_v57 = vpop.f32.mrf.mxu0 }
 0x2e0   : > { %v8410_v0 = vmul.f32 %v8402_v21, %v8354_v36  ;;  %v2998_v41 = vand.u32 2147483648, %v8193_v40  ;;  %v4752_v39 = vpop.eup %4751  ;;  %v2043_v62 = vsel %vm8394_vm2, %v2042_v19, %v2038_v33  ;;  %v3657_v6 = vadd.f32 %v8326_v1, %v870_v54  ;;  %v5000_v40 = vld [vmem:[%s5123_s26 + $0x1c0] sm:$0xff] }
 0x2e1   : > { %v3971_v48 = vadd.f32 %v3908_v18, %v3845_v59  ;;  %vm8421_vm7 = vcmp.eq.f32.partialorder %v2996_v31, 8.507059e+37  ;;  %v8430_v51 = vadd.f32 1.0, %v4752_v39  ;;  %v3388_v60 = vmul.f32 %v5000_v40, %v2043_v62  ;;  %v8453_v59 = vpop.f32.mrf.mxu3 }
 0x2e2   : > { %v8428_v37 = vpop.eup %4753  ;;  %v2995_v44 = vsel %vm8414_vm6, %v8237_v32, %v2991_v12  ;;  %v2999_v45 = vor.u32 1.1754944e-38, %v2998_v41  ;;  %4757 = vtanh.f32 %v3657_v6  ;;  %v521_v1 = vadd.f32 %v520_v17, %v5337_v14 }
 0x2e3   : > { %v4756_v16 = vpop.eup %4755  ;;  %v8438_v25 = vmul.f32 %v8428_v37, %v8376_v38  ;;  %4034 = vst [vmem:[%s5881_s17 + $0x138] sm:$0xff] %v3971_v48  ;;  %v679_v35 = vadd.f32 %v8360_v42, %v5449_v13  ;;  %4759 = vrcp.f32 %v8430_v51  ;;  %3595 = vmatmul.f32.gmra.mxu3 %v3388_v60  ;;  %v2047_v50 = vsub.f32 1.0, %v8301_v55 }
 0x2e4   : > { %v8445_v11 = vadd.f32 1.0, %v4756_v16  ;;  %v3000_v32 = vsel %vm8421_vm7, %v2999_v45, %v2995_v44  ;;  %v4182_v46 = vmul.f32 -1.442695, %v521_v1  ;;  %vm2050_vm8 = vweird.f32 %v8253_v3  ;;  %v8502_v16 = vpop.f32.mrf.mxu2 }
 0x2e5   : > { %v3034_v22 = vsub.f32 1.0, %v8438_v25  ;;  %v3783_v53 = vsub.f32 1.0, %v3000_v32  ;;  %v4229_v8 = vmul.f32 -1.442695, %v679_v35  ;;  %v2048_v42 = vmul.f32 %v8292_v63, %v2047_v50 }
 0x2e6   : > { %4761 = vrcp.f32 %v8445_v11  ;;  %vm2051_vm9 = vweird.f32 %v8292_v63  ;;  %v2054_v55 = vand.u32 2147483647, %v8253_v3  ;;  %v2056_v4 = vand.u32 2147483648, %v8253_v3  ;;  %v8470_v3 = vpop.f32.mrf.mxu1 }
 0x2e7   : > { %v3846_v54 = vmul.f32 %v5001_v24, %v3783_v53  ;;  %4763 = vpow2.f32 %v4182_v46  ;;  %v2049_v47 = vadd.f32 %v8292_v63, %v2048_v42  ;;  %v873_v10 = vadd.f32 %v8381_v61, %v5568_v56  ;;  %vm2052_vm10 = vmor %vm2050_vm8, %vm2051_vm9 }
 0x2e8   : > { %4765 = vpow2.f32 %v4229_v8  ;;  %v3005_v34 = vmul.f32 %v8297_v26, %v3004_v30  ;;  %v4758_v18 = vpop.eup %4757  ;;  %vm2055_vm11 = vcmp.eq.f32.partialorder %v2054_v55, 8.507059e+37  ;;  %v2057_v19 = vor.u32 1.1754944e-38, %v2056_v4  ;;  %v5003_v4 = vld [vmem:[%s5123_s26 + $0x148] sm:$0xff] }
 0x2e9   : > { %vm3007_vm12 = vweird.f32 %v8259_v28  ;;  %vm3008_vm13 = vweird.f32 %v8297_v26  ;;  %v8472_v31 = vpop.eup %4759  ;;  %v3909_v33 = vmul.f32 %v4758_v18, %v3000_v32  ;;  %v2053_v61 = vsel %vm2052_vm10, %v8292_v63, %v2049_v47  ;;  %v8504_v1 = vpop.f32.mrf.mxu3 }
 0x2ea   : > { %v3006_v7 = vadd.f32 %v8297_v26, %v3005_v34  ;;  %vm8476_vm14 = vmor %vm3007_vm12, %vm3008_vm13  ;;  %v3011_v12 = vand.u32 2147483647, %v8259_v28  ;;  %v8483_v41 = vmul.f32 %v8472_v31, %v8430_v51  ;;  %v2058_v17 = vsel %vm2055_vm11, %v2057_v19, %v2053_v61 }
 0x2eb   : > { %v3013_v39 = vand.u32 2147483648, %v8259_v28  ;;  %v3658_v48 = vadd.f32 %v8383_v9, %v873_v10  ;;  %v3972_v62 = vadd.f32 %v3909_v33, %v3846_v54  ;;  %v3389_v6 = vmul.f32 %v5002_v52, %v2058_v17 }
 0x2ec   : > { %v8487_v63 = vpop.eup %4761  ;;  %v3010_v40 = vsel %vm8476_vm14, %v8297_v26, %v3006_v7  ;;  %vm8493_vm15 = vcmp.eq.f32.partialorder %v3011_v12, 8.507059e+37  ;;  %v524_v9 = vadd.f32 %v523_v57, %v5337_v14  ;;  %v682_v32 = vadd.f32 %v8426_v5, %v5449_v13 }
 0x2ed   : > { %v4764_v44 = vpop.eup %4763  ;;  %v8499_v28 = vmul.f32 %v8487_v63, %v8445_v11  ;;  %v3014_v45 = vor.u32 1.1754944e-38, %v3013_v39  ;;  %4767 = vtanh.f32 %v3658_v48  ;;  %4035 = vst [vmem:[%s5881_s17 + $0x140] sm:$0xff] %v3972_v62  ;;  %3598 = vmatmul.f32.gmra.mxu3 %v3389_v6  ;;  %v2062_v50 = vsub.f32 1.0, %v8366_v58  ;;  %v8551_v62 = vpop.f32.mrf.mxu2 }
 0x2ee   : > { %v4766_v35 = vpop.eup %4765  ;;  %v8507_v26 = vadd.f32 1.0, %v4764_v44  ;;  %vm2065_vm0 = vweird.f32 %v8314_v2  ;;  %v4183_v8 = vmul.f32 -1.442695, %v524_v9  ;;  %v4230_v24 = vmul.f32 -1.442695, %v682_v32  ;;  %v8524_v55 = vpop.f32.mrf.mxu1 }
 0x2ef   : > { %v3049_v53 = vsub.f32 1.0, %v8499_v28  ;;  %v8514_v14 = vadd.f32 1.0, %v4766_v35  ;;  %v3015_v46 = vsel %vm8493_vm15, %v3014_v45, %v3010_v40  ;;  %v2063_v54 = vmul.f32 %v8352_v20, %v2062_v50 }
 0x2f0   : > { %4769 = vrcp.f32 %v8507_v26  ;;  %v3784_v42 = vsub.f32 1.0, %v3015_v46  ;;  %vm2066_vm1 = vweird.f32 %v8352_v20  ;;  %v2069_v58 = vand.u32 2147483647, %v8314_v2 }
 0x2f1   : > { %4771 = vrcp.f32 %v8514_v14  ;;  %v2071_v5 = vand.u32 2147483648, %v8314_v2  ;;  %v2064_v10 = vadd.f32 %v8352_v20, %v2063_v54  ;;  %v876_v34 = vadd.f32 %v8451_v43, %v5568_v56  ;;  %vm2067_vm2 = vmor %vm2065_vm0, %vm2066_vm1  ;;  %v8553_v52 = vpop.f32.mrf.mxu3  ;;  %v5005_v54 = vld [vmem:[%s5123_s26 + $0x150] sm:$0xff] }
 0x2f2   : > { %v3847_v47 = vmul.f32 %v5003_v4, %v3784_v42  ;;  %4773 = vpow2.f32 %v4183_v8  ;;  %vm2070_vm3 = vcmp.eq.f32.partialorder %v2069_v58, 8.507059e+37  ;;  %v3020_v33 = vmul.f32 %v8362_v23, %v3019_v27 }
 0x2f3   : > { %v4768_v18 = vpop.eup %4767  ;;  %4775 = vpow2.f32 %v4230_v24  ;;  %v2072_v19 = vor.u32 1.1754944e-38, %v2071_v5  ;;  %v2068_v7 = vsel %vm2067_vm2, %v8352_v20, %v2064_v10  ;;  %vm3022_vm4 = vweird.f32 %v8319_v15  ;;  %v5004_v20 = vld [vmem:[%s5123_s26 + $0x1d0] sm:$0xff] }
 0x2f4   : > { %v3910_v61 = vmul.f32 %v4768_v18, %v3015_v46  ;;  %vm3023_vm5 = vweird.f32 %v8362_v23  ;;  %v3021_v30 = vadd.f32 %v8362_v23, %v3020_v33  ;;  %v3026_v12 = vand.u32 2147483647, %v8319_v15 }
 0x2f5   : > { %v2073_v43 = vsel %vm2070_vm3, %v2072_v19, %v2068_v7  ;;  %vm8539_vm6 = vmor %vm3022_vm4, %vm3023_vm5  ;;  %v3028_v49 = vand.u32 2147483648, %v8319_v15  ;;  %v3659_v39 = vadd.f32 %v8453_v59, %v876_v34  ;;  %v685_v48 = vadd.f32 %v8470_v3, %v5449_v13  ;;  %v8611_v2 = vpop.f32.mrf.mxu2 }
 0x2f6   : > { %v8545_v27 = vpop.eup %4769  ;;  %v3973_v57 = vadd.f32 %v3910_v61, %v3847_v47  ;;  %v3390_v17 = vmul.f32 %v5004_v20, %v2073_v43  ;;  %v3025_v40 = vsel %vm8539_vm6, %v8362_v23, %v3021_v30  ;;  %vm3027_vm7 = vcmp.eq.f32.partialorder %v3026_v12, 8.507059e+37  ;;  %v8574_v23 = vpop.f32.mrf.mxu1 }
 0x2f7   : > { %v8555_v6 = vpop.eup %4771  ;;  %v8559_v15 = vmul.f32 %v8545_v27, %v8507_v26  ;;  %v3029_v60 = vor.u32 1.1754944e-38, %v3028_v49  ;;  %4777 = vtanh.f32 %v3659_v39  ;;  %v4231_v44 = vmul.f32 -1.442695, %v685_v48 }
 0x2f8   : > { %v4774_v59 = vpop.eup %4773  ;;  %v8566_v3 = vmul.f32 %v8555_v6, %v8514_v14  ;;  %4036 = vst [vmem:[%s5881_s17 + $0x148] sm:$0xff] %v3973_v57  ;;  %3601 = vmatmul.f32.gmra.mxu3 %v3390_v17  ;;  %v2077_v45 = vsub.f32 1.0, %v8410_v0  ;;  %vm2080_vm8 = vweird.f32 %v8354_v36  ;;  %vm2081_vm9 = vweird.f32 %v8402_v21  ;;  %v5006_v57 = vld [vmem:[%s5123_s26 + $0x1d8] sm:$0xff] }
 0x2f9   : > { %v4776_v9 = vpop.eup %4775  ;;  %v8570_v35 = vadd.f32 1.0, %v4774_v59  ;;  %v3030_v32 = vsel %vm3027_vm7, %v3029_v60, %v3025_v40  ;;  %4779 = vpow2.f32 %v4231_v44  ;;  %v2084_v42 = vand.u32 2147483647, %v8354_v36  ;;  %vm2082_vm12 = vmor %vm2080_vm8, %vm2081_vm9 }
 0x2fa   : > { %v3064_v50 = vsub.f32 1.0, %v8566_v3  ;;  %v8577_v46 = vadd.f32 1.0, %v4776_v9  ;;  %v3785_v8 = vsub.f32 1.0, %v3030_v32  ;;  %v2078_v0 = vmul.f32 %v8402_v21, %v2077_v45  ;;  %v5007_v9 = vld [vmem:[%s5123_s26 + $0x158] sm:$0xff] }
 0x2fb   : > { %4781 = vrcp.f32 %v8570_v35  ;;  %v2086_v24 = vand.u32 2147483648, %v8354_v36  ;;  %v879_v5 = vadd.f32 %v8502_v16, %v5568_v56  ;;  %v3035_v4 = vmul.f32 %v8428_v37, %v3034_v22 }
 0x2fc   : > { %4783 = vrcp.f32 %v8577_v46  ;;  %v3848_v58 = vmul.f32 %v5005_v54, %v3785_v8  ;;  %v2079_v47 = vadd.f32 %v8402_v21, %v2078_v0  ;;  %vm2085_vm10 = vcmp.eq.f32.partialorder %v2084_v42, 8.507059e+37 }
 0x2fd   : > { %v2087_v10 = vor.u32 1.1754944e-38, %v2086_v24  ;;  %vm3037_vm11 = vweird.f32 %v8376_v38  ;;  %v4778_v34 = vpop.eup %4777  ;;  %v3036_v18 = vadd.f32 %v8428_v37, %v3035_v4  ;;  %vm3038_vm13 = vweird.f32 %v8428_v37 }
 0x2fe   : > { %v3041_v25 = vand.u32 2147483647, %v8376_v38  ;;  %v3043_v22 = vand.u32 2147483648, %v8376_v38  ;;  %v3911_v16 = vmul.f32 %v4778_v34, %v3030_v32  ;;  %v2083_v19 = vsel %vm2082_vm12, %v8402_v21, %v2079_v47  ;;  %vm8601_vm14 = vmor %vm3037_vm11, %vm3038_vm13  ;;  %v8613_v21 = vpop.f32.mrf.mxu3  ;;  %v8620_v20 = vpop.f32.mrf.mxu1 }
 0x2ff   : > { %v3660_v61 = vadd.f32 %v8504_v1, %v879_v5  ;;  %v688_v36 = vadd.f32 %v8524_v55, %v5449_v13  ;;  %v4780_v7 = vpop.eup %4779  ;;  %v2088_v43 = vsel %vm2085_vm10, %v2087_v10, %v2083_v19  ;;  %v3040_v30 = vsel %vm8601_vm14, %v8428_v37, %v3036_v18  ;;  %v8665_v34 = vpop.f32.mrf.mxu2 }
 0x300   : > { %vm3042_vm15 = vcmp.eq.f32.partialorder %v3041_v25, 8.507059e+37  ;;  %v3044_v38 = vor.u32 1.1754944e-38, %v3043_v22  ;;  %v3974_v49 = vadd.f32 %v3911_v16, %v3848_v58  ;;  %v8617_v1 = vadd.f32 1.0, %v4780_v7 }
 0x301   : > { %v8615_v12 = vpop.eup %4781  ;;  %v3391_v55 = vmul.f32 %v5006_v57, %v2088_v43  ;;  %4785 = vtanh.f32 %v3660_v61  ;;  %v4232_v48 = vmul.f32 -1.442695, %v688_v36  ;;  %v2092_v40 = vsub.f32 1.0, %v8483_v41  ;;  %v5008_v61 = vld [vmem:[%s5123_s26 + $0x1e0] sm:$0xff] }
 0x302   : > { %v8622_v17 = vpop.eup %4783  ;;  %v8626_v37 = vmul.f32 %v8615_v12, %v8570_v35  ;;  %v3045_v39 = vsel %vm3042_vm15, %v3044_v38, %v3040_v30  ;;  %4037 = vst [vmem:[%s5881_s17 + $0x150] sm:$0xff] %v3974_v49  ;;  %4787 = vrcp.f32 %v8617_v1  ;;  %vm2095_vm0 = vweird.f32 %v8430_v51 }
 0x303   : > { %v8631_v60 = vmul.f32 %v8622_v17, %v8577_v46  ;;  %3604 = vmatmul.f32.gmra.mxu3 %v3391_v55  ;;  %v3786_v59 = vsub.f32 1.0, %v3045_v39  ;;  %4789 = vpow2.f32 %v4232_v48  ;;  %v2093_v44 = vmul.f32 %v8472_v31, %v2092_v40 }
 0x304   : > { %vm2096_vm1 = vweird.f32 %v8472_v31  ;;  %v2099_v45 = vand.u32 2147483647, %v8430_v51  ;;  %v2101_v8 = vand.u32 2147483648, %v8430_v51  ;;  %v882_v0 = vadd.f32 %v8551_v62, %v5568_v56 }
 0x305   : > { %v3079_v41 = vsub.f32 1.0, %v8631_v60  ;;  %v3849_v32 = vmul.f32 %v5007_v9, %v3786_v59  ;;  %v2094_v42 = vadd.f32 %v8472_v31, %v2093_v44  ;;  %v3050_v54 = vmul.f32 %v8487_v63, %v3049_v53  ;;  %vm2097_vm4 = vmor %vm2095_vm0, %vm2096_vm1  ;;  %v5010_v53 = vld [vmem:[%s5123_s26 + $0x1e8] sm:$0xff] }
 0x306   : > { %vm8645_vm2 = vcmp.eq.f32.partialorder %v2099_v45, 8.507059e+37  ;;  %vm3052_vm3 = vweird.f32 %v8445_v11  ;;  %v2102_v5 = vor.u32 1.1754944e-38, %v2101_v8  ;;  %vm3053_vm5 = vweird.f32 %v8487_v63  ;;  %v8667_v18 = vpop.f32.mrf.mxu3  ;;  %v8675_v16 = vpop.f32.mrf.mxu1 }
 0x307   : > { %v4786_v58 = vpop.eup %4785  ;;  %v3056_v62 = vand.u32 2147483647, %v8445_v11  ;;  %v3058_v4 = vand.u32 2147483648, %v8445_v11  ;;  %v2098_v10 = vsel %vm2097_vm4, %v8472_v31, %v2094_v42  ;;  %v3051_v28 = vadd.f32 %v8487_v63, %v3050_v54  ;;  %vm8660_vm6 = vmor %vm3052_vm3, %vm3053_vm5  ;;  %v890_v54 = vpop.f32.mrf.mxu2 }
 0x308   : > { %v3912_v47 = vmul.f32 %v4786_v58, %v3045_v39  ;;  %v3661_v51 = vadd.f32 %v8553_v52, %v882_v0  ;;  %v8669_v25 = vpop.eup %4787  ;;  %v2103_v11 = vsel %vm8645_vm2, %v2102_v5, %v2098_v10  ;;  %v691_v22 = vadd.f32 %v8574_v23, %v5449_v13  ;;  %v5009_v39 = vld [vmem:[%s5123_s26 + $0x160] sm:$0xff] }
 0x309   : > { %vm3057_vm7 = vcmp.eq.f32.partialorder %v3056_v62, 8.507059e+37  ;;  %v3059_v31 = vor.u32 1.1754944e-38, %v3058_v4  ;;  %v4790_v19 = vpop.eup %4789  ;;  %v8679_v52 = vmul.f32 %v8669_v25, %v8617_v1  ;;  %v3392_v36 = vmul.f32 %v5008_v61, %v2103_v11  ;;  %v5011_v61 = vld [vmem:[%s5123_s26 + $0x168] sm:$0xff] }
 0x30a   : > { %v3975_v33 = vadd.f32 %v3912_v47, %v3849_v32  ;;  %v3055_v7 = vsel %vm8660_vm6, %v8487_v63, %v3051_v28  ;;  %v8685_v43 = vadd.f32 1.0, %v4790_v19  ;;  %4791 = vtanh.f32 %v3661_v51 }
 0x30b   : > { %v3060_v30 = vsel %vm3057_vm7, %v3059_v31, %v3055_v7  ;;  %v4233_v23 = vmul.f32 -1.442695, %v691_v22  ;;  %v3094_v38 = vsub.f32 1.0, %v8679_v52  ;;  %3607 = vmatmul.f32.gmra.mxu3 %v3392_v36  ;;  %v2107_v57 = vsub.f32 1.0, %v8559_v15 }
 0x30c   : > { %4038 = vst [vmem:[%s5881_s17 + $0x158] sm:$0xff] %v3975_v33  ;;  %v3787_v49 = vsub.f32 1.0, %v3060_v30  ;;  %vm2110_vm8 = vweird.f32 %v8507_v26  ;;  %4793 = vrcp.f32 %v8685_v43  ;;  %vm2111_vm9 = vweird.f32 %v8545_v27 }
 0x30d   : > { %v2114_v63 = vand.u32 2147483647, %v8507_v26  ;;  %v2116_v55 = vand.u32 2147483648, %v8507_v26  ;;  %4795 = vpow2.f32 %v4233_v23  ;;  %v2108_v40 = vmul.f32 %v8545_v27, %v2107_v57  ;;  %vm8710_vm12 = vmor %vm2110_vm8, %vm2111_vm9 }
 0x30e   : > { %v3850_v48 = vmul.f32 %v5009_v39, %v3787_v49  ;;  %v885_v59 = vadd.f32 %v8611_v2, %v5568_v56  ;;  %v3065_v45 = vmul.f32 %v8555_v6, %v3064_v50  ;;  %vm3067_vm11 = vweird.f32 %v8514_v14  ;;  %v8726_v58 = vpop.f32.mrf.mxu3  ;;  %v8731_v4 = vpop.f32.mrf.mxu1 }
 0x30f   : > { %vm8699_vm10 = vcmp.eq.f32.partialorder %v2114_v63, 8.507059e+37  ;;  %v2117_v44 = vor.u32 1.1754944e-38, %v2116_v55  ;;  %v2109_v9 = vadd.f32 %v8545_v27, %v2108_v40  ;;  %vm3068_vm13 = vweird.f32 %v8555_v6  ;;  %v893_v40 = vpop.f32.mrf.mxu2 }
 0x310   : > { %v3071_v2 = vand.u32 2147483647, %v8514_v14  ;;  %v3073_v8 = vand.u32 2147483648, %v8514_v14  ;;  %v4792_v0 = vpop.eup %4791  ;;  %v3066_v3 = vadd.f32 %v8555_v6, %v3065_v45  ;;  %vm8718_vm14 = vmor %vm3067_vm11, %vm3068_vm13  ;;  %v3662_v42 = vadd.f32 %v8613_v21, %v885_v59 }
 0x311   : > { %v694_v26 = vadd.f32 %v8620_v20, %v5449_v13  ;;  %v2122_v24 = vsub.f32 1.0, %v8626_v37  ;;  %v3913_v5 = vmul.f32 %v4792_v0, %v3060_v30  ;;  %v2113_v14 = vsel %vm8710_vm12, %v8545_v27, %v2109_v9 }
 0x312   : > { %vm3072_vm15 = vcmp.eq.f32.partialorder %v3071_v2, 8.507059e+37  ;;  %v3074_v62 = vor.u32 1.1754944e-38, %v3073_v8  ;;  %v8733_v47 = vpop.eup %4793  ;;  %v2118_v21 = vsel %vm8699_vm10, %v2117_v44, %v2113_v14  ;;  %v3070_v20 = vsel %vm8718_vm14, %v8555_v6, %v3066_v3 }
 0x313   : > { %4797 = vtanh.f32 %v3662_v42  ;;  %v4234_v37 = vmul.f32 -1.442695, %v694_v26  ;;  %v4796_v10 = vpop.eup %4795  ;;  %v8742_v27 = vmul.f32 %v8733_v47, %v8685_v43  ;;  %v3976_v28 = vadd.f32 %v3913_v5, %v3850_v48 }
 0x314   : > { %v3393_v51 = vmul.f32 %v5010_v53, %v2118_v21  ;;  %v3075_v11 = vsel %vm3072_vm15, %v3074_v62, %v3070_v20  ;;  %v8745_v31 = vadd.f32 1.0, %v4796_v10  ;;  %v2123_v19 = vmul.f32 %v8615_v12, %v2122_v24 }
 0x315   : > { %v3788_v22 = vsub.f32 1.0, %v3075_v11  ;;  %4799 = vpow2.f32 %v4234_v37  ;;  %v3109_v6 = vsub.f32 1.0, %v8742_v27  ;;  %4039 = vst [vmem:[%s5881_s17 + $0x160] sm:$0xff] %v3976_v28  ;;  %vm2125_vm0 = vweird.f32 %v8570_v35 }
 0x316   : > { %3610 = vmatmul.f32.gmra.mxu3 %v3393_v51  ;;  %vm2126_vm1 = vweird.f32 %v8615_v12  ;;  %v2129_v33 = vand.u32 2147483647, %v8570_v35  ;;  %4801 = vrcp.f32 %v8745_v31  ;;  %v2124_v7 = vadd.f32 %v8615_v12, %v2123_v19  ;;  %v8776_v59 = vpop.f32.mrf.mxu3  ;;  %v5012_v51 = vld [vmem:[%s5123_s26 + $0x170] sm:$0xff] }
 0x317   : > { %v3851_v36 = vmul.f32 %v5011_v61, %v3788_v22  ;;  %v2131_v30 = vand.u32 2147483648, %v8570_v35  ;;  %vm8757_vm2 = vmor %vm2125_vm0, %vm2126_vm1  ;;  %v888_v57 = vadd.f32 %v8665_v34, %v5568_v56  ;;  %v3080_v63 = vmul.f32 %v8622_v17, %v3079_v41  ;;  %v896_v28 = vpop.f32.mrf.mxu2 }
 0x318   : > { %vm8761_vm3 = vcmp.eq.f32.partialorder %v2129_v33, 8.507059e+37  ;;  %vm3082_vm4 = vweird.f32 %v8577_v46  ;;  %v2128_v35 = vsel %vm8757_vm2, %v8615_v12, %v2124_v7  ;;  %vm3083_vm5 = vweird.f32 %v8622_v17  ;;  %v8785_v12 = vpop.f32.mrf.mxu1 }
 0x319   : > { %v4798_v55 = vpop.eup %4797  ;;  %v2132_v39 = vor.u32 1.1754944e-38, %v2131_v30  ;;  %v3086_v48 = vand.u32 2147483647, %v8577_v46  ;;  %v3081_v60 = vadd.f32 %v8622_v17, %v3080_v63  ;;  %vm8779_vm6 = vmor %vm3082_vm4, %vm3083_vm5  ;;  %v3088_v15 = vand.u32 2147483648, %v8577_v46 }
 0x31a   : > { %v3914_v34 = vmul.f32 %v4798_v55, %v3075_v11  ;;  %v3663_v44 = vadd.f32 %v8667_v18, %v888_v57  ;;  %v697_v2 = vadd.f32 %v8675_v16, %v5449_v13  ;;  %v891_v8 = vadd.f32 %v890_v54, %v5568_v56 }
 0x31b   : > { %v4800_v45 = vpop.eup %4799  ;;  %v2133_v9 = vsel %vm8761_vm3, %v2132_v39, %v2128_v35  ;;  %vm8789_vm7 = vcmp.eq.f32.partialorder %v3086_v48, 8.507059e+37  ;;  %v3085_v3 = vsel %vm8779_vm6, %v8622_v17, %v3081_v60  ;;  %v3089_v42 = vor.u32 1.1754944e-38, %v3088_v15  ;;  %v5013_v48 = vld [vmem:[%s5123_s26 + $0x178] sm:$0xff] }
 0x31c   : > { %v3977_v0 = vadd.f32 %v3914_v34, %v3851_v36  ;;  %v8796_v46 = vadd.f32 1.0, %v4800_v45  ;;  %v3394_v18 = vmul.f32 %v8202_v29, %v2133_v9  ;;  %v8802_v50 = vpop.eup %4801  ;;  %4803 = vtanh.f32 %v3663_v44 }
 0x31d   : > { %v4235_v26 = vmul.f32 -1.442695, %v697_v2  ;;  %v3095_v16 = vmul.f32 %v8669_v25, %v3094_v38  ;;  %v3123_v24 = vmul.f32 %v8802_v50, %v8745_v31  ;;  %vm3097_vm8 = vweird.f32 %v8617_v1 }
 0x31e   : > { %4040 = vst [vmem:[%s5881_s17 + $0x168] sm:$0xff] %v3977_v0  ;;  %4805 = vrcp.f32 %v8796_v46  ;;  %3613 = vmatmul.f32.gmra.mxu3 %v3394_v18  ;;  %vm3098_vm9 = vweird.f32 %v8669_v25  ;;  %v3090_v29 = vsel %vm8789_vm7, %v3089_v42, %v3085_v3  ;;  %v3101_v38 = vand.u32 2147483647, %v8617_v1  ;;  %v3575_v53 = vpop.f32.mrf.mxu3  ;;  %v5014_v3 = vld [vmem:[%s5123_s26 + $0x180] sm:$0xff] }
 0x31f   : > { %4807 = vpow2.f32 %v4235_v26  ;;  %v3096_v17 = vadd.f32 %v8669_v25, %v3095_v16  ;;  %vm8816_vm10 = vmor %vm3097_vm8, %vm3098_vm9  ;;  %v3124_v54 = vsub.f32 1.0, %v3123_v24  ;;  %v3789_v5 = vsub.f32 1.0, %v3090_v29  ;;  %v899_v32 = vpop.f32.mrf.mxu2 }
 0x320   : > { %v3103_v14 = vand.u32 2147483648, %v8617_v1  ;;  %v3664_v62 = vadd.f32 %v8726_v58, %v891_v8  ;;  %vm8826_vm11 = vcmp.eq.f32.partialorder %v3101_v38, 8.507059e+37  ;;  %v700_v37 = vadd.f32 %v8731_v4, %v5449_v13 }
 0x321   : > { %v3100_v21 = vsel %vm8816_vm10, %v8669_v25, %v3096_v17  ;;  %v894_v10 = vadd.f32 %v893_v40, %v5568_v56  ;;  %v3852_v11 = vmul.f32 %v5012_v51, %v3789_v5  ;;  %v3110_v58 = vmul.f32 %v8733_v47, %v3109_v6  ;;  %v705_v25 = vpop.f32.mrf.mxu1 }
 0x322   : > { %v3104_v1 = vor.u32 1.1754944e-38, %v3103_v14  ;;  %4809 = vtanh.f32 %v3664_v62  ;;  %v4804_v22 = vpop.eup %4803  ;;  %v4236_v19 = vmul.f32 -1.442695, %v700_v37  ;;  %vm3112_vm12 = vweird.f32 %v8685_v43 }
 0x323   : > { %vm3113_vm13 = vweird.f32 %v8733_v47  ;;  %v3116_v4 = vand.u32 2147483647, %v8685_v43  ;;  %v3915_v61 = vmul.f32 %v4804_v22, %v3090_v29  ;;  %v3111_v27 = vadd.f32 %v8733_v47, %v3110_v58 }
 0x324   : > { %v8840_v33 = vpop.eup %4805  ;;  %v3105_v36 = vsel %vm8826_vm11, %v3104_v1, %v3100_v21  ;;  %vm8845_vm14 = vmor %vm3112_vm12, %vm3113_vm13  ;;  %v3118_v7 = vand.u32 2147483648, %v8685_v43  ;;  %4811 = vpow2.f32 %v4236_v19  ;;  %v3665_v43 = vadd.f32 %v8776_v59, %v894_v10 }
 0x325   : > { %v4808_v30 = vpop.eup %4807  ;;  %v3138_v23 = vmul.f32 %v8840_v33, %v8796_v46  ;;  %v3790_v49 = vsub.f32 1.0, %v3105_v36  ;;  %vm3117_vm15 = vcmp.eq.f32.partialorder %v3116_v4, 8.507059e+37  ;;  %v3978_v57 = vadd.f32 %v3915_v61, %v3852_v11  ;;  %v5015_v61 = vld [vmem:[%s5123_s26 + $0x188] sm:$0xff] }
 0x326   : > { %v8852_v63 = vadd.f32 1.0, %v4808_v30  ;;  %v3115_v55 = vsel %vm8845_vm14, %v8733_v47, %v3111_v27  ;;  %v3119_v35 = vor.u32 1.1754944e-38, %v3118_v7  ;;  %v703_v34 = vadd.f32 %v8785_v12, %v5449_v13 }
 0x327   : > { %v3139_v39 = vsub.f32 1.0, %v3138_v23  ;;  %v3853_v40 = vmul.f32 %v5013_v48, %v3790_v49  ;;  %4041 = vst [vmem:[%s5881_s17 + $0x170] sm:$0xff] %v3978_v57  ;;  %v897_v15 = vadd.f32 %v896_v28, %v5568_v56  ;;  %v3125_v44 = vmul.f32 %v8802_v50, %v3124_v54  ;;  %v3578_v2 = vpop.f32.mrf.mxu3  ;;  %v902_v22 = vpop.f32.mrf.mxu2 }
 0x328   : > { %v4810_v60 = vpop.eup %4809  ;;  %4813 = vrcp.f32 %v8852_v63  ;;  %v3120_v41 = vsel %vm3117_vm15, %v3119_v35, %v3115_v55  ;;  %v4237_v9 = vmul.f32 -1.442695, %v703_v34  ;;  %vm3127_vm0 = vweird.f32 %v8745_v31 }
 0x329   : > { %v3916_v47 = vmul.f32 %v4810_v60, %v3105_v36  ;;  %4815 = vtanh.f32 %v3665_v43  ;;  %v3791_v45 = vsub.f32 1.0, %v3120_v41  ;;  %v3126_v59 = vadd.f32 %v8802_v50, %v3125_v44  ;;  %v708_v8 = vpop.f32.mrf.mxu1 }
 0x32a   : > { %vm3128_vm1 = vweird.f32 %v8802_v50  ;;  %v3131_v12 = vand.u32 2147483647, %v8745_v31  ;;  %v4812_v0 = vpop.eup %4811  ;;  %4817 = vpow2.f32 %v4237_v9  ;;  %v3133_v16 = vand.u32 2147483648, %v8745_v31 }
 0x32b   : > { %v3979_v18 = vadd.f32 %v3916_v47, %v3853_v40  ;;  %v3854_v42 = vmul.f32 %v5014_v3, %v3791_v45  ;;  %vm8870_vm2 = vmor %vm3127_vm0, %vm3128_vm1  ;;  %v8875_v24 = vadd.f32 1.0, %v4812_v0  ;;  %v3666_v17 = vadd.f32 %v3575_v53, %v897_v15 }
 0x32c   : > { %v3130_v29 = vsel %vm8870_vm2, %v8802_v50, %v3126_v59  ;;  %vm3132_vm3 = vcmp.eq.f32.partialorder %v3131_v12, 8.507059e+37  ;;  %v3134_v52 = vor.u32 1.1754944e-38, %v3133_v16  ;;  %v706_v38 = vadd.f32 %v705_v25, %v5449_v13 }
 0x32d   : > { %4042 = vst [vmem:[%s5881_s17 + $0x178] sm:$0xff] %v3979_v18  ;;  %v900_v54 = vadd.f32 %v899_v32, %v5568_v56  ;;  %v3140_v5 = vmul.f32 %v8840_v33, %v3139_v39  ;;  %4819 = vrcp.f32 %v8875_v24  ;;  %vm3142_vm4 = vweird.f32 %v8796_v46 }
 0x32e   : > { %v8884_v14 = vpop.eup %4813  ;;  %vm3143_vm5 = vweird.f32 %v8840_v33  ;;  %v3146_v31 = vand.u32 2147483647, %v8796_v46  ;;  %v3135_v21 = vsel %vm3132_vm3, %v3134_v52, %v3130_v29  ;;  %4821 = vtanh.f32 %v3666_v17 }
 0x32f   : > { %v4816_v50 = vpop.eup %4815  ;;  %v3153_v62 = vmul.f32 %v8884_v14, %v8852_v63  ;;  %v4238_v20 = vmul.f32 -1.442695, %v706_v38  ;;  %vm8892_vm6 = vmor %vm3142_vm4, %vm3143_vm5  ;;  %v3792_v28 = vsub.f32 1.0, %v3135_v21  ;;  %v3141_v53 = vadd.f32 %v8840_v33, %v3140_v5  ;;  %v905_v18 = vpop.f32.mrf.mxu2 }
 0x330   : > { %v3917_v10 = vmul.f32 %v4816_v50, %v3120_v41  ;;  %vm8897_vm7 = vcmp.eq.f32.partialorder %v3146_v31, 8.507059e+37  ;;  %v4818_v11 = vpop.eup %4817  ;;  %v3148_v58 = vand.u32 2147483648, %v8796_v46  ;;  %v3667_v25 = vadd.f32 %v3578_v2, %v900_v54  ;;  %v5016_v2 = vld [vmem:[%s5123_s26 + $0x190] sm:$0xff] }
 0x331   : > { %v3154_v1 = vsub.f32 1.0, %v3153_v62  ;;  %4823 = vpow2.f32 %v4238_v20  ;;  %v8902_v4 = vadd.f32 1.0, %v4818_v11  ;;  %v3855_v36 = vmul.f32 %v5015_v61, %v3792_v28  ;;  %v711_v49 = vpop.f32.mrf.mxu1 }
 0x332   : > { %v3980_v19 = vadd.f32 %v3917_v10, %v3854_v42  ;;  %v3145_v27 = vsel %vm8892_vm6, %v8840_v33, %v3141_v53  ;;  %v3149_v6 = vor.u32 1.1754944e-38, %v3148_v58  ;;  %4825 = vtanh.f32 %v3667_v25  ;;  %v3581_v23 = vpop.f32.mrf.mxu3  ;;  %v5017_v25 = vld [vmem:[%s5123_s26 + $0x198] sm:$0xff] }
 0x333   : > { %v709_v7 = vadd.f32 %v708_v8, %v5449_v13  ;;  %v903_v30 = vadd.f32 %v902_v22, %v5568_v56  ;;  %v8910_v46 = vpop.eup %4819  ;;  %4827 = vrcp.f32 %v8902_v4  ;;  %v3155_v57 = vmul.f32 %v8884_v14, %v3154_v1 }
 0x334   : > { %4043 = vst [vmem:[%s5881_s17 + $0x180] sm:$0xff] %v3980_v19  ;;  %vm3157_vm8 = vweird.f32 %v8852_v63  ;;  %vm3158_vm9 = vweird.f32 %v8884_v14  ;;  %v4822_v33 = vpop.eup %4821  ;;  %v3168_v55 = vmul.f32 %v8910_v46, %v8875_v24  ;;  %v3150_v35 = vsel %vm8897_vm7, %v3149_v6, %v3145_v27 }
 0x335   : > { %v4239_v39 = vmul.f32 -1.442695, %v709_v7  ;;  %vm8921_vm10 = vmor %vm3157_vm8, %vm3158_vm9  ;;  %v3161_v40 = vand.u32 2147483647, %v8852_v63  ;;  %v3918_v43 = vmul.f32 %v4822_v33, %v3135_v21  ;;  %v3793_v34 = vsub.f32 1.0, %v3150_v35 }
 0x336   : > { %v3156_v60 = vadd.f32 %v8884_v14, %v3155_v57  ;;  %v3163_v41 = vand.u32 2147483648, %v8852_v63  ;;  %v3169_v44 = vsub.f32 1.0, %v3168_v55  ;;  %v3668_v45 = vadd.f32 %v3581_v23, %v903_v30 }
 0x337   : > { %v4824_v15 = vpop.eup %4823  ;;  %4829 = vpow2.f32 %v4239_v39  ;;  %vm8928_vm11 = vcmp.eq.f32.partialorder %v3161_v40, 8.507059e+37  ;;  %v3981_v9 = vadd.f32 %v3918_v43, %v3855_v36  ;;  %v3856_v59 = vmul.f32 %v5016_v2, %v3793_v34  ;;  %v908_v27 = vpop.f32.mrf.mxu2  ;;  %v5018_v34 = vld [vmem:[%s5123_s26 + $0x1a0] sm:$0xff] }
 0x338   : > { %v8932_v32 = vadd.f32 1.0, %v4824_v15  ;;  %v3160_v12 = vsel %vm8921_vm10, %v8884_v14, %v3156_v60  ;;  %v4826_v8 = vpop.eup %4825  ;;  %v3164_v63 = vor.u32 1.1754944e-38, %v3163_v41  ;;  %4831 = vtanh.f32 %v3668_v45 }
 0x339   : > { %v712_v0 = vadd.f32 %v711_v49, %v5449_v13  ;;  %v3170_v3 = vmul.f32 %v8910_v46, %v3169_v44  ;;  %v8940_v42 = vpop.eup %4827  ;;  %4044 = vst [vmem:[%s5881_s17 + $0x188] sm:$0xff] %v3981_v9  ;;  %v3919_v26 = vmul.f32 %v4826_v8, %v3150_v35  ;;  %v906_v16 = vadd.f32 %v905_v18, %v5568_v56  ;;  %v714_v37 = vpop.f32.mrf.mxu1 }
 0x33a   : > { %4833 = vrcp.f32 %v8932_v32  ;;  %vm3172_vm12 = vweird.f32 %v8875_v24  ;;  %v3183_v29 = vmul.f32 %v8940_v42, %v8902_v4  ;;  %v3165_v17 = vsel %vm8928_vm11, %v3164_v63, %v3160_v12 }
 0x33b   : > { %v4240_v52 = vmul.f32 -1.442695, %v712_v0  ;;  %v3171_v38 = vadd.f32 %v8910_v46, %v3170_v3  ;;  %v3982_v54 = vadd.f32 %v3919_v26, %v3856_v59  ;;  %v3794_v5 = vsub.f32 1.0, %v3165_v17 }
 0x33c   : > { %vm3173_vm13 = vweird.f32 %v8910_v46  ;;  %v3176_v14 = vand.u32 2147483647, %v8875_v24  ;;  %v3184_v50 = vsub.f32 1.0, %v3183_v29  ;;  %v3178_v21 = vand.u32 2147483648, %v8875_v24  ;;  %v3584_v20 = vpop.f32.mrf.mxu3 }
 0x33d   : > { %v4830_v31 = vpop.eup %4829  ;;  %vm8953_vm14 = vmor %vm3172_vm12, %vm3173_vm13  ;;  %4045 = vst [vmem:[%s5881_s17 + $0x190] sm:$0xff] %v3982_v54  ;;  %4835 = vpow2.f32 %v4240_v52  ;;  %v3669_v11 = vadd.f32 %v3584_v20, %v906_v16  ;;  %v3857_v24 = vmul.f32 %v5017_v25, %v3794_v5  ;;  %v715_v19 = vadd.f32 %v714_v37, %v5449_v13  ;;  %v5019_v54 = vld [vmem:[%s5123_s26 + $0x1a8] sm:$0xff] }
 0x33e   : > { %v3175_v10 = vsel %vm8953_vm14, %v8910_v46, %v3171_v38  ;;  %vm3177_vm15 = vcmp.eq.f32.partialorder %v3176_v14, 8.507059e+37  ;;  %v4832_v28 = vpop.eup %4831  ;;  %v8962_v53 = vadd.f32 1.0, %v4830_v31  ;;  %v3179_v51 = vor.u32 1.1754944e-38, %v3178_v21 }
 0x33f   : > { %v3185_v1 = vmul.f32 %v8940_v42, %v3184_v50  ;;  %v3920_v22 = vmul.f32 %v4832_v28, %v3165_v17  ;;  %vm3187_vm0 = vweird.f32 %v8902_v4  ;;  %4837 = vtanh.f32 %v3669_v11  ;;  %v911_v59 = vpop.f32.mrf.mxu2 }
 0x340   : > { %v8965_v58 = vpop.eup %4833  ;;  %v3180_v36 = vsel %vm3177_vm15, %v3179_v51, %v3175_v10  ;;  %vm3188_vm1 = vweird.f32 %v8940_v42  ;;  %4839 = vrcp.f32 %v8962_v53  ;;  %v3191_v30 = vand.u32 2147483647, %v8902_v4 }
 0x341   : > { %v3198_v61 = vmul.f32 %v8965_v58, %v8932_v32  ;;  %v3983_v6 = vadd.f32 %v3920_v22, %v3857_v24  ;;  %v3186_v7 = vadd.f32 %v8940_v42, %v3185_v1  ;;  %v3193_v23 = vand.u32 2147483648, %v8902_v4  ;;  %vm8981_vm2 = vmor %vm3187_vm0, %vm3188_vm1  ;;  %v717_v4 = vpop.f32.mrf.mxu1 }
 0x342   : > { %v3795_v46 = vsub.f32 1.0, %v3180_v36  ;;  %v909_v57 = vadd.f32 %v908_v27, %v5568_v56  ;;  %v4241_v35 = vmul.f32 -1.442695, %v715_v19  ;;  %vm3192_vm3 = vcmp.eq.f32.partialorder %v3191_v30, 8.507059e+37 }
 0x343   : > { %v4836_v49 = vpop.eup %4835  ;;  %4046 = vst [vmem:[%s5881_s17 + $0x198] sm:$0xff] %v3983_v6  ;;  %v3199_v55 = vsub.f32 1.0, %v3198_v61  ;;  %v3194_v39 = vor.u32 1.1754944e-38, %v3193_v23  ;;  %v3190_v40 = vsel %vm8981_vm2, %v8940_v42, %v3186_v7  ;;  %vm3202_vm4 = vweird.f32 %v8932_v32  ;;  %v5020_v7 = vld [vmem:[%s5123_s26 + $0x1b0] sm:$0xff] }
 0x344   : > { %v3858_v60 = vmul.f32 %v5018_v34, %v3795_v46  ;;  %4841 = vpow2.f32 %v4241_v35  ;;  %v8992_v45 = vadd.f32 1.0, %v4836_v49  ;;  %vm3203_vm5 = vweird.f32 %v8965_v58 }
 0x345   : > { %v4838_v48 = vpop.eup %4837  ;;  %v3200_v47 = vmul.f32 %v8965_v58, %v3199_v55  ;;  %v3195_v2 = vsel %vm3192_vm3, %v3194_v39, %v3190_v40  ;;  %v718_v8 = vadd.f32 %v717_v4, %v5449_v13  ;;  %v3208_v63 = vand.u32 2147483648, %v8932_v32  ;;  %vm9005_vm6 = vmor %vm3202_vm4, %vm3203_vm5 }
 0x346   : > { %v3587_v43 = vpop.f32.mrf.mxu3  ;;  %v3921_v41 = vmul.f32 %v4838_v48, %v3180_v36  ;;  %v8989_v44 = vpop.eup %4839  ;;  %v3796_v0 = vsub.f32 1.0, %v3195_v2  ;;  %v3206_v3 = vand.u32 2147483647, %v8932_v32  ;;  %v912_v42 = vadd.f32 %v911_v59, %v5568_v56 }
 0x347   : > { %v3670_v15 = vadd.f32 %v3587_v43, %v909_v57  ;;  %v3213_v12 = vmul.f32 %v8989_v44, %v8962_v53  ;;  %v3201_v18 = vadd.f32 %v8965_v58, %v3200_v47  ;;  %v4242_v52 = vmul.f32 -1.442695, %v718_v8  ;;  %v914_v51 = vpop.f32.mrf.mxu2 }
 0x348   : > { %v3984_v9 = vadd.f32 %v3921_v41, %v3858_v60  ;;  %v3209_v38 = vor.u32 1.1754944e-38, %v3208_v63  ;;  %v3859_v5 = vmul.f32 %v5019_v54, %v3796_v0  ;;  %vm3207_vm7 = vcmp.eq.f32.partialorder %v3206_v3, 8.507059e+37  ;;  %v5021_v0 = vld [vmem:[%s5123_s26 + $0x1b8] sm:$0xff] }
 0x349   : > { %4843 = vtanh.f32 %v3670_v15  ;;  %v3214_v17 = vsub.f32 1.0, %v3213_v12  ;;  %v3205_v32 = vsel %vm9005_vm6, %v8965_v58, %v3201_v18  ;;  %v720_v21 = vpop.f32.mrf.mxu1  ;;  %vm3217_vm8 = vweird.f32 %v8962_v53 }
 0x34a   : > { %4047 = vst [vmem:[%s5881_s17 + $0x1a0] sm:$0xff] %v3984_v9  ;;  %4845 = vrcp.f32 %v8992_v45  ;;  %v4842_v16 = vpop.eup %4841  ;;  %v3210_v10 = vsel %vm3207_vm7, %v3209_v38, %v3205_v32  ;;  %vm3218_vm9 = vweird.f32 %v8989_v44  ;;  %v3223_v58 = vand.u32 2147483648, %v8962_v53 }
 0x34b   : > { %v9013_v50 = vadd.f32 1.0, %v4842_v16  ;;  %v3215_v28 = vmul.f32 %v8989_v44, %v3214_v17  ;;  %v3797_v1 = vsub.f32 1.0, %v3210_v10  ;;  %v721_v25 = vadd.f32 %v720_v21, %v5449_v13  ;;  %vm9029_vm10 = vmor %vm3217_vm8, %vm3218_vm9 }
 0x34c   : > { %v3221_v22 = vand.u32 2147483647, %v8962_v53  ;;  %v915_v19 = vadd.f32 %v914_v51, %v5568_v56  ;;  %v3224_v49 = vor.u32 1.1754944e-38, %v3223_v58  ;;  %vm3232_vm12 = vweird.f32 %v8992_v45 }
 0x34d   : > { %v3216_v24 = vadd.f32 %v8989_v44, %v3215_v28  ;;  %v3860_v30 = vmul.f32 %v5020_v7, %v3797_v1  ;;  %v4243_v57 = vmul.f32 -1.442695, %v721_v25  ;;  %v3238_v4 = vand.u32 2147483648, %v8992_v45 }
 0x34e   : > { %vm3222_vm11 = vcmp.eq.f32.partialorder %v3221_v22, 8.507059e+37  ;;  %v3236_v9 = vand.u32 2147483647, %v8992_v45  ;;  %vm3247_vm0 = vweird.f32 %v9013_v50  ;;  %v3253_v32 = vand.u32 2147483648, %v9013_v50 }
 0x34f   : > { %v4844_v29 = vpop.eup %4843  ;;  %v3220_v53 = vsel %vm9029_vm10, %v8989_v44, %v3216_v24  ;;  %v917_v34 = vpop.f32.mrf.mxu2 }
 0x350   : > { %v3922_v14 = vmul.f32 %v4844_v29, %v3195_v2  ;;  %v9015_v37 = vpop.eup %4845  ;;  %v3225_v43 = vsel %vm3222_vm11, %v3224_v49, %v3220_v53  ;;  %v918_v59 = vadd.f32 %v917_v34, %v5568_v56  ;;  %vm3237_vm15 = vcmp.eq.f32.partialorder %v3236_v9, 8.507059e+37 }
 0x351   : > { %v3590_v31 = vpop.f32.mrf.mxu3  ;;  %v3228_v11 = vmul.f32 %v9015_v37, %v8992_v45  ;;  %v723_v55 = vpop.f32.mrf.mxu1  ;;  %vm3233_vm13 = vweird.f32 %v9015_v37  ;;  %v3798_v15 = vsub.f32 1.0, %v3225_v43 }
 0x352   : > { %v3671_v62 = vadd.f32 %v3590_v31, %v912_v42  ;;  %v3985_v20 = vadd.f32 %v3922_v14, %v3859_v5  ;;  %v724_v41 = vadd.f32 %v723_v55, %v5449_v13  ;;  %vm9053_vm14 = vmor %vm3232_vm12, %vm3233_vm13  ;;  %v3239_v42 = vor.u32 1.1754944e-38, %v3238_v4 }
 0x353   : > { %v3229_v6 = vsub.f32 1.0, %v3228_v11  ;;  %v3861_v18 = vmul.f32 %v5021_v0, %v3798_v15  ;;  %v3254_v11 = vor.u32 1.1754944e-38, %v3253_v32  ;;  %v5023_v15 = vld [vmem:[%s5123_s26 + $0x1c8] sm:$0xff]  ;;  %v5024_v32 = vld [vmem:[%s5123_s26 + $0x1d0] sm:$0xff] }
 0x354   : > { %4847 = vtanh.f32 %v3671_v62  ;;  %4048 = vst [vmem:[%s5881_s17 + $0x1a8] sm:$0xff] %v3985_v20  ;;  %v4244_v2 = vmul.f32 -1.442695, %v724_v41  ;;  %v3251_v20 = vand.u32 2147483647, %v9013_v50 }
 0x355   : > { %4849 = vpow2.f32 %v4242_v52  ;;  %v3230_v60 = vmul.f32 %v9015_v37, %v3229_v6 }
 0x356   : > { %4851 = vrcp.f32 %v9013_v50  ;;  %vm3252_vm3 = vcmp.eq.f32.partialorder %v3251_v20, 8.507059e+37 }
 0x357   : > { %v3231_v47 = vadd.f32 %v9015_v37, %v3230_v60  ;;  %v920_v5 = vpop.f32.mrf.mxu2 }
 0x358   : > { %v921_v51 = vadd.f32 %v920_v5, %v5568_v56 }
 0x359   : > { %v726_v26 = vpop.f32.mrf.mxu1  ;;  %v3235_v16 = vsel %vm9053_vm14, %v9015_v37, %v3231_v47 }
 0x35a   : > { %v4848_v36 = vpop.eup %4847  ;;  %v3240_v14 = vsel %vm3237_vm15, %v3239_v42, %v3235_v16  ;;  %v727_v62 = vadd.f32 %v726_v26, %v5449_v13 }
 0x35b   : > { %v4850_v27 = vpop.eup %4849  ;;  %v3923_v23 = vmul.f32 %v4848_v36, %v3210_v10  ;;  %v3799_v10 = vsub.f32 1.0, %v3240_v14 }
 0x35c   : > { %v9034_v46 = vpop.eup %4851  ;;  %v3593_v33 = vpop.f32.mrf.mxu3  ;;  %v9039_v48 = vadd.f32 1.0, %v4850_v27  ;;  %v4245_v58 = vmul.f32 -1.442695, %v727_v62 }
 0x35d   : > { %v3986_v35 = vadd.f32 %v3923_v23, %v3860_v30  ;;  %v3672_v39 = vadd.f32 %v3593_v33, %v915_v19  ;;  %v3243_v40 = vmul.f32 %v9034_v46, %v9013_v50  ;;  %vm3248_vm1 = vweird.f32 %v9034_v46  ;;  %v5022_v19 = vld [vmem:[%s5123_s26 + $0x1c0] sm:$0xff] }
 0x35e   : > { %vm9075_vm2 = vmor %vm3247_vm0, %vm3248_vm1  ;;  %v3862_v61 = vmul.f32 %v5022_v19, %v3799_v10  ;;  %vm3262_vm4 = vweird.f32 %v9039_v48  ;;  %v3268_v55 = vand.u32 2147483648, %v9039_v48 }
 0x35f   : > { %4049 = vst [vmem:[%s5881_s17 + $0x1b0] sm:$0xff] %v3986_v35  ;;  %4853 = vtanh.f32 %v3672_v39  ;;  %v3244_v44 = vsub.f32 1.0, %v3243_v40  ;;  %v3266_v39 = vand.u32 2147483647, %v9039_v48 }
 0x360   : > { %4855 = vpow2.f32 %v4243_v57  ;;  %v923_v57 = vpop.f32.mrf.mxu2 }
 0x361   : > { %4857 = vrcp.f32 %v9039_v48  ;;  %v3245_v29 = vmul.f32 %v9034_v46, %v3244_v44  ;;  %v729_v50 = vpop.f32.mrf.mxu1  ;;  %v924_v40 = vadd.f32 %v923_v57, %v5568_v56  ;;  %v3269_v44 = vor.u32 1.1754944e-38, %v3268_v55  ;;  %v5025_v57 = vld [vmem:[%s5123_s26 + $0x1d8] sm:$0xff] }
 0x362   : > { %4859 = vpow2.f32 %v4244_v2  ;;  %v730_v49 = vadd.f32 %v729_v50, %v5449_v13  ;;  %vm3267_vm7 = vcmp.eq.f32.partialorder %v3266_v39, 8.507059e+37 }
 0x363   : > { %v3246_v21 = vadd.f32 %v9034_v46, %v3245_v29 }
 0x364   : > { %v4246_v35 = vmul.f32 -1.442695, %v730_v49 }
 0x365   : > { %v4854_v8 = vpop.eup %4853  ;;  %v3250_v25 = vsel %vm9075_vm2, %v9034_v46, %v3246_v21 }
 0x366   : > { %v4856_v63 = vpop.eup %4855  ;;  %v3924_v3 = vmul.f32 %v4854_v8, %v3225_v43  ;;  %v3596_v45 = vpop.f32.mrf.mxu3  ;;  %v3255_v6 = vsel %vm3252_vm3, %v3254_v11, %v3250_v25 }
 0x367   : > { %v9062_v17 = vpop.eup %4857  ;;  %v3673_v38 = vadd.f32 %v3596_v45, %v918_v59  ;;  %v9064_v54 = vadd.f32 1.0, %v4856_v63  ;;  %v3800_v33 = vsub.f32 1.0, %v3255_v6 }
 0x368   : > { %v3987_v52 = vadd.f32 %v3924_v3, %v3861_v18  ;;  %v3258_v31 = vmul.f32 %v9062_v17, %v9039_v48  ;;  %v4860_v28 = vpop.eup %4859  ;;  %vm3263_vm5 = vweird.f32 %v9062_v17  ;;  %v926_v63 = vpop.f32.mrf.mxu2 }
 0x369   : > { %4861 = vtanh.f32 %v3673_v38  ;;  %v9084_v22 = vadd.f32 1.0, %v4860_v28  ;;  %vm9101_vm6 = vmor %vm3262_vm4, %vm3263_vm5  ;;  %v3863_v4 = vmul.f32 %v5023_v15, %v3800_v33  ;;  %vm3277_vm8 = vweird.f32 %v9064_v54 }
 0x36a   : > { %4050 = vst [vmem:[%s5881_s17 + $0x1b8] sm:$0xff] %v3987_v52  ;;  %4863 = vrcp.f32 %v9064_v54  ;;  %v3259_v1 = vsub.f32 1.0, %v3258_v31  ;;  %v3283_v16 = vand.u32 2147483648, %v9064_v54  ;;  %v927_v52 = vadd.f32 %v926_v63, %v5568_v56 }
 0x36b   : > { %4865 = vpow2.f32 %v4245_v58  ;;  %vm3292_vm12 = vweird.f32 %v9084_v22  ;;  %v3298_v25 = vand.u32 2147483648, %v9084_v22  ;;  %v3296_v50 = vand.u32 2147483647, %v9084_v22 }
 0x36c   : > { %v3260_v46 = vmul.f32 %v9062_v17, %v3259_v1  ;;  %v3284_v21 = vor.u32 1.1754944e-38, %v3283_v16 }
 0x36d   : > { %vm3297_vm15 = vcmp.eq.f32.partialorder %v3296_v50, 8.507059e+37 }
 0x36e   : > { %v3261_v13 = vadd.f32 %v9062_v17, %v3260_v46 }
 0x36f   : > { %v4862_v24 = vpop.eup %4861 }
 0x370   : > { %v3925_v36 = vmul.f32 %v4862_v24, %v3240_v14  ;;  %v3599_v27 = vpop.f32.mrf.mxu3  ;;  %v9087_v30 = vpop.eup %4863  ;;  %v3265_v48 = vsel %vm9101_vm6, %v9062_v17, %v3261_v13  ;;  %v3281_v17 = vand.u32 2147483647, %v9064_v54 }
 0x371   : > { %v3674_v7 = vadd.f32 %v3599_v27, %v921_v51  ;;  %v3273_v53 = vmul.f32 %v9087_v30, %v9064_v54  ;;  %v4866_v34 = vpop.eup %4865  ;;  %v3270_v18 = vsel %vm3267_vm7, %v3269_v44, %v3265_v48  ;;  %vm3278_vm9 = vweird.f32 %v9087_v30  ;;  %v929_v11 = vpop.f32.mrf.mxu2 }
 0x372   : > { %v3988_v23 = vadd.f32 %v3925_v36, %v3862_v61  ;;  %v9111_v59 = vadd.f32 1.0, %v4866_v34  ;;  %v3801_v26 = vsub.f32 1.0, %v3270_v18  ;;  %vm9124_vm10 = vmor %vm3277_vm8, %vm3278_vm9  ;;  %vm3282_vm11 = vcmp.eq.f32.partialorder %v3281_v17, 8.507059e+37 }
 0x373   : > { %4867 = vtanh.f32 %v3674_v7  ;;  %v3274_v41 = vsub.f32 1.0, %v3273_v53  ;;  %v930_v36 = vadd.f32 %v929_v11, %v5568_v56 }
 0x374   : > { %4869 = vrcp.f32 %v9084_v22  ;;  %4051 = vst [vmem:[%s5881_s17 + $0x1c0] sm:$0xff] %v3988_v23  ;;  %v3864_v31 = vmul.f32 %v5024_v32, %v3801_v26  ;;  %vm3307_vm0 = vweird.f32 %v9111_v59  ;;  %v3313_v43 = vand.u32 2147483648, %v9111_v59 }
 0x375   : > { %4871 = vpow2.f32 %v4246_v35  ;;  %v3275_v3 = vmul.f32 %v9087_v30, %v3274_v41  ;;  %v3311_v41 = vand.u32 2147483647, %v9111_v59 }
 0x376   : > { %v3314_v48 = vor.u32 1.1754944e-38, %v3313_v43 }
 0x377   : > { %v3276_v29 = vadd.f32 %v9087_v30, %v3275_v3  ;;  %vm3312_vm3 = vcmp.eq.f32.partialorder %v3311_v41, 8.507059e+37 }
 0x379   : > { %v4868_v60 = vpop.eup %4867  ;;  %v3280_v54 = vsel %vm9124_vm10, %v9087_v30, %v3276_v29  ;;  %v932_v35 = vpop.f32.mrf.mxu2 }
 0x37a   : > { %v9106_v47 = vpop.eup %4869  ;;  %v3926_v9 = vmul.f32 %v4868_v60, %v3255_v6  ;;  %v3285_v58 = vsel %vm3282_vm11, %v3284_v21, %v3280_v54  ;;  %v3299_v6 = vor.u32 1.1754944e-38, %v3298_v25  ;;  %v933_v15 = vadd.f32 %v932_v35, %v5568_v56 }
 0x37b   : > { %v3602_v2 = vpop.f32.mrf.mxu3  ;;  %v3288_v0 = vmul.f32 %v9106_v47, %v9084_v22  ;;  %v4872_v42 = vpop.eup %4871  ;;  %vm3293_vm13 = vweird.f32 %v9106_v47  ;;  %v3802_v61 = vsub.f32 1.0, %v3285_v58 }
 0x37c   : > { %v3675_v12 = vadd.f32 %v3602_v2, %v924_v40  ;;  %v3989_v8 = vadd.f32 %v3926_v9, %v3863_v4  ;;  %v9128_v14 = vadd.f32 1.0, %v4872_v42  ;;  %vm9146_vm14 = vmor %vm3292_vm12, %vm3293_vm13 }
 0x37d   : > { %v3289_v45 = vsub.f32 1.0, %v3288_v0  ;;  %v3865_v22 = vmul.f32 %v5025_v57, %v3802_v61 }
 0x37e   : > { %4873 = vtanh.f32 %v3675_v12  ;;  %4052 = vst [vmem:[%s5881_s17 + $0x1c8] sm:$0xff] %v3989_v8  ;;  %vm3322_vm4 = vweird.f32 %v9128_v14  ;;  %v3328_v42 = vand.u32 2147483648, %v9128_v14  ;;  %v3326_v16 = vand.u32 2147483647, %v9128_v14 }
 0x37f   : > { %4875 = vrcp.f32 %v9111_v59  ;;  %v3290_v10 = vmul.f32 %v9106_v47, %v3289_v45 }
 0x380   : > { %4877 = vrcp.f32 %v9128_v14  ;;  %v3329_v17 = vor.u32 1.1754944e-38, %v3328_v42  ;;  %vm3327_vm7 = vcmp.eq.f32.partialorder %v3326_v16, 8.507059e+37 }
 0x381   : > { %v3291_v24 = vadd.f32 %v9106_v47, %v3290_v10 }
 0x383   : > { %v3295_v30 = vsel %vm9146_vm14, %v9106_v47, %v3291_v24  ;;  %v5026_v47 = vld [vmem:[%s5123_s26 + $0x1e0] sm:$0xff] }
 0x384   : > { %v4874_v5 = vpop.eup %4873  ;;  %v3300_v55 = vsel %vm3297_vm15, %v3299_v6, %v3295_v30 }
 0x385   : > { %v3927_v62 = vmul.f32 %v4874_v5, %v3270_v18  ;;  %v9131_v20 = vpop.eup %4875  ;;  %v3803_v40 = vsub.f32 1.0, %v3300_v55  ;;  %v935_v18 = vpop.f32.mrf.mxu2 }
 0x386   : > { %v3605_v37 = vpop.f32.mrf.mxu3  ;;  %v3303_v1 = vmul.f32 %v9131_v20, %v9111_v59  ;;  %v4878_v7 = vpop.eup %4877  ;;  %vm3308_vm1 = vweird.f32 %v9131_v20  ;;  %v936_v45 = vadd.f32 %v935_v18, %v5568_v56  ;;  %v5028_v56 = vld [vmem:[%s5123_s26 + $0x1f0] sm:$0xff] }
 0x387   : > { %v3990_v28 = vadd.f32 %v3927_v62, %v3864_v31  ;;  %v3676_v51 = vadd.f32 %v3605_v37, %v927_v52  ;;  %v3318_v33 = vmul.f32 %v4878_v7, %v9128_v14  ;;  %vm9164_vm2 = vmor %vm3307_vm0, %vm3308_vm1  ;;  %v3866_v9 = vmul.f32 %v5026_v47, %v3803_v40  ;;  %v5027_v31 = vld [vmem:[%s5123_s26 + $0x1e8] sm:$0xff] }
 0x388   : > { %v3304_v27 = vsub.f32 1.0, %v3303_v1  ;;  %vm3323_vm5 = vweird.f32 %v4878_v7 }
 0x389   : > { %4053 = vst [vmem:[%s5881_s17 + $0x1d0] sm:$0xff] %v3990_v28  ;;  %4879 = vtanh.f32 %v3676_v51  ;;  %v3319_v34 = vsub.f32 1.0, %v3318_v33  ;;  %vm3324_vm6 = vmor %vm3322_vm4, %vm3323_vm5 }
 0x38a   : > { %v3305_v13 = vmul.f32 %v9131_v20, %v3304_v27 }
 0x38b   : > { %v3320_v63 = vmul.f32 %v4878_v7, %v3319_v34 }
 0x38c   : > { %v3306_v60 = vadd.f32 %v9131_v20, %v3305_v13 }
 0x38d   : > { %v3321_v26 = vadd.f32 %v4878_v7, %v3320_v63 }
 0x38e   : > { %v3608_v49 = vpop.f32.mrf.mxu3  ;;  %v3310_v12 = vsel %vm9164_vm2, %v9131_v20, %v3306_v60 }
 0x38f   : > { %v4880_v23 = vpop.eup %4879  ;;  %v3677_v53 = vadd.f32 %v3608_v49, %v930_v36  ;;  %v3315_v3 = vsel %vm3312_vm3, %v3314_v48, %v3310_v12  ;;  %v3325_v52 = vsel %vm3324_vm6, %v4878_v7, %v3321_v26 }
 0x390   : > { %v3928_v46 = vmul.f32 %v4880_v23, %v3285_v58  ;;  %v3804_v29 = vsub.f32 1.0, %v3315_v3  ;;  %v3330_v20 = vsel %vm3327_vm7, %v3329_v17, %v3325_v52 }
 0x391   : > { %4881 = vtanh.f32 %v3677_v53  ;;  %v3805_v14 = vsub.f32 1.0, %v3330_v20 }
 0x392   : > { %v3991_v39 = vadd.f32 %v3928_v46, %v3865_v22  ;;  %v3867_v62 = vmul.f32 %v5027_v31, %v3804_v29 }
 0x393   : > { %v3868_v10 = vmul.f32 %v5028_v56, %v3805_v14 }
 0x394   : > { %4054 = vst [vmem:[%s5881_s17 + $0x1d8] sm:$0xff] %v3991_v39 }
 0x397   : > { %v4882_v44 = vpop.eup %4881 }
 0x398   : > { %v3929_v2 = vmul.f32 %v4882_v44, %v3300_v55 }
 0x399   : > { %v3611_v8 = vpop.f32.mrf.mxu3 }
 0x39a   : > { %v3678_v59 = vadd.f32 %v3611_v8, %v933_v15  ;;  %v3992_v0 = vadd.f32 %v3929_v2, %v3866_v9 }
 0x39c   : > { %4883 = vtanh.f32 %v3678_v59  ;;  %4055 = vst [vmem:[%s5881_s17 + $0x1e0] sm:$0xff] %v3992_v0 }
 0x3a1   : > { %v3614_v38 = vpop.f32.mrf.mxu3 }
 0x3a2   : > { %v4884_v5 = vpop.eup %4883  ;;  %v3679_v32 = vadd.f32 %v3614_v38, %v936_v45 }
 0x3a3   : > { %v3930_v21 = vmul.f32 %v4884_v5, %v3315_v3 }
 0x3a4   : > { %4885 = vtanh.f32 %v3679_v32 }
 0x3a5   : > { %v3993_v54 = vadd.f32 %v3930_v21, %v3867_v62 }
 0x3a7   : > { %4056 = vst [vmem:[%s5881_s17 + $0x1e8] sm:$0xff] %v3993_v54 }
 0x3aa   : > { %v4886_v37 = vpop.eup %4885 }
 0x3ab   : > { %v3931_v28 = vmul.f32 %v4886_v37, %v3330_v20 }
 0x3ad   : > { %v3994_v51 = vadd.f32 %v3931_v28, %v3868_v10 }
 0x3af   : > { %4057 = vst [vmem:[%s5881_s17 + $0x1f0] sm:$0xff] %v3994_v51 }
 0x3b0 PF: > { %s14_s15 = sadd.s32 1, %s5035_s15  }
 0x3b1   : > { %p11_p4 = scmp.ge.s32.totalorder %s14_s15, 4  }
 0x3b3   :  { %13 = sbr.rel (!%p11_p4) target bundleno = 1 (0x1), region = 66 }

</bundles_post_ra>
